<compile_context>
chip_gen: v7x
topology: tpu7x:2x2x1
jax: 0.10.0
libtpu: 0.0.40
codegen_flags: <defaults>
</compile_context>

<pallas_src>
import functools

import numpy as np
import jax
import jax.numpy as jnp
from jax import lax
from jax.experimental import pallas as pl
from jax.experimental.pallas import tpu as pltpu

BN_EPS = 1e-5
LANE = 128


def _round_up(x, m):
    return (x + m - 1) // m * m


# ------------------------------- kernel ------------------------------------

def down_kernel(x_ref, w1_ref, b1_ref, w2_ref, b2_ref, o_ref,
                pad1_ref, pad2_ref):
    # x_ref   : [1, 4, Hp, Wp, Cin_p] bf16 - the four 2x2 pooling taps
    # w*_ref  : [9, Cin_p, Cout_p]    bf16 - 3x3 taps on the leading dim,
    #                                        BN scale folded into the weights
    # b*_ref  : [1, Cout_p]           f32  - folded BN bias (conv bias folded)
    # o_ref   : [1, Hp, Wp, C2_p]     f32  - lane-dense (C2_p % 128 == 0)
    # pad*_ref: [Hp+2, Wp+2, C]       bf16 - 1-px zero-border scratch per conv
    _, Hp, Wp, C2p = o_ref.shape
    C1p = w1_ref.shape[-1]
    cdt = pad1_ref.dtype  # bf16 compute dtype fed to the MXU

    # ---- MaxPool2d(kernel_size=2, stride=2): elementwise max of the 4 taps -
    pooled = jnp.maximum(jnp.maximum(x_ref[0, 0], x_ref[0, 1]),
                         jnp.maximum(x_ref[0, 2], x_ref[0, 3]))  # [Hp,Wp,Cin_p]

    def conv3x3_bias_relu(pad_ref, src, w_ref, b_ref):
        """3x3 SAME conv as 9 shifted MXU matmuls + bias + ReLU (f32 out)."""
        hp, wp, cin = src.shape
        cout = w_ref.shape[-1]

        # Zero only the 1-pixel border (O(perimeter)), every grid step so the
        # scratch stays correct under megacore "parallel" sharding of the
        # batch axis, then write the interior.
        pad_ref[0:1, :, :] = jnp.zeros((1, wp + 2, cin), cdt)
        pad_ref[hp + 1:hp + 2, :, :] = jnp.zeros((1, wp + 2, cin), cdt)
        pad_ref[:, 0:1, :] = jnp.zeros((hp + 2, 1, cin), cdt)
        pad_ref[:, wp + 1:wp + 2, :] = jnp.zeros((hp + 2, 1, cin), cdt)
        pad_ref[1:hp + 1, 1:wp + 1, :] = src

        # 9 statically shifted views of the padded input, each a lane-dense
        # [hp*wp, cin] x [cin, cout] MXU matmul (bf16 in, f32 accumulation).
        # No im2col buffer is materialized.
        acc = jnp.zeros((hp * wp, cout), jnp.float32)
        for k in range(9):
            dy, dx = k // 3, k % 3
            tap = pad_ref[dy:dy + hp, dx:dx + wp, :].reshape(hp * wp, cin)
            acc = acc + jnp.dot(tap, w_ref[k],
                                preferred_element_type=jnp.float32)

        # Folded-BN bias + ReLU epilogue in f32 (BN scale already in weights).
        return jnp.maximum(acc + b_ref[...], 0.0)  # [hp*wp, cout] f32

    # ---- Conv1 (3x3, pad=1) + folded BN + ReLU ----
    y1 = conv3x3_bias_relu(pad1_ref, pooled, w1_ref, b1_ref)
    y1 = y1.astype(cdt).reshape(Hp, Wp, C1p)

    # ---- Conv2 (3x3, pad=1) + folded BN + ReLU ----
    y2 = conv3x3_bias_relu(pad2_ref, y1, w2_ref, b2_ref)

    # Lane-dense, unmasked output store (C2_p is a multiple of 128).
    o_ref[...] = y2.reshape(1, Hp, Wp, C2p).astype(o_ref.dtype)


# ------------------------------- wrapper ------------------------------------

def down_forward(x_nchw, folded, out_channels):
    """x_nchw: [N, Cin, H, W] float32 -> [N, out_channels, H/2, W/2] float32."""
    w1, b1, w2, b2 = folded
    N, Cin, H, W = x_nchw.shape
    assert H % 2 == 0 and W % 2 == 0, "MaxPool2d(2) path assumes even H, W"
    Hp, Wp = H // 2, W // 2
    Cin_p, C1p = w1.shape[1], w1.shape[2]
    C2p = w2.shape[2]

    # NCHW -> NHWC, bf16 cast, channel zero-pad to the 128-lane width, and the
    # 2x2 pooling-tap gather.  All of this is layout plumbing that XLA fuses
    # with the mandatory layout transpose into a single HBM copy.
    x = jnp.transpose(x_nchw, (0, 2, 3, 1)).astype(jnp.bfloat16)   # [N,H,W,Cin]
    x = jnp.pad(x, ((0, 0), (0, 0), (0, 0), (0, Cin_p - Cin)))     # -> Cin_p
    x = x.reshape(N, Hp, 2, Wp, 2, Cin_p).transpose(0, 2, 4, 1, 3, 5)
    x = x.reshape(N, 4, Hp, Wp, Cin_p)                             # taps on axis 1

    # Explicit VMEM budget: double-buffered in/out blocks + weights + the two
    # 1-px pad scratches + f32 accumulator headroom (review feedback; the
    # scoped default is 16 MiB on v5e, 32 MiB on v6e/v7x).
    in_block = 4 * Hp * Wp * Cin_p * 2
    out_block = Hp * Wp * C2p * 4
    weights = (9 * Cin_p * C1p + 9 * C1p * C2p) * 2 + (C1p + C2p) * 4
    scratch = (Hp + 2) * (Wp + 2) * (Cin_p + C1p) * 2
    temps = 3 * Hp * Wp * max(C1p, C2p) * 4
    est = 2 * (in_block + out_block) + 2 * weights + scratch + temps
    vmem_limit = int(min(64 * 2**20, max(16 * 2**20, 2 * est)))

    out_nhwc = pl.pallas_call(
        down_kernel,
        out_shape=jax.ShapeDtypeStruct((N, Hp, Wp, C2p), jnp.float32),
        grid_spec=pltpu.PrefetchScalarGridSpec(
            num_scalar_prefetch=0,
            grid=(N,),
            in_specs=[
                pl.BlockSpec((1, 4, Hp, Wp, Cin_p), lambda n: (n, 0, 0, 0, 0)),
                pl.BlockSpec((9, Cin_p, C1p), lambda n: (0, 0, 0)),
                pl.BlockSpec((1, C1p), lambda n: (0, 0)),
                pl.BlockSpec((9, C1p, C2p), lambda n: (0, 0, 0)),
                pl.BlockSpec((1, C2p), lambda n: (0, 0)),
            ],
            out_specs=pl.BlockSpec((1, Hp, Wp, C2p), lambda n: (n, 0, 0, 0)),
            scratch_shapes=[
                pltpu.VMEM((Hp + 2, Wp + 2, Cin_p), jnp.bfloat16),  # pad1
                pltpu.VMEM((Hp + 2, Wp + 2, C1p), jnp.bfloat16),    # pad2
            ],
        ),
        compiler_params=pltpu.CompilerParams(
            dimension_semantics=("parallel",),   # batch axis -> both TCs
            vmem_limit_bytes=vmem_limit),
    )(x, w1, b1, w2, b2)

    # Slice away the zero-padded output channels and return NCHW.
    out_nhwc = out_nhwc[..., :out_channels]
    return jnp.transpose(out_nhwc, (0, 3, 1, 2))


# ------------------------- parameter construction --------------------------

def init_raw_params(key, in_channels, out_channels):
    """Deterministic synthetic parameters mirroring the PyTorch layer shapes."""
    ks = jax.random.split(key, 12)

    def conv_w(k, cin, cout):
        fan_in = cin * 9
        return jax.random.normal(k, (3, 3, cin, cout), jnp.float32) / jnp.sqrt(fan_in)

    def bn(k0, k1, k2, k3, c):
        gamma = 1.0 + 0.1 * jax.random.normal(k0, (c,), jnp.float32)
        beta = 0.1 * jax.random.normal(k1, (c,), jnp.float32)
        mean = 0.1 * jax.random.normal(k2, (c,), jnp.float32)
        var = 0.5 + jax.random.uniform(k3, (c,), jnp.float32)
        return gamma, beta, mean, var

    w1 = conv_w(ks[0], in_channels, out_channels)
    cb1 = 0.1 * jax.random.normal(ks[1], (out_channels,), jnp.float32)
    g1, be1, m1, v1 = bn(ks[2], ks[3], ks[4], ks[5], out_channels)

    w2 = conv_w(ks[6], out_channels, out_channels)
    cb2 = 0.1 * jax.random.normal(ks[7], (out_channels,), jnp.float32)
    g2, be2, m2, v2 = bn(ks[8], ks[9], ks[10], ks[11], out_channels)

    return (w1, cb1, g1, be1, m1, v1, w2, cb2, g2, be2, m2, v2)


def fold_params(raw):
    """Fold conv-bias + eval-mode BN into the weights (scale) and a bias, then
    zero-pad all channel dims to a multiple of 128 (lane width).

    conv(x, w) * s == conv(x, w * s), so the BN scale goes into the weights;
    only a per-channel bias add remains in the kernel.  Weights come out as
    [9, Cin_p, Cout_p] bf16 (3x3 taps on the leading dim); padded rows/cols
    are zero so they contribute nothing.
    """
    (w1, cb1, g1, be1, m1, v1, w2, cb2, g2, be2, m2, v2) = raw
    cin, c1 = w1.shape[2], w1.shape[3]
    c2 = w2.shape[3]
    cin_p = _round_up(cin, LANE)
    c1_p = _round_up(c1, LANE)
    c2_p = _round_up(c2, LANE)

    s1 = g1 / jnp.sqrt(v1 + BN_EPS)
    b1 = be1 + (cb1 - m1) * s1
    s2 = g2 / jnp.sqrt(v2 + BN_EPS)
    b2 = be2 + (cb2 - m2) * s2

    def pack_w(w, s, ci_p, co_p):
        wf = (w * s).astype(jnp.bfloat16)                       # (3,3,ci,co)
        wf = jnp.pad(wf, ((0, 0), (0, 0),
                          (0, ci_p - w.shape[2]), (0, co_p - w.shape[3])))
        return wf.reshape(9, ci_p, co_p)

    w1f = pack_w(w1, s1, cin_p, c1_p)
    w2f = pack_w(w2, s2, c1_p, c2_p)
    b1f = jnp.pad(b1, (0, c1_p - c1)).reshape(1, c1_p).astype(jnp.float32)
    b2f = jnp.pad(b2, (0, c2_p - c2)).reshape(1, c2_p).astype(jnp.float32)
    return (w1f, b1f, w2f, b2f)


# ------------------------- pure-JAX reference ------------------------------

def down_reference(x_nchw, raw):
    (w1, cb1, g1, be1, m1, v1, w2, cb2, g2, be2, m2, v2) = raw
    x = jnp.transpose(x_nchw, (0, 2, 3, 1)).astype(jnp.float32)
    x = lax.reduce_window(x, -jnp.inf, lax.max,
                          (1, 2, 2, 1), (1, 2, 2, 1), "VALID")

    def block(x, w, cb, g, be, m, v):
        y = lax.conv_general_dilated(
            x, w, (1, 1), "SAME",
            dimension_numbers=("NHWC", "HWIO", "NHWC")) + cb
        y = (y - m) / jnp.sqrt(v + BN_EPS) * g + be
        return jnp.maximum(y, 0.0)

    x = block(x, w1, cb1, g1, be1, m1, v1)
    x = block(x, w2, cb2, g2, be2, m2, v2)
    return jnp.transpose(x, (0, 3, 1, 2))


if __name__ == "__main__":
    key = jax.random.PRNGKey(0)
    kx, kp = jax.random.split(key)

    N, Cin, H, W = 2, 4, 16, 16
    Cout = 8

    x = jax.random.normal(kx, (N, Cin, H, W), jnp.float32)
    raw = init_raw_params(kp, Cin, Cout)
    folded = fold_params(raw)

    fwd = jax.jit(functools.partial(down_forward, out_channels=Cout))
    out = jax.block_until_ready(fwd(x, folded))
    assert out.shape == (N, Cout, H // 2, W // 2), out.shape

    ref = down_reference(x, raw)
    # Loose tolerance: the kernel feeds bf16 activations/weights to the MXU
    # (f32 accumulation), while the reference conv runs in full f32.
    np.testing.assert_allclose(np.asarray(out), np.asarray(ref),
                               rtol=2e-2, atol=5e-2)

    print("KERNEL_OK")
</pallas_src>

<mosaic_0001>
module attributes {stable_mosaic.version = 11 : i64} {
  func.func @down_kernel(%arg0: i32, %arg1: memref<1x4x8x8x128xbf16, #tpu.memory_space<vmem>>, %arg2: memref<9x128x128xbf16, #tpu.memory_space<vmem>>, %arg3: memref<1x128xf32, #tpu.memory_space<vmem>>, %arg4: memref<9x128x128xbf16, #tpu.memory_space<vmem>>, %arg5: memref<1x128xf32, #tpu.memory_space<vmem>>, %arg6: memref<1x8x8x128xf32, #tpu.memory_space<vmem>>, %arg7: memref<10x10x128xbf16, #tpu.memory_space<vmem>>, %arg8: memref<10x10x128xbf16, #tpu.memory_space<vmem>>) attributes {dimension_semantics = [#tpu.dimension_semantics<parallel>], iteration_bounds = array<i64: 2>, scalar_prefetch = 0 : i64, scratch_operands = 2 : i64, tpu.core_type = #tpu.core_type<tc>, window_params = [{transform_indices = @transform_0, window_bounds = array<i64: 1, 4, 8, 8, 128>}, {pipeline_mode = #tpu.pipeline_mode<synchronous>, transform_indices = @transform_1, window_bounds = array<i64: 9, 128, 128>}, {pipeline_mode = #tpu.pipeline_mode<synchronous>, transform_indices = @transform_2, window_bounds = array<i64: 1, 128>}, {pipeline_mode = #tpu.pipeline_mode<synchronous>, transform_indices = @transform_3, window_bounds = array<i64: 9, 128, 128>}, {pipeline_mode = #tpu.pipeline_mode<synchronous>, transform_indices = @transform_4, window_bounds = array<i64: 1, 128>}, {transform_indices = @transform_5, window_bounds = array<i64: 1, 8, 8, 128>}]} {
    %c0 = arith.constant 0 : index
    %c0_0 = arith.constant 0 : index
    %c0_1 = arith.constant 0 : index
    %c0_2 = arith.constant 0 : index
    %c0_3 = arith.constant 0 : index
    %0 = vector.load %arg1[%c0, %c0_0, %c0_1, %c0_2, %c0_3] : memref<1x4x8x8x128xbf16, #tpu.memory_space<vmem>>, vector<1x1x8x8x128xbf16>
    %1 = vector.shape_cast %0 : vector<1x1x8x8x128xbf16> to vector<8x8x128xbf16>
    %c0_4 = arith.constant 0 : index
    %c1 = arith.constant 1 : index
    %c0_5 = arith.constant 0 : index
    %c0_6 = arith.constant 0 : index
    %c0_7 = arith.constant 0 : index
    %2 = vector.load %arg1[%c0_4, %c1, %c0_5, %c0_6, %c0_7] : memref<1x4x8x8x128xbf16, #tpu.memory_space<vmem>>, vector<1x1x8x8x128xbf16>
    %3 = vector.shape_cast %2 : vector<1x1x8x8x128xbf16> to vector<8x8x128xbf16>
    %4 = arith.maximumf %1, %3 : vector<8x8x128xbf16>
    %c0_8 = arith.constant 0 : index
    %c2 = arith.constant 2 : index
    %c0_9 = arith.constant 0 : index
    %c0_10 = arith.constant 0 : index
    %c0_11 = arith.constant 0 : index
    %5 = vector.load %arg1[%c0_8, %c2, %c0_9, %c0_10, %c0_11] : memref<1x4x8x8x128xbf16, #tpu.memory_space<vmem>>, vector<1x1x8x8x128xbf16>
    %6 = vector.shape_cast %5 : vector<1x1x8x8x128xbf16> to vector<8x8x128xbf16>
    %c0_12 = arith.constant 0 : index
    %c3 = arith.constant 3 : index
    %c0_13 = arith.constant 0 : index
    %c0_14 = arith.constant 0 : index
    %c0_15 = arith.constant 0 : index
    %7 = vector.load %arg1[%c0_12, %c3, %c0_13, %c0_14, %c0_15] : memref<1x4x8x8x128xbf16, #tpu.memory_space<vmem>>, vector<1x1x8x8x128xbf16>
    %8 = vector.shape_cast %7 : vector<1x1x8x8x128xbf16> to vector<8x8x128xbf16>
    %9 = arith.maximumf %6, %8 : vector<8x8x128xbf16>
    %10 = arith.maximumf %4, %9 : vector<8x8x128xbf16>
    %cst = arith.constant 0.000000e+00 : bf16
    %11 = vector.broadcast %cst : bf16 to vector<1x10x128xbf16>
    %c0_16 = arith.constant 0 : index
    %c0_17 = arith.constant 0 : index
    %c0_18 = arith.constant 0 : index
    %12 = vector.load %arg7[%c0_16, %c0_17, %c0_18] : memref<10x10x128xbf16, #tpu.memory_space<vmem>>, vector<1x10x128xbf16>
    tpu.vector_store %arg7[%c0_16, %c0_17, %c0_18], %11 {strides = array<i32>} : memref<10x10x128xbf16, #tpu.memory_space<vmem>>, vector<1x10x128xbf16>,
    %cst_19 = arith.constant 0.000000e+00 : bf16
    %13 = vector.broadcast %cst_19 : bf16 to vector<1x10x128xbf16>
    %c9 = arith.constant 9 : index
    %c0_20 = arith.constant 0 : index
    %c0_21 = arith.constant 0 : index
    %14 = vector.load %arg7[%c9, %c0_20, %c0_21] : memref<10x10x128xbf16, #tpu.memory_space<vmem>>, vector<1x10x128xbf16>
    tpu.vector_store %arg7[%c9, %c0_20, %c0_21], %13 {strides = array<i32>} : memref<10x10x128xbf16, #tpu.memory_space<vmem>>, vector<1x10x128xbf16>,
    %cst_22 = arith.constant 0.000000e+00 : bf16
    %15 = vector.broadcast %cst_22 : bf16 to vector<10x1x128xbf16>
    %c0_23 = arith.constant 0 : index
    %c0_24 = arith.constant 0 : index
    %c0_25 = arith.constant 0 : index
    %16 = vector.load %arg7[%c0_23, %c0_24, %c0_25] : memref<10x10x128xbf16, #tpu.memory_space<vmem>>, vector<10x1x128xbf16>
    tpu.vector_store %arg7[%c0_23, %c0_24, %c0_25], %15 {strides = array<i32>} : memref<10x10x128xbf16, #tpu.memory_space<vmem>>, vector<10x1x128xbf16>,
    %cst_26 = arith.constant 0.000000e+00 : bf16
    %17 = vector.broadcast %cst_26 : bf16 to vector<10x1x128xbf16>
    %c0_27 = arith.constant 0 : index
    %c9_28 = arith.constant 9 : index
    %c0_29 = arith.constant 0 : index
    %18 = vector.load %arg7[%c0_27, %c9_28, %c0_29] : memref<10x10x128xbf16, #tpu.memory_space<vmem>>, vector<10x1x128xbf16>
    tpu.vector_store %arg7[%c0_27, %c9_28, %c0_29], %17 {strides = array<i32>} : memref<10x10x128xbf16, #tpu.memory_space<vmem>>, vector<10x1x128xbf16>,
    %c1_30 = arith.constant 1 : index
    %c1_31 = arith.constant 1 : index
    %c0_32 = arith.constant 0 : index
    %19 = vector.load %arg7[%c1_30, %c1_31, %c0_32] : memref<10x10x128xbf16, #tpu.memory_space<vmem>>, vector<8x8x128xbf16>
    tpu.vector_store %arg7[%c1_30, %c1_31, %c0_32], %10 {strides = array<i32>} : memref<10x10x128xbf16, #tpu.memory_space<vmem>>, vector<8x8x128xbf16>,
    %cst_33 = arith.constant 0.000000e+00 : f32
    %20 = vector.broadcast %cst_33 : f32 to vector<64x128xf32>
    %c0_34 = arith.constant 0 : index
    %c0_35 = arith.constant 0 : index
    %c0_36 = arith.constant 0 : index
    %21 = vector.load %arg7[%c0_34, %c0_35, %c0_36] : memref<10x10x128xbf16, #tpu.memory_space<vmem>>, vector<8x8x128xbf16>
    %22 = vector.shape_cast %21 : vector<8x8x128xbf16> to vector<64x128xbf16>
    %c0_37 = arith.constant 0 : index
    %c0_38 = arith.constant 0 : index
    %c0_39 = arith.constant 0 : index
    %23 = vector.load %arg2[%c0_37, %c0_38, %c0_39] : memref<9x128x128xbf16, #tpu.memory_space<vmem>>, vector<1x128x128xbf16>
    %24 = vector.shape_cast %23 : vector<1x128x128xbf16> to vector<128x128xbf16>
    %cst_40 = arith.constant dense<0.000000e+00> : vector<64x128xf32>
    %25 = tpu.matmul %22, %24, %cst_40 {dimension_numbers = #tpu.dot_dimension_numbers<[1], [0], [0], [1], [0, 0, 1, 1], [], []>} : vector<64x128xbf16>, vector<128x128xbf16>, vector<64x128xf32> -> vector<64x128xf32>
    %26 = arith.addf %20, %25 : vector<64x128xf32>
    %c0_41 = arith.constant 0 : index
    %c1_42 = arith.constant 1 : index
    %c0_43 = arith.constant 0 : index
    %27 = vector.load %arg7[%c0_41, %c1_42, %c0_43] : memref<10x10x128xbf16, #tpu.memory_space<vmem>>, vector<8x8x128xbf16>
    %28 = vector.shape_cast %27 : vector<8x8x128xbf16> to vector<64x128xbf16>
    %c1_44 = arith.constant 1 : index
    %c0_45 = arith.constant 0 : index
    %c0_46 = arith.constant 0 : index
    %29 = vector.load %arg2[%c1_44, %c0_45, %c0_46] : memref<9x128x128xbf16, #tpu.memory_space<vmem>>, vector<1x128x128xbf16>
    %30 = vector.shape_cast %29 : vector<1x128x128xbf16> to vector<128x128xbf16>
    %cst_47 = arith.constant dense<0.000000e+00> : vector<64x128xf32>
    %31 = tpu.matmul %28, %30, %cst_47 {dimension_numbers = #tpu.dot_dimension_numbers<[1], [0], [0], [1], [0, 0, 1, 1], [], []>} : vector<64x128xbf16>, vector<128x128xbf16>, vector<64x128xf32> -> vector<64x128xf32>
    %32 = arith.addf %26, %31 : vector<64x128xf32>
    %c0_48 = arith.constant 0 : index
    %c2_49 = arith.constant 2 : index
    %c0_50 = arith.constant 0 : index
    %33 = vector.load %arg7[%c0_48, %c2_49, %c0_50] : memref<10x10x128xbf16, #tpu.memory_space<vmem>>, vector<8x8x128xbf16>
    %34 = vector.shape_cast %33 : vector<8x8x128xbf16> to vector<64x128xbf16>
    %c2_51 = arith.constant 2 : index
    %c0_52 = arith.constant 0 : index
    %c0_53 = arith.constant 0 : index
    %35 = vector.load %arg2[%c2_51, %c0_52, %c0_53] : memref<9x128x128xbf16, #tpu.memory_space<vmem>>, vector<1x128x128xbf16>
    %36 = vector.shape_cast %35 : vector<1x128x128xbf16> to vector<128x128xbf16>
    %cst_54 = arith.constant dense<0.000000e+00> : vector<64x128xf32>
    %37 = tpu.matmul %34, %36, %cst_54 {dimension_numbers = #tpu.dot_dimension_numbers<[1], [0], [0], [1], [0, 0, 1, 1], [], []>} : vector<64x128xbf16>, vector<128x128xbf16>, vector<64x128xf32> -> vector<64x128xf32>
    %38 = arith.addf %32, %37 : vector<64x128xf32>
    %c1_55 = arith.constant 1 : index
    %c0_56 = arith.constant 0 : index
    %c0_57 = arith.constant 0 : index
    %39 = vector.load %arg7[%c1_55, %c0_56, %c0_57] : memref<10x10x128xbf16, #tpu.memory_space<vmem>>, vector<8x8x128xbf16>
    %40 = vector.shape_cast %39 : vector<8x8x128xbf16> to vector<64x128xbf16>
    %c3_58 = arith.constant 3 : index
    %c0_59 = arith.constant 0 : index
    %c0_60 = arith.constant 0 : index
    %41 = vector.load %arg2[%c3_58, %c0_59, %c0_60] : memref<9x128x128xbf16, #tpu.memory_space<vmem>>, vector<1x128x128xbf16>
    %42 = vector.shape_cast %41 : vector<1x128x128xbf16> to vector<128x128xbf16>
    %cst_61 = arith.constant dense<0.000000e+00> : vector<64x128xf32>
    %43 = tpu.matmul %40, %42, %cst_61 {dimension_numbers = #tpu.dot_dimension_numbers<[1], [0], [0], [1], [0, 0, 1, 1], [], []>} : vector<64x128xbf16>, vector<128x128xbf16>, vector<64x128xf32> -> vector<64x128xf32>
    %44 = arith.addf %38, %43 : vector<64x128xf32>
    %c1_62 = arith.constant 1 : index
    %c1_63 = arith.constant 1 : index
    %c0_64 = arith.constant 0 : index
    %45 = vector.load %arg7[%c1_62, %c1_63, %c0_64] : memref<10x10x128xbf16, #tpu.memory_space<vmem>>, vector<8x8x128xbf16>
    %46 = vector.shape_cast %45 : vector<8x8x128xbf16> to vector<64x128xbf16>
    %c4 = arith.constant 4 : index
    %c0_65 = arith.constant 0 : index
    %c0_66 = arith.constant 0 : index
    %47 = vector.load %arg2[%c4, %c0_65, %c0_66] : memref<9x128x128xbf16, #tpu.memory_space<vmem>>, vector<1x128x128xbf16>
    %48 = vector.shape_cast %47 : vector<1x128x128xbf16> to vector<128x128xbf16>
    %cst_67 = arith.constant dense<0.000000e+00> : vector<64x128xf32>
    %49 = tpu.matmul %46, %48, %cst_67 {dimension_numbers = #tpu.dot_dimension_numbers<[1], [0], [0], [1], [0, 0, 1, 1], [], []>} : vector<64x128xbf16>, vector<128x128xbf16>, vector<64x128xf32> -> vector<64x128xf32>
    %50 = arith.addf %44, %49 : vector<64x128xf32>
    %c1_68 = arith.constant 1 : index
    %c2_69 = arith.constant 2 : index
    %c0_70 = arith.constant 0 : index
    %51 = vector.load %arg7[%c1_68, %c2_69, %c0_70] : memref<10x10x128xbf16, #tpu.memory_space<vmem>>, vector<8x8x128xbf16>
    %52 = vector.shape_cast %51 : vector<8x8x128xbf16> to vector<64x128xbf16>
    %c5 = arith.constant 5 : index
    %c0_71 = arith.constant 0 : index
    %c0_72 = arith.constant 0 : index
    %53 = vector.load %arg2[%c5, %c0_71, %c0_72] : memref<9x128x128xbf16, #tpu.memory_space<vmem>>, vector<1x128x128xbf16>
    %54 = vector.shape_cast %53 : vector<1x128x128xbf16> to vector<128x128xbf16>
    %cst_73 = arith.constant dense<0.000000e+00> : vector<64x128xf32>
    %55 = tpu.matmul %52, %54, %cst_73 {dimension_numbers = #tpu.dot_dimension_numbers<[1], [0], [0], [1], [0, 0, 1, 1], [], []>} : vector<64x128xbf16>, vector<128x128xbf16>, vector<64x128xf32> -> vector<64x128xf32>
    %56 = arith.addf %50, %55 : vector<64x128xf32>
    %c2_74 = arith.constant 2 : index
    %c0_75 = arith.constant 0 : index
    %c0_76 = arith.constant 0 : index
    %57 = vector.load %arg7[%c2_74, %c0_75, %c0_76] : memref<10x10x128xbf16, #tpu.memory_space<vmem>>, vector<8x8x128xbf16>
    %58 = vector.shape_cast %57 : vector<8x8x128xbf16> to vector<64x128xbf16>
    %c6 = arith.constant 6 : index
    %c0_77 = arith.constant 0 : index
    %c0_78 = arith.constant 0 : index
    %59 = vector.load %arg2[%c6, %c0_77, %c0_78] : memref<9x128x128xbf16, #tpu.memory_space<vmem>>, vector<1x128x128xbf16>
    %60 = vector.shape_cast %59 : vector<1x128x128xbf16> to vector<128x128xbf16>
    %cst_79 = arith.constant dense<0.000000e+00> : vector<64x128xf32>
    %61 = tpu.matmul %58, %60, %cst_79 {dimension_numbers = #tpu.dot_dimension_numbers<[1], [0], [0], [1], [0, 0, 1, 1], [], []>} : vector<64x128xbf16>, vector<128x128xbf16>, vector<64x128xf32> -> vector<64x128xf32>
    %62 = arith.addf %56, %61 : vector<64x128xf32>
    %c2_80 = arith.constant 2 : index
    %c1_81 = arith.constant 1 : index
    %c0_82 = arith.constant 0 : index
    %63 = vector.load %arg7[%c2_80, %c1_81, %c0_82] : memref<10x10x128xbf16, #tpu.memory_space<vmem>>, vector<8x8x128xbf16>
    %64 = vector.shape_cast %63 : vector<8x8x128xbf16> to vector<64x128xbf16>
    %c7 = arith.constant 7 : index
    %c0_83 = arith.constant 0 : index
    %c0_84 = arith.constant 0 : index
    %65 = vector.load %arg2[%c7, %c0_83, %c0_84] : memref<9x128x128xbf16, #tpu.memory_space<vmem>>, vector<1x128x128xbf16>
    %66 = vector.shape_cast %65 : vector<1x128x128xbf16> to vector<128x128xbf16>
    %cst_85 = arith.constant dense<0.000000e+00> : vector<64x128xf32>
    %67 = tpu.matmul %64, %66, %cst_85 {dimension_numbers = #tpu.dot_dimension_numbers<[1], [0], [0], [1], [0, 0, 1, 1], [], []>} : vector<64x128xbf16>, vector<128x128xbf16>, vector<64x128xf32> -> vector<64x128xf32>
    %68 = arith.addf %62, %67 : vector<64x128xf32>
    %c2_86 = arith.constant 2 : index
    %c2_87 = arith.constant 2 : index
    %c0_88 = arith.constant 0 : index
    %69 = vector.load %arg7[%c2_86, %c2_87, %c0_88] : memref<10x10x128xbf16, #tpu.memory_space<vmem>>, vector<8x8x128xbf16>
    %70 = vector.shape_cast %69 : vector<8x8x128xbf16> to vector<64x128xbf16>
    %c8 = arith.constant 8 : index
    %c0_89 = arith.constant 0 : index
    %c0_90 = arith.constant 0 : index
    %71 = vector.load %arg2[%c8, %c0_89, %c0_90] : memref<9x128x128xbf16, #tpu.memory_space<vmem>>, vector<1x128x128xbf16>
    %72 = vector.shape_cast %71 : vector<1x128x128xbf16> to vector<128x128xbf16>
    %cst_91 = arith.constant dense<0.000000e+00> : vector<64x128xf32>
    %73 = tpu.matmul %70, %72, %cst_91 {dimension_numbers = #tpu.dot_dimension_numbers<[1], [0], [0], [1], [0, 0, 1, 1], [], []>} : vector<64x128xbf16>, vector<128x128xbf16>, vector<64x128xf32> -> vector<64x128xf32>
    %74 = arith.addf %68, %73 : vector<64x128xf32>
    %c0_92 = arith.constant 0 : index
    %c0_93 = arith.constant 0 : index
    %75 = vector.load %arg3[%c0_92, %c0_93] : memref<1x128xf32, #tpu.memory_space<vmem>>, vector<1x128xf32>
    %76 = vector.broadcast %75 : vector<1x128xf32> to vector<64x128xf32>
    %77 = arith.addf %74, %76 : vector<64x128xf32>
    %cst_94 = arith.constant 0.000000e+00 : f32
    %78 = vector.broadcast %cst_94 : f32 to vector<64x128xf32>
    %79 = arith.maximumf %77, %78 : vector<64x128xf32>
    %80 = arith.truncf %79 : vector<64x128xf32> to vector<64x128xbf16>
    %81 = vector.shape_cast %80 : vector<64x128xbf16> to vector<8x8x128xbf16>
    %cst_95 = arith.constant 0.000000e+00 : bf16
    %82 = vector.broadcast %cst_95 : bf16 to vector<1x10x128xbf16>
    %c0_96 = arith.constant 0 : index
    %c0_97 = arith.constant 0 : index
    %c0_98 = arith.constant 0 : index
    %83 = vector.load %arg8[%c0_96, %c0_97, %c0_98] : memref<10x10x128xbf16, #tpu.memory_space<vmem>>, vector<1x10x128xbf16>
    tpu.vector_store %arg8[%c0_96, %c0_97, %c0_98], %82 {strides = array<i32>} : memref<10x10x128xbf16, #tpu.memory_space<vmem>>, vector<1x10x128xbf16>,
    %cst_99 = arith.constant 0.000000e+00 : bf16
    %84 = vector.broadcast %cst_99 : bf16 to vector<1x10x128xbf16>
    %c9_100 = arith.constant 9 : index
    %c0_101 = arith.constant 0 : index
    %c0_102 = arith.constant 0 : index
    %85 = vector.load %arg8[%c9_100, %c0_101, %c0_102] : memref<10x10x128xbf16, #tpu.memory_space<vmem>>, vector<1x10x128xbf16>
    tpu.vector_store %arg8[%c9_100, %c0_101, %c0_102], %84 {strides = array<i32>} : memref<10x10x128xbf16, #tpu.memory_space<vmem>>, vector<1x10x128xbf16>,
    %cst_103 = arith.constant 0.000000e+00 : bf16
    %86 = vector.broadcast %cst_103 : bf16 to vector<10x1x128xbf16>
    %c0_104 = arith.constant 0 : index
    %c0_105 = arith.constant 0 : index
    %c0_106 = arith.constant 0 : index
    %87 = vector.load %arg8[%c0_104, %c0_105, %c0_106] : memref<10x10x128xbf16, #tpu.memory_space<vmem>>, vector<10x1x128xbf16>
    tpu.vector_store %arg8[%c0_104, %c0_105, %c0_106], %86 {strides = array<i32>} : memref<10x10x128xbf16, #tpu.memory_space<vmem>>, vector<10x1x128xbf16>,
    %cst_107 = arith.constant 0.000000e+00 : bf16
    %88 = vector.broadcast %cst_107 : bf16 to vector<10x1x128xbf16>
    %c0_108 = arith.constant 0 : index
    %c9_109 = arith.constant 9 : index
    %c0_110 = arith.constant 0 : index
    %89 = vector.load %arg8[%c0_108, %c9_109, %c0_110] : memref<10x10x128xbf16, #tpu.memory_space<vmem>>, vector<10x1x128xbf16>
    tpu.vector_store %arg8[%c0_108, %c9_109, %c0_110], %88 {strides = array<i32>} : memref<10x10x128xbf16, #tpu.memory_space<vmem>>, vector<10x1x128xbf16>,
    %c1_111 = arith.constant 1 : index
    %c1_112 = arith.constant 1 : index
    %c0_113 = arith.constant 0 : index
    %90 = vector.load %arg8[%c1_111, %c1_112, %c0_113] : memref<10x10x128xbf16, #tpu.memory_space<vmem>>, vector<8x8x128xbf16>
    tpu.vector_store %arg8[%c1_111, %c1_112, %c0_113], %81 {strides = array<i32>} : memref<10x10x128xbf16, #tpu.memory_space<vmem>>, vector<8x8x128xbf16>,
    %cst_114 = arith.constant 0.000000e+00 : f32
    %91 = vector.broadcast %cst_114 : f32 to vector<64x128xf32>
    %c0_115 = arith.constant 0 : index
    %c0_116 = arith.constant 0 : index
    %c0_117 = arith.constant 0 : index
    %92 = vector.load %arg8[%c0_115, %c0_116, %c0_117] : memref<10x10x128xbf16, #tpu.memory_space<vmem>>, vector<8x8x128xbf16>
    %93 = vector.shape_cast %92 : vector<8x8x128xbf16> to vector<64x128xbf16>
    %c0_118 = arith.constant 0 : index
    %c0_119 = arith.constant 0 : index
    %c0_120 = arith.constant 0 : index
    %94 = vector.load %arg4[%c0_118, %c0_119, %c0_120] : memref<9x128x128xbf16, #tpu.memory_space<vmem>>, vector<1x128x128xbf16>
    %95 = vector.shape_cast %94 : vector<1x128x128xbf16> to vector<128x128xbf16>
    %cst_121 = arith.constant dense<0.000000e+00> : vector<64x128xf32>
    %96 = tpu.matmul %93, %95, %cst_121 {dimension_numbers = #tpu.dot_dimension_numbers<[1], [0], [0], [1], [0, 0, 1, 1], [], []>} : vector<64x128xbf16>, vector<128x128xbf16>, vector<64x128xf32> -> vector<64x128xf32>
    %97 = arith.addf %91, %96 : vector<64x128xf32>
    %c0_122 = arith.constant 0 : index
    %c1_123 = arith.constant 1 : index
    %c0_124 = arith.constant 0 : index
    %98 = vector.load %arg8[%c0_122, %c1_123, %c0_124] : memref<10x10x128xbf16, #tpu.memory_space<vmem>>, vector<8x8x128xbf16>
    %99 = vector.shape_cast %98 : vector<8x8x128xbf16> to vector<64x128xbf16>
    %c1_125 = arith.constant 1 : index
    %c0_126 = arith.constant 0 : index
    %c0_127 = arith.constant 0 : index
    %100 = vector.load %arg4[%c1_125, %c0_126, %c0_127] : memref<9x128x128xbf16, #tpu.memory_space<vmem>>, vector<1x128x128xbf16>
    %101 = vector.shape_cast %100 : vector<1x128x128xbf16> to vector<128x128xbf16>
    %cst_128 = arith.constant dense<0.000000e+00> : vector<64x128xf32>
    %102 = tpu.matmul %99, %101, %cst_128 {dimension_numbers = #tpu.dot_dimension_numbers<[1], [0], [0], [1], [0, 0, 1, 1], [], []>} : vector<64x128xbf16>, vector<128x128xbf16>, vector<64x128xf32> -> vector<64x128xf32>
    %103 = arith.addf %97, %102 : vector<64x128xf32>
    %c0_129 = arith.constant 0 : index
    %c2_130 = arith.constant 2 : index
    %c0_131 = arith.constant 0 : index
    %104 = vector.load %arg8[%c0_129, %c2_130, %c0_131] : memref<10x10x128xbf16, #tpu.memory_space<vmem>>, vector<8x8x128xbf16>
    %105 = vector.shape_cast %104 : vector<8x8x128xbf16> to vector<64x128xbf16>
    %c2_132 = arith.constant 2 : index
    %c0_133 = arith.constant 0 : index
    %c0_134 = arith.constant 0 : index
    %106 = vector.load %arg4[%c2_132, %c0_133, %c0_134] : memref<9x128x128xbf16, #tpu.memory_space<vmem>>, vector<1x128x128xbf16>
    %107 = vector.shape_cast %106 : vector<1x128x128xbf16> to vector<128x128xbf16>
    %cst_135 = arith.constant dense<0.000000e+00> : vector<64x128xf32>
    %108 = tpu.matmul %105, %107, %cst_135 {dimension_numbers = #tpu.dot_dimension_numbers<[1], [0], [0], [1], [0, 0, 1, 1], [], []>} : vector<64x128xbf16>, vector<128x128xbf16>, vector<64x128xf32> -> vector<64x128xf32>
    %109 = arith.addf %103, %108 : vector<64x128xf32>
    %c1_136 = arith.constant 1 : index
    %c0_137 = arith.constant 0 : index
    %c0_138 = arith.constant 0 : index
    %110 = vector.load %arg8[%c1_136, %c0_137, %c0_138] : memref<10x10x128xbf16, #tpu.memory_space<vmem>>, vector<8x8x128xbf16>
    %111 = vector.shape_cast %110 : vector<8x8x128xbf16> to vector<64x128xbf16>
    %c3_139 = arith.constant 3 : index
    %c0_140 = arith.constant 0 : index
    %c0_141 = arith.constant 0 : index
    %112 = vector.load %arg4[%c3_139, %c0_140, %c0_141] : memref<9x128x128xbf16, #tpu.memory_space<vmem>>, vector<1x128x128xbf16>
    %113 = vector.shape_cast %112 : vector<1x128x128xbf16> to vector<128x128xbf16>
    %cst_142 = arith.constant dense<0.000000e+00> : vector<64x128xf32>
    %114 = tpu.matmul %111, %113, %cst_142 {dimension_numbers = #tpu.dot_dimension_numbers<[1], [0], [0], [1], [0, 0, 1, 1], [], []>} : vector<64x128xbf16>, vector<128x128xbf16>, vector<64x128xf32> -> vector<64x128xf32>
    %115 = arith.addf %109, %114 : vector<64x128xf32>
    %c1_143 = arith.constant 1 : index
    %c1_144 = arith.constant 1 : index
    %c0_145 = arith.constant 0 : index
    %116 = vector.load %arg8[%c1_143, %c1_144, %c0_145] : memref<10x10x128xbf16, #tpu.memory_space<vmem>>, vector<8x8x128xbf16>
    %117 = vector.shape_cast %116 : vector<8x8x128xbf16> to vector<64x128xbf16>
    %c4_146 = arith.constant 4 : index
    %c0_147 = arith.constant 0 : index
    %c0_148 = arith.constant 0 : index
    %118 = vector.load %arg4[%c4_146, %c0_147, %c0_148] : memref<9x128x128xbf16, #tpu.memory_space<vmem>>, vector<1x128x128xbf16>
    %119 = vector.shape_cast %118 : vector<1x128x128xbf16> to vector<128x128xbf16>
    %cst_149 = arith.constant dense<0.000000e+00> : vector<64x128xf32>
    %120 = tpu.matmul %117, %119, %cst_149 {dimension_numbers = #tpu.dot_dimension_numbers<[1], [0], [0], [1], [0, 0, 1, 1], [], []>} : vector<64x128xbf16>, vector<128x128xbf16>, vector<64x128xf32> -> vector<64x128xf32>
    %121 = arith.addf %115, %120 : vector<64x128xf32>
    %c1_150 = arith.constant 1 : index
    %c2_151 = arith.constant 2 : index
    %c0_152 = arith.constant 0 : index
    %122 = vector.load %arg8[%c1_150, %c2_151, %c0_152] : memref<10x10x128xbf16, #tpu.memory_space<vmem>>, vector<8x8x128xbf16>
    %123 = vector.shape_cast %122 : vector<8x8x128xbf16> to vector<64x128xbf16>
    %c5_153 = arith.constant 5 : index
    %c0_154 = arith.constant 0 : index
    %c0_155 = arith.constant 0 : index
    %124 = vector.load %arg4[%c5_153, %c0_154, %c0_155] : memref<9x128x128xbf16, #tpu.memory_space<vmem>>, vector<1x128x128xbf16>
    %125 = vector.shape_cast %124 : vector<1x128x128xbf16> to vector<128x128xbf16>
    %cst_156 = arith.constant dense<0.000000e+00> : vector<64x128xf32>
    %126 = tpu.matmul %123, %125, %cst_156 {dimension_numbers = #tpu.dot_dimension_numbers<[1], [0], [0], [1], [0, 0, 1, 1], [], []>} : vector<64x128xbf16>, vector<128x128xbf16>, vector<64x128xf32> -> vector<64x128xf32>
    %127 = arith.addf %121, %126 : vector<64x128xf32>
    %c2_157 = arith.constant 2 : index
    %c0_158 = arith.constant 0 : index
    %c0_159 = arith.constant 0 : index
    %128 = vector.load %arg8[%c2_157, %c0_158, %c0_159] : memref<10x10x128xbf16, #tpu.memory_space<vmem>>, vector<8x8x128xbf16>
    %129 = vector.shape_cast %128 : vector<8x8x128xbf16> to vector<64x128xbf16>
    %c6_160 = arith.constant 6 : index
    %c0_161 = arith.constant 0 : index
    %c0_162 = arith.constant 0 : index
    %130 = vector.load %arg4[%c6_160, %c0_161, %c0_162] : memref<9x128x128xbf16, #tpu.memory_space<vmem>>, vector<1x128x128xbf16>
    %131 = vector.shape_cast %130 : vector<1x128x128xbf16> to vector<128x128xbf16>
    %cst_163 = arith.constant dense<0.000000e+00> : vector<64x128xf32>
    %132 = tpu.matmul %129, %131, %cst_163 {dimension_numbers = #tpu.dot_dimension_numbers<[1], [0], [0], [1], [0, 0, 1, 1], [], []>} : vector<64x128xbf16>, vector<128x128xbf16>, vector<64x128xf32> -> vector<64x128xf32>
    %133 = arith.addf %127, %132 : vector<64x128xf32>
    %c2_164 = arith.constant 2 : index
    %c1_165 = arith.constant 1 : index
    %c0_166 = arith.constant 0 : index
    %134 = vector.load %arg8[%c2_164, %c1_165, %c0_166] : memref<10x10x128xbf16, #tpu.memory_space<vmem>>, vector<8x8x128xbf16>
    %135 = vector.shape_cast %134 : vector<8x8x128xbf16> to vector<64x128xbf16>
    %c7_167 = arith.constant 7 : index
    %c0_168 = arith.constant 0 : index
    %c0_169 = arith.constant 0 : index
    %136 = vector.load %arg4[%c7_167, %c0_168, %c0_169] : memref<9x128x128xbf16, #tpu.memory_space<vmem>>, vector<1x128x128xbf16>
    %137 = vector.shape_cast %136 : vector<1x128x128xbf16> to vector<128x128xbf16>
    %cst_170 = arith.constant dense<0.000000e+00> : vector<64x128xf32>
    %138 = tpu.matmul %135, %137, %cst_170 {dimension_numbers = #tpu.dot_dimension_numbers<[1], [0], [0], [1], [0, 0, 1, 1], [], []>} : vector<64x128xbf16>, vector<128x128xbf16>, vector<64x128xf32> -> vector<64x128xf32>
    %139 = arith.addf %133, %138 : vector<64x128xf32>
    %c2_171 = arith.constant 2 : index
    %c2_172 = arith.constant 2 : index
    %c0_173 = arith.constant 0 : index
    %140 = vector.load %arg8[%c2_171, %c2_172, %c0_173] : memref<10x10x128xbf16, #tpu.memory_space<vmem>>, vector<8x8x128xbf16>
    %141 = vector.shape_cast %140 : vector<8x8x128xbf16> to vector<64x128xbf16>
    %c8_174 = arith.constant 8 : index
    %c0_175 = arith.constant 0 : index
    %c0_176 = arith.constant 0 : index
    %142 = vector.load %arg4[%c8_174, %c0_175, %c0_176] : memref<9x128x128xbf16, #tpu.memory_space<vmem>>, vector<1x128x128xbf16>
    %143 = vector.shape_cast %142 : vector<1x128x128xbf16> to vector<128x128xbf16>
    %cst_177 = arith.constant dense<0.000000e+00> : vector<64x128xf32>
    %144 = tpu.matmul %141, %143, %cst_177 {dimension_numbers = #tpu.dot_dimension_numbers<[1], [0], [0], [1], [0, 0, 1, 1], [], []>} : vector<64x128xbf16>, vector<128x128xbf16>, vector<64x128xf32> -> vector<64x128xf32>
    %145 = arith.addf %139, %144 : vector<64x128xf32>
    %c0_178 = arith.constant 0 : index
    %c0_179 = arith.constant 0 : index
    %146 = vector.load %arg5[%c0_178, %c0_179] : memref<1x128xf32, #tpu.memory_space<vmem>>, vector<1x128xf32>
    %147 = vector.broadcast %146 : vector<1x128xf32> to vector<64x128xf32>
    %148 = arith.addf %145, %147 : vector<64x128xf32>
    %cst_180 = arith.constant 0.000000e+00 : f32
    %149 = vector.broadcast %cst_180 : f32 to vector<64x128xf32>
    %150 = arith.maximumf %148, %149 : vector<64x128xf32>
    %151 = vector.shape_cast %150 : vector<64x128xf32> to vector<1x8x8x128xf32>
    %c0_181 = arith.constant 0 : index
    %c0_182 = arith.constant 0 : index
    %c0_183 = arith.constant 0 : index
    %c0_184 = arith.constant 0 : index
    %152 = vector.load %arg6[%c0_181, %c0_182, %c0_183, %c0_184] : memref<1x8x8x128xf32, #tpu.memory_space<vmem>>, vector<1x8x8x128xf32>
    tpu.vector_store %arg6[%c0_181, %c0_182, %c0_183, %c0_184], %151 {strides = array<i32>} : memref<1x8x8x128xf32, #tpu.memory_space<vmem>>, vector<1x8x8x128xf32>,
    return
  }
  func.func @transform_0(%arg0: i32) -> (i32, i32, i32, i32, i32) {
    %c0_i32 = arith.constant 0 : i32
    %c0_i32_0 = arith.constant 0 : i32
    %c0_i32_1 = arith.constant 0 : i32
    %c0_i32_2 = arith.constant 0 : i32
    %c0_i32_3 = arith.constant 0 : i32
    return %arg0, %c0_i32, %c0_i32_0, %c0_i32_1, %c0_i32_2 : i32, i32, i32, i32, i32
  }
  func.func @transform_1(%arg0: i32) -> (i32, i32, i32) {
    %c0_i32 = arith.constant 0 : i32
    %c0_i32_0 = arith.constant 0 : i32
    %c0_i32_1 = arith.constant 0 : i32
    %c0_i32_2 = arith.constant 0 : i32
    return %c0_i32, %c0_i32_0, %c0_i32_1 : i32, i32, i32
  }
  func.func @transform_2(%arg0: i32) -> (i32, i32) {
    %c0_i32 = arith.constant 0 : i32
    %c0_i32_0 = arith.constant 0 : i32
    %c0_i32_1 = arith.constant 0 : i32
    return %c0_i32, %c0_i32_0 : i32, i32
  }
  func.func @transform_3(%arg0: i32) -> (i32, i32, i32) {
    %c0_i32 = arith.constant 0 : i32
    %c0_i32_0 = arith.constant 0 : i32
    %c0_i32_1 = arith.constant 0 : i32
    %c0_i32_2 = arith.constant 0 : i32
    return %c0_i32, %c0_i32_0, %c0_i32_1 : i32, i32, i32
  }
  func.func @transform_4(%arg0: i32) -> (i32, i32) {
    %c0_i32 = arith.constant 0 : i32
    %c0_i32_0 = arith.constant 0 : i32
    %c0_i32_1 = arith.constant 0 : i32
    return %c0_i32, %c0_i32_0 : i32, i32
  }
  func.func @transform_5(%arg0: i32) -> (i32, i32, i32, i32) {
    %c0_i32 = arith.constant 0 : i32
    %c0_i32_0 = arith.constant 0 : i32
    %c0_i32_1 = arith.constant 0 : i32
    %c0_i32_2 = arith.constant 0 : i32
    return %arg0, %c0_i32, %c0_i32_0, %c0_i32_1 : i32, i32, i32, i32
  }
}

</mosaic_0001>

<bundles_post_ra>
// kernel: down_forward.1
= control target key start
LH: loop header
LB: loop body
LE: loop exit
PB: predicated region body
PF: predicated region fallthrough
CT: control target
= control target key end

     0   :  { %s6310_s18 = smov 0   ;;  %s7492_s0 = inlined_call_operand.vmem [shape: bf16[2,4,8,8,128], index: 0, kind: input, shape index: {}]   ;;  %s7493_s1 = inlined_call_operand.vmem [shape: bf16[9,128,128], index: 1, kind: input, shape index: {}]   ;;  %s7494_s2 = inlined_call_operand.vmem [shape: f32[1,128], index: 2, kind: input, shape index: {}]   ;;  %s7495_s3 = inlined_call_operand.vmem [shape: bf16[9,128,128], index: 3, kind: input, shape index: {}]   ;;  %s7496_s4 = inlined_call_operand.vmem [shape: f32[1,128], index: 4, kind: input, shape index: {}]   ;;  %s7497_s5 = inlined_call_operand.vmem [shape: f32[2,8,8,128], index: 5, kind: output, shape index: {}]  }
   0x1 LB: > { %s4743_s19 = sadd.s32 4294967295, %s6277_s18   ;;  %p4747_p0 = scmp.ge.s32.totalorder %s6277_s18, 1  ;;  %s6277_s18 = sphi %s6310_s18, %s15_s18  }
   0x2   : > { %p187_p1 = scmp.lt.s32.totalorder %s6277_s18, 3 }
   0x4   : > { %p188_p2 = pnand %p4747_p0, %p187_p1 }
   0x5   : > { %v6103_v0 = vld [vmem:[%s7493_s1 + $0x40] sm:$0xff] (!%p188_p2)   ;;  %p215_p3 = scmp.lt.s32.totalorder (!%p188_p2), %s4743_s19, 1  ;;  %v6104_v1 = vld [vmem:[%s7493_s1 + $0x48] sm:$0xff] (!%p188_p2)   ;;  %v6279_v2 = vmov (!%p188_p2), 0   ;;  %v6105_v3 = vld [vmem:[%s7493_s1 + $0x50] sm:$0xff] (!%p188_p2)   ;;  %vm290_vm0 = vcmask (!%p188_p2), 1040384  }
   0x6   : > { %191 = sbr.rel (%p188_p2) target bundleno = 1052 (0x41c), region = 40  ;;  %5534 = vmatprep.subr.bf16.mxu0 (!%p188_p2), %v6103_v0  ;;  %285 = vst [vmem:[#allocation2] sm:$0xf] (!%p188_p2), %v6279_v2  ;;  %286 = vst [vmem:[#allocation2 + $0x4] sm:$0x1] (!%p188_p2), %v6279_v2  ;;  %v6106_v4 = vld [vmem:[%s7493_s1 + $0x58] sm:$0xff] (!%p188_p2)  }
   0x7   : > { %288 = vst [vmem:[#allocation2 + $0x48] sm:$0xf] (!%p188_p2), %v6279_v2  ;;  %289 = vst [vmem:[#allocation2 + $0x4c] sm:$0x1] (!%p188_p2), %v6279_v2  ;;  %5535 = vmatpush3.bf16.msra.mxu0 (!%p188_p2), %v6103_v0  ;;  %vm291_vm1 = vsmask.f32 (!%p188_p2), 256 }
   0x8   : > { %2501 = vst [vmem:[#allocation3] sm:$0xf] (!%p188_p2), %v6279_v2  ;;  %2502 = vst [vmem:[#allocation3 + $0x4] sm:$0x1] (!%p188_p2), %v6279_v2  ;;  %5536 = vmatprep.subr.bf16.mxu0 (!%p188_p2), %v6104_v1  ;;  %v296_v13 = vld [vmem:[#allocation2 + $0x8] sm:$0x1] (!%p188_p2) }
   0x9   : > { %2504 = vst [vmem:[#allocation3 + $0x48] sm:$0xf] (!%p188_p2), %v6279_v2  ;;  %2505 = vst [vmem:[#allocation3 + $0x4c] sm:$0x1] (!%p188_p2), %v6279_v2  ;;  %vm323_vm3 = vsmask.f32 (!%p188_p2), 7938 }
   0xa   : > { %vm6343_vm2 = vmand (!%p188_p2), %vm290_vm0, %vm291_vm1  ;;  %v328_v18 = vld [vmem:[#allocation2 + $0xc] sm:$0x1] (!%p188_p2)  ;;  %v6107_v19 = vld [vmem:[%s7493_s1 + $0x60] sm:$0xff] (!%p188_p2)   ;;  %vm436_vm5 = vcmask (!%p188_p2), 1043456   ;;  %vm518_vm7 = vsmask.f32 (!%p188_p2), 3328 }
   0xb   : > { %5537 = vmatpush3.bf16.msra.mxu0 (!%p188_p2), %v6104_v1  ;;  %v297_v16 = vsel (!%p188_p2), %vm6343_vm2, 0, %v296_v13  ;;  %vm6353_vm4 = vmand (!%p188_p2), %vm290_vm0, %vm323_vm3  ;;  %v6108_v23 = vld [vmem:[%s7493_s1 + $0x68] sm:$0xff] (!%p188_p2)   ;;  %v299_v39 = vld [vmem:[#allocation2 + $0x10] sm:$0x1] (!%p188_p2)  ;;  %vm519_vm8 = vsmask.f32 (!%p188_p2), 7440 }
   0xc   : > { %5538 = vmatprep.subr.bf16.mxu0 (!%p188_p2), %v6105_v3  ;;  %298 = vst [vmem:[#allocation2 + $0x8] sm:$0x1] (!%p188_p2), %v297_v16  ;;  %v329_v22 = vsel (!%p188_p2), %vm6353_vm4, 0, %v328_v18  ;;  %vm6373_vm6 = vmand (!%p188_p2), %vm436_vm5, %vm323_vm3  ;;  %v302_v40 = vld [vmem:[#allocation2 + $0x18] sm:$0x1] (!%p188_p2)  ;;  %v6109_v41 = vld [vmem:[%s7493_s1 + $0x70] sm:$0xff] (!%p188_p2)  }
   0xd   : > { %s7509_s19 = smov (!%p215_p3, %s4743_s19), 1  ;;  %v293_v10 = vld [vmem:[#allocation2] sm:$0x1]  ;;  %v325_v14 = vld [vmem:[#allocation2 + $0x4] sm:$0x1]  ;;  %v300_v45 = vsel %vm6343_vm2, 0, %v299_v39  ;;  %vm6433_vm9 = vmor %vm518_vm7, %vm519_vm8 }
   0xe   : > { %s5308_s26 = sshll.u32 %s7509_s19, 7  ;;  %v294_v15 = vsel %vm6343_vm2, 0, %v293_v10  ;;  %v326_v21 = vsel %vm6353_vm4, 0, %v325_v14  ;;  %330 = vst [vmem:[#allocation2 + $0xc] sm:$0x1] %v329_v22  ;;  %v303_v51 = vsel %vm6343_vm2, 0, %v302_v40 }
   0xf   : > { %s6333_s29 = scalar_lea.vmem %s7492_s0, %s5308_s26  ;;  %5539 = vmatpush3.bf16.msra.mxu0 %v6105_v3  ;;  %295 = vst [vmem:[#allocation2] sm:$0x1] %v294_v15  ;;  %327 = vst [vmem:[#allocation2 + $0x4] sm:$0x1] %v326_v21  ;;  %v331_v46 = vld [vmem:[#allocation2 + $0x14] sm:$0x1] }
  0x10   : > { %v226_v5 = vld [vmem:[%s6333_s29] sm:$0xf]  ;;  %5540 = vmatprep.subr.bf16.mxu0 %v6106_v4  ;;  %v227_v26 = vld [vmem:[%s6333_s29 + $0x4] sm:$0xf]  ;;  %v228_v27 = vld [vmem:[%s6333_s29 + $0x8] sm:$0xf] }
  0x11   : > { %v4752_v6 = vld [vmem:[%s6333_s29 + $0x20] sm:$0xf]  ;;  %v4753_v28 = vld [vmem:[%s6333_s29 + $0x24] sm:$0xf]  ;;  %v4754_v29 = vld [vmem:[%s6333_s29 + $0x28] sm:$0xf] }
  0x12   : > { %v4760_v7 = vld [vmem:[%s6333_s29 + $0x40] sm:$0xf]  ;;  %v243_v8 = vmax.bf16 %v4752_v6, %v226_v5  ;;  %v4761_v30 = vld [vmem:[%s6333_s29 + $0x44] sm:$0xf]  ;;  %v244_v33 = vmax.bf16 %v4753_v28, %v227_v26  ;;  %v245_v34 = vmax.bf16 %v4754_v29, %v228_v27  ;;  %v4762_v35 = vld [vmem:[%s6333_s29 + $0x48] sm:$0xf] }
  0x13   : > { %v4768_v9 = vld [vmem:[%s6333_s29 + $0x60] sm:$0xf]  ;;  %5541 = vmatpush3.bf16.msra.mxu0 %v6106_v4  ;;  %v4769_v36 = vld [vmem:[%s6333_s29 + $0x64] sm:$0xf]  ;;  %v4770_v37 = vld [vmem:[%s6333_s29 + $0x68] sm:$0xf] }
  0x14   : > { %v269_v11 = vmax.bf16 %v4768_v9, %v4760_v7  ;;  %5542 = vmatprep.subr.bf16.mxu0 %v6107_v19  ;;  %v270_v38 = vmax.bf16 %v4769_v36, %v4761_v30  ;;  %v271_v44 = vmax.bf16 %v4770_v37, %v4762_v35  ;;  %v334_v47 = vld [vmem:[#allocation2 + $0x1c] sm:$0x1]  ;;  %v438_v48 = vld [vmem:[#allocation2 + $0x8] sm:$0xf]  ;;  %301 = vst [vmem:[#allocation2 + $0x10] sm:$0x1] %v300_v45 }
  0x15   : > { %v332_v52 = vsel %vm6353_vm4, 0, %v331_v46  ;;  %v441_v54 = vld [vmem:[#allocation2 + $0xc] sm:$0x1]  ;;  %304 = vst [vmem:[#allocation2 + $0x18] sm:$0x1] %v303_v51  ;;  %v335_v60 = vsel %vm6353_vm4, 0, %v334_v47 }
  0x16   : > { %v277_v20 = vmax.bf16 %v269_v11, %v243_v8  ;;  %v6385_v49 = vld [vmem:[#allocation2] sm:$0xf]  ;;  %v278_v50 = vmax.bf16 %v270_v38, %v244_v33  ;;  %v6393_v55 = vld [vmem:[#allocation2 + $0x4] sm:$0x1]  ;;  %v279_v58 = vmax.bf16 %v271_v44, %v245_v34  ;;  %333 = vst [vmem:[#allocation2 + $0x14] sm:$0x1] %v332_v52 }
  0x17   : > { %5543 = vmatpush3.bf16.msra.mxu0 %v6107_v19  ;;  %v522_v56 = vshrl.u32 %v6385_v49, 16  ;;  %v525_v57 = vshll.u32 %v6385_v49, 16  ;;  %336 = vst [vmem:[#allocation2 + $0x1c] sm:$0x1] %v335_v60  ;;  %v531_v1 = vshll.u32 %v6393_v55, 16  ;;  %v6110_v4 = vld [vmem:[%s7493_s1 + $0x78] sm:$0xff]  }
  0x18   : > { %v356_v24 = vshrl.u32 %v277_v20, 16  ;;  %v359_v25 = vshll.u32 %v277_v20, 16  ;;  %5544 = vmatprep.subr.bf16.mxu0 %v6108_v23  ;;  %v364_v63 = vshrl.u32 %v278_v50, 16  ;;  %v367_v0 = vshll.u32 %v278_v50, 16  ;;  %v6408_v8 = vld [vmem:[%s7493_s1] sm:$0xff]   ;;  %s5309_s15 = sshll.u32 %s7509_s19, 6 }
  0x19   : > { %v524_v61 = vrot.slane %v522_v56, 4  ;;  %v527_v62 = vrot.slane %v525_v57, 5  ;;  %v372_v2 = vshrl.u32 %v279_v58, 16  ;;  %v375_v3 = vshll.u32 %v279_v58, 16  ;;  %v229_v30 = vld [vmem:[%s6333_s29 + $0xc] sm:$0xf]  ;;  %s224_s20 = scalar_lea.vmem %s7497_s5, %s5309_s15 }
  0x1a   : > { %v358_v31 = vrot.slane %v356_v24, 7  ;;  %v366_v5 = vrot.slane %v364_v63, 7  ;;  %v6410_v13 = vrot.slane %v531_v1, 5  ;;  %v4755_v35 = vld [vmem:[%s6333_s29 + $0x2c] sm:$0xf]  ;;  %vm940_vm10 = vcmask 1042432  }
  0x1b   : > { %5545 = vmatpush3.bf16.msra.mxu0 %v6108_v23  ;;  %v374_v6 = vrot.slane %v372_v2, 7  ;;  %v528_v7 = vor.u32 %v527_v62, %v524_v61  ;;  %v444_v11 = vld [vmem:[#allocation2 + $0x10] sm:$0xf]  ;;  %v246_v39 = vmax.bf16 %v4755_v35, %v229_v30  ;;  %v4771_v44 = vld [vmem:[%s6333_s29 + $0x6c] sm:$0xf]  ;;  %vm941_vm11 = vcmask 1046532  }
  0x1c   : > { %v361_v42 = vor.u32 %v359_v25, %v358_v31  ;;  %v362_v43 = vrot.slane %v358_v31, 4  ;;  %5546 = vmatprep.subr.bf16.mxu0 %v6109_v41  ;;  %v369_v9 = vor.u32 %v367_v0, %v366_v5  ;;  %v370_v10 = vrot.slane %v366_v5, 4  ;;  %v450_v18 = vld [vmem:[#allocation2 + $0x18] sm:$0xf]  ;;  %v230_v31 = vld [vmem:[%s6333_s29 + $0x10] sm:$0xf]  ;;  %vm6542_vm12 = vmor %vm940_vm10, %vm941_vm11 }
  0x1d   : > { %v377_v14 = vor.u32 %v375_v3, %v374_v6  ;;  %v378_v15 = vrot.slane %v374_v6, 4  ;;  %v447_v16 = vld [vmem:[#allocation2 + $0x14] sm:$0x1]  ;;  %v529_v27 = vrot.slane %v528_v7, 4  ;;  %v4756_v36 = vld [vmem:[%s6333_s29 + $0x30] sm:$0xf] }
  0x1e   : > { %v439_v53 = vsel %vm6373_vm6, %v361_v42, %v438_v48  ;;  %v442_v59 = vsel %vm6343_vm2, %v362_v43, %v441_v54  ;;  %v445_v20 = vsel %vm6373_vm6, %v369_v9, %v444_v11  ;;  %v448_v21 = vsel %vm6343_vm2, %v370_v10, %v447_v16  ;;  %v453_v26 = vld [vmem:[#allocation2 + $0x1c] sm:$0x1]  ;;  %v4764_v42 = vld [vmem:[%s6333_s29 + $0x50] sm:$0xf]  ;;  %v305_v46 = vld [vmem:[#allocation2 + $0x20] sm:$0x1] }
  0x1f   : > { %440 = vst [vmem:[#allocation2 + $0x8] sm:$0xf] %v439_v53  ;;  %443 = vst [vmem:[#allocation2 + $0xc] sm:$0x1] %v442_v59  ;;  %5547 = vmatpush3.bf16.msra.mxu0 %v6109_v41  ;;  %v451_v25 = vsel %vm6373_vm6, %v377_v14, %v450_v18  ;;  %v454_v29 = vsel %vm6343_vm2, %v378_v15, %v453_v26  ;;  %v247_v40 = vmax.bf16 %v4756_v36, %v230_v31  ;;  %v4763_v41 = vld [vmem:[%s6333_s29 + $0x4c] sm:$0xf] }
  0x20   : > { %5548 = vmatprep.subr.bf16.mxu0 %v6110_v4  ;;  %446 = vst [vmem:[#allocation2 + $0x10] sm:$0xf] %v445_v20  ;;  %449 = vst [vmem:[#allocation2 + $0x14] sm:$0x1] %v448_v21  ;;  %v4772_v45 = vld [vmem:[%s6333_s29 + $0x70] sm:$0xf]  ;;  %v272_v47 = vmax.bf16 %v4771_v44, %v4763_v41  ;;  %v534_v53 = vsel %vm6433_vm9, %v529_v27, %v6410_v13 }
  0x21   : > { %452 = vst [vmem:[#allocation2 + $0x18] sm:$0xf] %v451_v25  ;;  %455 = vst [vmem:[#allocation2 + $0x1c] sm:$0x1] %v454_v29  ;;  %v273_v48 = vmax.bf16 %v4772_v45, %v4764_v42  ;;  %v306_v50 = vsel %vm6343_vm2, 0, %v305_v46  ;;  %v6267_v37 = vld [vmem:[%s7495_s3 + $0x220] sm:$0xff]  }
  0x22   : > { %v308_v51 = vld [vmem:[#allocation2 + $0x28] sm:$0x1]  ;;  %v337_v52 = vld [vmem:[#allocation2 + $0x24] sm:$0x1]  ;;  %307 = vst [vmem:[#allocation2 + $0x20] sm:$0x1] %v306_v50  ;;  %v280_v61 = vmax.bf16 %v272_v47, %v246_v39 }
  0x23   : > { %5549 = vmatpush3.bf16.msra.mxu0 %v6110_v4  ;;  %v309_v56 = vsel %vm6343_vm2, 0, %v308_v51  ;;  %v338_v57 = vsel %vm6353_vm4, 0, %v337_v52  ;;  %v340_v58 = vld [vmem:[#allocation2 + $0x2c] sm:$0x1]  ;;  %v281_v62 = vmax.bf16 %v273_v48, %v247_v40  ;;  %v231_v25 = vld [vmem:[%s6333_s29 + $0x14] sm:$0xf] }
  0x24   : > { %5558 = vmatprep.subr.bf16.mxu0 %v6408_v8  ;;  %310 = vst [vmem:[#allocation2 + $0x28] sm:$0x1] %v309_v56  ;;  %339 = vst [vmem:[#allocation2 + $0x24] sm:$0x1] %v338_v57  ;;  %v341_v63 = vsel %vm6353_vm4, 0, %v340_v58  ;;  %v380_v18 = vshrl.u32 %v280_v61, 16 }
  0x25   : > { %342 = vst [vmem:[#allocation2 + $0x2c] sm:$0x1] %v341_v63  ;;  %v232_v30 = vld [vmem:[%s6333_s29 + $0x18] sm:$0xf]  ;;  %v4757_v41 = vld [vmem:[%s6333_s29 + $0x34] sm:$0xf] }
  0x26   : > { %v6412_v19 = vld [vmem:[#allocation2 + $0x8] sm:$0xf]  ;;  %v6418_v22 = vld [vmem:[#allocation2 + $0xc] sm:$0x1]  ;;  %v382_v27 = vrot.slane %v380_v18, 7  ;;  %v248_v47 = vmax.bf16 %v4757_v41, %v231_v25 }
  0x27   : > { %v536_v23 = vshrl.u32 %v6412_v19, 16  ;;  %v539_v24 = vshll.u32 %v6412_v19, 16  ;;  %v545_v28 = vshll.u32 %v6418_v22, 16  ;;  %v6451_v59 = vld [vmem:[#allocation2 + $0x10] sm:$0xf] }
  0x28   : > { %v6453_v60 = vld [vmem:[#allocation2 + $0x14] sm:$0x1]  ;;  %v6459_v1 = vld [vmem:[#allocation2 + $0x18] sm:$0xf]  ;;  %v550_v2 = vshrl.u32 %v6451_v59, 16  ;;  %v553_v3 = vshll.u32 %v6451_v59, 16 }
  0x29   : > { %v538_v33 = vrot.slane %v536_v23, 4  ;;  %v541_v34 = vrot.slane %v539_v24, 5  ;;  %v547_v38 = vrot.slane %v545_v28, 5  ;;  %v559_v4 = vshll.u32 %v6453_v60, 16  ;;  %v6464_v6 = vld [vmem:[#allocation2 + $0x1c] sm:$0x1] }
  0x2a   : > { %v564_v7 = vshrl.u32 %v6459_v1, 16  ;;  %v567_v9 = vshll.u32 %v6459_v1, 16  ;;  %v552_v10 = vrot.slane %v550_v2, 4  ;;  %v555_v11 = vrot.slane %v553_v3, 5  ;;  %v456_v29 = vld [vmem:[#allocation2 + $0x20] sm:$0xf] }
  0x2b   : > { %v542_v43 = vor.u32 %v541_v34, %v538_v33  ;;  %v573_v13 = vshll.u32 %v6464_v6, 16  ;;  %v561_v14 = vrot.slane %v559_v4, 5  ;;  %v383_v23 = vshll.u32 %v280_v61, 16  ;;  %v459_v34 = vld [vmem:[#allocation2 + $0x24] sm:$0x1] }
  0x2c   : > { %v566_v15 = vrot.slane %v564_v7, 4  ;;  %v569_v16 = vrot.slane %v567_v9, 5  ;;  %v556_v20 = vor.u32 %v555_v11, %v552_v10  ;;  %v388_v24 = vshrl.u32 %v281_v62, 16  ;;  %v462_v35 = vld [vmem:[#allocation2 + $0x28] sm:$0xf]  ;;  %v6113_v11 = vld [vmem:[%s7493_s1 + $0x10] sm:$0xff]  }
  0x2d   : > { %v543_v54 = vrot.slane %v542_v43, 4  ;;  %v575_v21 = vrot.slane %v573_v13, 5  ;;  %v391_v28 = vshll.u32 %v281_v62, 16  ;;  %v386_v39 = vrot.slane %v382_v27, 4  ;;  %v465_v40 = vld [vmem:[#allocation2 + $0x2c] sm:$0x1] }
  0x2e   : > { %v570_v26 = vor.u32 %v569_v16, %v566_v15  ;;  %v557_v31 = vrot.slane %v556_v20, 4  ;;  %v390_v33 = vrot.slane %v388_v24, 7  ;;  %v6112_v43 = vld [vmem:[%s7493_s1 + $0x8] sm:$0xff]   ;;  %v4758_v46 = vld [vmem:[%s6333_s29 + $0x38] sm:$0xf] }
  0x2f   : > { %v548_v0 = vsel %vm6433_vm9, %v543_v54, %v547_v38  ;;  %v385_v38 = vor.u32 %v383_v23, %v382_v27  ;;  %v4765_v48 = vld [vmem:[%s6333_s29 + $0x54] sm:$0xf]  ;;  %v460_v52 = vsel %vm6343_vm2, %v386_v39, %v459_v34  ;;  %v4766_v54 = vld [vmem:[%s6333_s29 + $0x58] sm:$0xf]  ;;  %v346_v10 = vld [vmem:[#allocation2 + $0x3c] sm:$0x1] }
  0x30   : > { %v4792_v5 = vcombine.low %v534_v53, %v548_v0  ;;  %v571_v36 = vrot.slane %v570_v26, 4  ;;  %v562_v42 = vsel %vm6433_vm9, %v557_v31, %v561_v14  ;;  %v393_v44 = vor.u32 %v391_v28, %v390_v33  ;;  %v4773_v56 = vld [vmem:[%s6333_s29 + $0x74] sm:$0xf]  ;;  %v4774_v57 = vld [vmem:[%s6333_s29 + $0x78] sm:$0xf] }
  0x31   : > { %v394_v45 = vrot.slane %v390_v33, 4  ;;  %v457_v51 = vsel %vm6373_vm6, %v385_v38, %v456_v29  ;;  %v249_v53 = vmax.bf16 %v4758_v46, %v232_v30  ;;  %461 = vst [vmem:[#allocation2 + $0x24] sm:$0x1] %v460_v52  ;;  %v274_v63 = vmax.bf16 %v4773_v56, %v4765_v48  ;;  %v311_v0 = vld [vmem:[#allocation2 + $0x30] sm:$0x1]  ;;  %v6114_v24 = vld [vmem:[%s7493_s1 + $0x18] sm:$0xff]  }
  0x32   : > { %5550 = vmatprep.mubr.bf16.mxu0 %v4792_v5  ;;  %v576_v50 = vsel %vm6433_vm9, %v571_v36, %v575_v21  ;;  %458 = vst [vmem:[#allocation2 + $0x20] sm:$0xf] %v457_v51  ;;  %v463_v61 = vsel %vm6373_vm6, %v393_v44, %v462_v35  ;;  %v314_v2 = vld [vmem:[#allocation2 + $0x38] sm:$0x1]  ;;  %v343_v3 = vld [vmem:[#allocation2 + $0x34] sm:$0x1]  ;;  %v275_v4 = vmax.bf16 %v4774_v57, %v4766_v54 }
  0x33   : > { %v4793_v58 = vcombine.low %v562_v42, %v576_v50  ;;  %v466_v62 = vsel %vm6343_vm2, %v394_v45, %v465_v40  ;;  %464 = vst [vmem:[#allocation2 + $0x28] sm:$0xf] %v463_v61  ;;  %v312_v5 = vsel %vm6343_vm2, 0, %v311_v0  ;;  %v315_v7 = vsel %vm6343_vm2, 0, %v314_v2  ;;  %v6115_v50 = vld [vmem:[%s7493_s1 + $0x20] sm:$0xff]   ;;  %v6116_v2 = vld [vmem:[%s7493_s1 + $0x28] sm:$0xff]  }
  0x34   : > { %467 = vst [vmem:[#allocation2 + $0x2c] sm:$0x1] %v466_v62  ;;  %v344_v9 = vsel %vm6353_vm4, 0, %v343_v3  ;;  %v282_v13 = vmax.bf16 %v274_v63, %v248_v47  ;;  %313 = vst [vmem:[#allocation2 + $0x30] sm:$0x1] %v312_v5  ;;  %v347_v14 = vsel %vm6353_vm4, 0, %v346_v10  ;;  %v283_v15 = vmax.bf16 %v275_v4, %v249_v53 }
  0x35   : > { %5551 = vmatmul.mubr.bf16.vlgmr.msra.gmra.mrb[0].mxu0 %v4793_v58  ;;  %316 = vst [vmem:[#allocation2 + $0x38] sm:$0x1] %v315_v7  ;;  %345 = vst [vmem:[#allocation2 + $0x34] sm:$0x1] %v344_v9  ;;  %v953_v0 = vrot.slane %v6453_v60, 5  ;;  %v957_v4 = vrot.slane %v6464_v6, 5 }
  0x36   : > { %5559 = vmatpush3.bf16.msra.mxu0 %v6408_v8  ;;  %348 = vst [vmem:[#allocation2 + $0x3c] sm:$0x1] %v347_v14  ;;  %v396_v16 = vshrl.u32 %v282_v13, 16  ;;  %v399_v18 = vshll.u32 %v282_v13, 16  ;;  %v404_v20 = vshrl.u32 %v283_v15, 16  ;;  %v407_v23 = vshll.u32 %v283_v15, 16 }
  0x37   : > { %5560 = vmatprep.subr.bf16.mxu0 %v6112_v43  ;;  %v918_v9 = vld [vmem:[#allocation2 + $0x10] sm:$0xe]  ;;  %v919_v10 = vld [vmem:[#allocation2 + $0x18] sm:$0xe] }
  0x38   : > { %v398_v21 = vrot.slane %v396_v16, 7  ;;  %v6509_v26 = vld [vmem:[#allocation2 + $0x24] sm:$0x1]  ;;  %v406_v27 = vrot.slane %v404_v20, 7  ;;  %v6117_v13 = vld [vmem:[%s7493_s1 + $0x30] sm:$0xff]   ;;  %v4819_v14 = vrot.slane %v919_v10, 9 }
  0x39   : > { %v6507_v25 = vld [vmem:[#allocation2 + $0x20] sm:$0xf]  ;;  %v587_v33 = vshll.u32 %v6509_v26, 16 }
  0x3a   : > { %5561 = vmatpush3.bf16.msra.mxu0 %v6112_v43  ;;  %v6511_v8 = vld [vmem:[#allocation2 + $0x28] sm:$0xf]  ;;  %v578_v29 = vshrl.u32 %v6507_v25, 16  ;;  %v581_v30 = vshll.u32 %v6507_v25, 16  ;;  %v401_v31 = vor.u32 %v399_v18, %v398_v21  ;;  %v402_v41 = vrot.slane %v398_v21, 4 }
  0x3b   : > { %5562 = vmatprep.subr.bf16.mxu0 %v6113_v11  ;;  %v6513_v28 = vld [vmem:[#allocation2 + $0x2c] sm:$0x1]  ;;  %v592_v34 = vshrl.u32 %v6511_v8, 16  ;;  %v595_v35 = vshll.u32 %v6511_v8, 16  ;;  %v468_v38 = vld [vmem:[#allocation2 + $0x30] sm:$0xf]  ;;  %v409_v42 = vor.u32 %v407_v23, %v406_v27 }
  0x3c   : > { %v601_v36 = vshll.u32 %v6513_v28, 16  ;;  %v580_v39 = vrot.slane %v578_v29, 4  ;;  %v583_v40 = vrot.slane %v581_v30, 5  ;;  %v471_v43 = vld [vmem:[#allocation2 + $0x34] sm:$0x1]  ;;  %v589_v44 = vrot.slane %v587_v33, 5 }
  0x3d   : > { %v594_v45 = vrot.slane %v592_v34, 4  ;;  %v597_v46 = vrot.slane %v595_v35, 5  ;;  %v474_v48 = vld [vmem:[#allocation2 + $0x38] sm:$0xf]  ;;  %v410_v52 = vrot.slane %v406_v27, 4  ;;  %v469_v53 = vsel %vm6373_vm6, %v401_v31, %v468_v38 }
  0x3e   : > { %5563 = vmatpush3.bf16.msra.mxu0 %v6113_v11  ;;  %v603_v47 = vrot.slane %v601_v36, 5  ;;  %v584_v51 = vor.u32 %v583_v40, %v580_v39  ;;  %v472_v54 = vsel %vm6343_vm2, %v402_v41, %v471_v43  ;;  %v477_v56 = vld [vmem:[#allocation2 + $0x3c] sm:$0x1]  ;;  %470 = vst [vmem:[#allocation2 + $0x30] sm:$0xf] %v469_v53  ;;  %v475_v58 = vsel %vm6373_vm6, %v409_v42, %v474_v48 }
  0x3f   : > { %5564 = vmatprep.subr.bf16.mxu0 %v6114_v24  ;;  %v598_v57 = vor.u32 %v597_v46, %v594_v45  ;;  %473 = vst [vmem:[#allocation2 + $0x34] sm:$0x1] %v472_v54  ;;  %476 = vst [vmem:[#allocation2 + $0x38] sm:$0xf] %v475_v58  ;;  %v478_v62 = vsel %vm6343_vm2, %v410_v52, %v477_v56  ;;  %v4818_v11 = vrot.slane %v918_v9, 9  ;;  %v6118_v36 = vld [vmem:[%s7493_s1 + $0x38] sm:$0xff]  }
  0x40   : > { %v585_v61 = vrot.slane %v584_v51, 4  ;;  %479 = vst [vmem:[#allocation2 + $0x3c] sm:$0x1] %v478_v62  ;;  %v6120_v46 = vld [vmem:[%s7493_s1 + $0x80] sm:$0xff]   ;;  %v917_v53 = vld [vmem:[#allocation2 + $0x8] sm:$0xe] }
  0x41   : > { %v599_v63 = vrot.slane %v598_v57, 4  ;;  %v6555_v16 = vsel %vm6542_vm12, %v4818_v11, %v953_v0  ;;  %v916_v52 = vld [vmem:[#allocation2] sm:$0xe]  ;;  %v945_v54 = vrot.slane %v6393_v55, 5  ;;  %v949_v56 = vrot.slane %v6418_v22, 5 }
  0x42   : > { %5565 = vmatpush3.bf16.msra.mxu0 %v6114_v24  ;;  %v590_v3 = vsel %vm6433_vm9, %v585_v61, %v589_v44  ;;  %v6564_v24 = vsel %vm6542_vm12, %v4819_v14, %v957_v4  ;;  %v4805_v57 = vcombine.low %v6451_v59, %v6459_v1  ;;  %v4816_v58 = vrot.slane %v916_v52, 9  ;;  %v233_v62 = vld [vmem:[%s6333_s29 + $0x1c] sm:$0xf]  ;;  %v317_v4 = vld [vmem:[#allocation2 + $0x40] sm:$0x1]  ;;  %v6123_v1 = vld [vmem:[%s7493_s1 + $0x90] sm:$0xff]  }
  0x43   : > { %5566 = vmatprep.subr.bf16.mxu0 %v6115_v50  ;;  %v604_v5 = vsel %vm6433_vm9, %v599_v63, %v603_v47  ;;  %v4841_v31 = vcombine.low %v6555_v16, %v6564_v24  ;;  %v4817_v61 = vrot.slane %v917_v53, 9  ;;  %v4759_v63 = vld [vmem:[%s6333_s29 + $0x3c] sm:$0xf]  ;;  %v318_v22 = vsel %vm6343_vm2, 0, %v317_v4  ;;  %v6132_v53 = vld [vmem:[%s7493_s1 + $0xc8] sm:$0xff]  }
  0x44   : > { %v4794_v60 = vcombine.low %v590_v3, %v604_v5  ;;  %v4767_v0 = vld [vmem:[%s6333_s29 + $0x5c] sm:$0xf]  ;;  %v250_v3 = vmax.bf16 %v4759_v63, %v233_v62  ;;  %319 = vst [vmem:[#allocation2 + $0x40] sm:$0x1] %v318_v22  ;;  %v1299_v24 = vld [vmem:[#allocation2 + $0x8] sm:$0xf] }
  0x45   : > { %v6549_v6 = vld [vmem:[#allocation2 + $0x30] sm:$0xf]  ;;  %v6134_v16 = vld [vmem:[%s7493_s1 + $0xd8] sm:$0xff]   ;;  %v320_v63 = vld [vmem:[#allocation2 + $0x48] sm:$0x1] }
  0x46   : > { %5567 = vmatpush3.bf16.msra.mxu0 %v6115_v50  ;;  %5554 = vmatprep.mubr.bf16.mxu0 %v4794_v60  ;;  %v6551_v15 = vld [vmem:[#allocation2 + $0x34] sm:$0x1]  ;;  %v6557_v18 = vld [vmem:[#allocation2 + $0x38] sm:$0xf]  ;;  %v606_v20 = vshrl.u32 %v6549_v6, 16  ;;  %v609_v21 = vshll.u32 %v6549_v6, 16  ;;  %v4804_v50 = vcombine.low %v6385_v49, %v6412_v19  ;;  %v4806_v19 = vcombine.low %v6507_v25, %v6511_v8 }
  0x47   : > { %5568 = vmatprep.subr.bf16.mxu0 %v6116_v2  ;;  %v615_v23 = vshll.u32 %v6551_v15, 16  ;;  %v6566_v27 = vld [vmem:[#allocation2 + $0x3c] sm:$0x1]  ;;  %v620_v29 = vshrl.u32 %v6557_v18, 16  ;;  %v623_v30 = vshll.u32 %v6557_v18, 16  ;;  %v6122_v49 = vld [vmem:[%s7493_s1 + $0x88] sm:$0xff]   ;;  %v946_v25 = vsel %vm6542_vm12, %v4816_v58, %v945_v54 }
  0x48   : > { %v608_v33 = vrot.slane %v606_v20, 4  ;;  %v611_v34 = vrot.slane %v609_v21, 5  ;;  %v629_v35 = vshll.u32 %v6566_v27, 16  ;;  %v950_v8 = vsel %vm6542_vm12, %v4817_v61, %v949_v56  ;;  %v6133_v54 = vld [vmem:[%s7493_s1 + $0xd0] sm:$0xff]   ;;  %v6136_v58 = vld [vmem:[%s7493_s1 + $0xe8] sm:$0xff]  }
  0x49   : > { %v622_v38 = vrot.slane %v620_v29, 4  ;;  %v625_v39 = vrot.slane %v623_v30, 5  ;;  %v617_v41 = vrot.slane %v615_v23, 5  ;;  %v4807_v60 = vcombine.low %v6549_v6, %v6557_v18  ;;  %v6125_v6 = vld [vmem:[%s7493_s1 + $0xa0] sm:$0xff]   ;;  %v6126_v18 = vld [vmem:[%s7493_s1 + $0xa8] sm:$0xff]   ;;  %v6128_v23 = vld [vmem:[%s7493_s1 + $0xb0] sm:$0xff]  }
  0x4a   : > { %5569 = vmatpush3.bf16.msra.mxu0 %v6116_v2  ;;  %v612_v40 = vor.u32 %v611_v34, %v608_v33  ;;  %v631_v43 = vrot.slane %v629_v35, 5  ;;  %v4775_v2 = vld [vmem:[%s6333_s29 + $0x7c] sm:$0xf]  ;;  %v4840_v10 = vcombine.low %v946_v25, %v950_v8  ;;  %v920_v29 = vld [vmem:[#allocation2 + $0x20] sm:$0xe]  ;;  %v1319_v61 = vshll.u32 %v1299_v24, 16 }
  0x4b   : > { %5570 = vmatprep.subr.bf16.mxu0 %v6117_v13  ;;  %v626_v42 = vor.u32 %v625_v39, %v622_v38  ;;  %v276_v55 = vmax.bf16 %v4775_v2, %v4767_v0  ;;  %v480_v20 = vld [vmem:[#allocation2 + $0x40] sm:$0xf]  ;;  %v921_v30 = vld [vmem:[#allocation2 + $0x28] sm:$0xe]  ;;  %v349_v33 = vld [vmem:[#allocation2 + $0x44] sm:$0x1] }
  0x4c   : > { %v613_v44 = vrot.slane %v612_v40, 4  ;;  %v350_v34 = vsel %vm6353_vm4, 0, %v349_v33  ;;  %v6130_v35 = vld [vmem:[%s7493_s1 + $0xb8] sm:$0xff]   ;;  %v961_v38 = vrot.slane %v6509_v26, 5  ;;  %v4821_v39 = vrot.slane %v921_v30, 9  ;;  %v6142_v33 = vld [vmem:[%s7493_s1 + $0x108] sm:$0xff]  }
  0x4d   : > { %v627_v45 = vrot.slane %v626_v42, 4  ;;  %v284_v59 = vmax.bf16 %v276_v55, %v250_v3  ;;  %351 = vst [vmem:[#allocation2 + $0x44] sm:$0x1] %v350_v34  ;;  %v965_v40 = vrot.slane %v6513_v28, 5  ;;  %v6131_v42 = vld [vmem:[%s7493_s1 + $0xc0] sm:$0xff]   ;;  %v969_v26 = vrot.slane %v6551_v15, 5 }
  0x4e   : > { %5571 = vmatpush3.bf16.msra.mxu0 %v6117_v13  ;;  %v618_v47 = vsel %vm6433_vm9, %v613_v44, %v617_v41  ;;  %v6124_v13 = vld [vmem:[%s7493_s1 + $0x98] sm:$0xff]   ;;  %v321_v2 = vsel %vm6343_vm2, 0, %v320_v63  ;;  %v6137_v3 = vld [vmem:[%s7493_s1 + $0xf0] sm:$0xff]   ;;  %v6668_v55 = vld [vmem:[#allocation2 + $0xc] sm:$0x1] }
  0x4f   : > { %5572 = vmatprep.subr.bf16.mxu0 %v6118_v36  ;;  %v632_v48 = vsel %vm6433_vm9, %v627_v45, %v631_v43  ;;  %v412_v5 = vshrl.u32 %v284_v59, 16  ;;  %v415_v9 = vshll.u32 %v284_v59, 16  ;;  %v966_v44 = vsel %vm6542_vm12, %v4821_v39, %v965_v40  ;;  %v922_v45 = vld [vmem:[#allocation2 + $0x30] sm:$0xe]  ;;  %322 = vst [vmem:[#allocation2 + $0x48] sm:$0x1] %v321_v2 }
  0x50   : > { %v4795_v51 = vcombine.low %v618_v47, %v632_v48  ;;  %v973_v47 = vrot.slane %v6566_v27, 5  ;;  %v6670_v4 = vld [vmem:[#allocation2 + $0x14] sm:$0x1]  ;;  %v1321_v59 = vrot.slane %v1319_v61, 5  ;;  %v1303_v8 = vld [vmem:[#allocation2 + $0x18] sm:$0xf] }
  0x51   : > { %v414_v11 = vrot.slane %v412_v5, 7  ;;  %v6138_v5 = vld [vmem:[%s7493_s1 + $0xf8] sm:$0xff]   ;;  %v1307_v39 = vld [vmem:[#allocation2 + $0x28] sm:$0xf]  ;;  %v1309_v40 = vld [vmem:[#allocation2 + $0x30] sm:$0xf] }
  0x52   : > { %5573 = vmatpush3.bf16.msra.mxu0 %v6118_v36  ;;  %v4820_v36 = vrot.slane %v920_v29, 9  ;;  %v1347_v29 = vshll.u32 %v1303_v8, 16  ;;  %v1311_v61 = vld [vmem:[#allocation2 + $0x38] sm:$0xf] }
  0x53   : > { %5582 = vmatprep.subr.bf16.mxu0 %v6120_v46  ;;  %5555 = vmatmul.mubr.bf16.gmra.mrb[4].mxu0 %v4795_v51  ;;  %v417_v14 = vor.u32 %v415_v9, %v414_v11  ;;  %v418_v41 = vrot.slane %v414_v11, 4  ;;  %v1325_v9 = vshll.u32 %v6668_v55, 16 }
  0x54   : > { %5574 = vmatprep.mubr.bf16.mxu0 %v4804_v50  ;;  %v962_v43 = vsel %vm6542_vm12, %v4820_v36, %v961_v38  ;;  %v483_v28 = vld [vmem:[#allocation2 + $0x44] sm:$0x1]  ;;  %v4822_v50 = vrot.slane %v922_v45, 9  ;;  %v1372_v45 = vshrl.u32 %v1307_v39, 16 }
  0x55   : > { %v481_v21 = vsel %vm6373_vm6, %v417_v14, %v480_v20  ;;  %v4842_v48 = vcombine.low %v962_v43, %v966_v44  ;;  %v484_v52 = vsel %vm6343_vm2, %v418_v41, %v483_v28  ;;  %v1344_v14 = vshrl.u32 %v1303_v8, 16  ;;  %v6140_v20 = vld [vmem:[%s7493_s1 + $0x100] sm:$0xff]   ;;  %v6143_v43 = vld [vmem:[%s7493_s1 + $0x110] sm:$0xff]   ;;  %v6713_v8 = vld [vmem:[#allocation2 + $0x3c] sm:$0x1] }
  0x56   : > { %482 = vst [vmem:[#allocation2 + $0x40] sm:$0xf] %v481_v21  ;;  %485 = vst [vmem:[#allocation2 + $0x44] sm:$0x1] %v484_v52  ;;  %v970_v15 = vsel %vm6542_vm12, %v4822_v50, %v969_v26  ;;  %v6141_v21 = vld [vmem:[#allocation2 + $0x18] ss:$8 sps:$4 sm:$0xff]  }
  0x57   : > { %v1346_v36 = vrot.slane %v1344_v14, 4  ;;  %v1349_v41 = vrot.slane %v1347_v29, 5  ;;  %v1386_v26 = vshrl.u32 %v1309_v40, 16  ;;  %v6144_v50 = vld [vmem:[%s7493_s1 + $0x118] sm:$0xff]   ;;  %v1374_v52 = vrot.slane %v1372_v45, 4 }
  0x59   : > { %v1350_v63 = vor.u32 %v1349_v41, %v1346_v36  ;;  %v1582_v41 = vld [vmem:[#allocation2 + $0x10] sm:$0xe] }
  0x5b   : > { %5575 = vmatmul.mubr.bf16.vlgmr.msra.gmra.mrb[0].mxu0 %v4805_v57  ;;  %v6139_v57 = vld [vmem:[#allocation2 + $0x8] ss:$8 sps:$4 sm:$0xff]   ;;  %v1351_v14 = vrot.slane %v1350_v63, 4 }
  0x5c   : > { %5583 = vmatpush3.bf16.msra.mxu0 %v6120_v46  ;;  %5578 = vmatprep.mubr.bf16.mxu0 %v4806_v19  ;;  %v923_v46 = vld [vmem:[#allocation2 + $0x38] sm:$0xe]  ;;  %v1316_v19 = vshrl.u32 %v1299_v24, 16  ;;  %v1585_v63 = vld [vmem:[#allocation2 + $0x28] sm:$0xe] }
  0x5d   : > { %5584 = vmatprep.subr.bf16.mxu0 %v6122_v49  ;;  %v4823_v51 = vrot.slane %v923_v46, 9  ;;  %v1375_v46 = vshll.u32 %v1307_v39, 16  ;;  %v6722_v39 = vld [vmem:[#allocation2 + $0x44] sm:$0x1] }
  0x5e   : > { %v1318_v22 = vrot.slane %v1316_v19, 4  ;;  %v6704_v19 = vld [vmem:[#allocation2 + $0x34] sm:$0x1] }
  0x5f   : > { %v974_v27 = vsel %vm6542_vm12, %v4823_v51, %v973_v47 }
  0x60   : > { %5585 = vmatpush3.bf16.msra.mxu0 %v6122_v49  ;;  %v4843_v56 = vcombine.low %v970_v15, %v974_v27  ;;  %v6135_v49 = vld [vmem:[%s7493_s1 + $0xe0] sm:$0xff]   ;;  %v6693_v15 = vld [vmem:[#allocation2 + $0x1c] sm:$0x1]  ;;  %v352_v27 = vld [vmem:[#allocation2 + $0x4c] sm:$0x1] }
  0x61   : > { %5586 = vmatprep.subr.bf16.mxu0 %v6123_v1  ;;  %v353_v24 = vsel %vm6353_vm4, 0, %v352_v27  ;;  %v1611_v27 = vrot.slane %v6670_v4, 5 }
  0x62   : > { %354 = vst [vmem:[#allocation2 + $0x4c] sm:$0x1] %v353_v24 }
  0x63   : > { %5579 = vmatmul.mubr.bf16.gmra.mrb[4].mxu0 %v4807_v60  ;;  %v1339_v60 = vshll.u32 %v6670_v4, 16  ;;  %v1587_v4 = vld [vmem:[#allocation2 + $0x38] sm:$0xe] }
  0x64   : > { %5587 = vmatpush3.bf16.msra.mxu0 %v6123_v1  ;;  %5598 = vmatprep.mubr.bf16.mxu0 %v4840_v10  ;;  %v1322_v10 = vor.u32 %v1321_v59, %v1318_v22  ;;  %v6146_v22 = vld [vmem:[%s7493_s1 + $0x128] sm:$0xff]  }
  0x65   : > { %5588 = vmatprep.subr.bf16.mxu0 %v6124_v13 }
  0x66   : > { %v1323_v34 = vrot.slane %v1322_v10, 4 }
  0x68   : > { %5589 = vmatpush3.bf16.msra.mxu0 %v6124_v13  ;;  %v1305_v13 = vld [vmem:[#allocation2 + $0x20] sm:$0xf] }
  0x69   : > { %5590 = vmatprep.subr.bf16.mxu0 %v6125_v6  ;;  %v1358_v30 = vshrl.u32 %v1305_v13, 16  ;;  %v1361_v38 = vshll.u32 %v1305_v13, 16 }
  0x6b   : > { %v1363_v44 = vrot.slane %v1361_v38, 5  ;;  %v6150_v38 = vld [vmem:[%s7493_s1 + $0x138] sm:$0xff]  }
  0x6c   : > { %5591 = vmatpush3.bf16.msra.mxu0 %v6125_v6  ;;  %v6147_v6 = vld [vmem:[#allocation2 + $0x28] ss:$8 sps:$4 sm:$0xff]  }
  0x6d   : > { %5592 = vmatprep.subr.bf16.mxu0 %v6126_v18 }
  0x70   : > { %5593 = vmatpush3.bf16.msra.mxu0 %v6126_v18  ;;  %v1327_v18 = vrot.slane %v1325_v9, 5  ;;  %v1403_v9 = vshll.u32 %v1311_v61, 16 }
  0x71   : > { %5594 = vmatprep.subr.bf16.mxu0 %v6128_v23 }
  0x72   : > { %v1328_v47 = vsel %vm6433_vm9, %v1323_v34, %v1327_v18  ;;  %v1405_v34 = vrot.slane %v1403_v9, 5  ;;  %v4912_v9 = vrot.slane %v1585_v63, 9 }
  0x74   : > { %5595 = vmatpush3.bf16.msra.mxu0 %v6128_v23  ;;  %v1341_v23 = vrot.slane %v1339_v60, 5 }
  0x75   : > { %5596 = vmatprep.subr.bf16.mxu0 %v6130_v35 }
  0x78   : > { %5597 = vmatpush3.bf16.msra.mxu0 %v6130_v35 }
  0x79   : > { %5606 = vmatprep.subr.bf16.mxu0 %v6131_v42 }
  0x7b   : > { %5599 = vmatmul.mubr.bf16.vlgmr.msra.gmra.mrb[0].mxu0 %v4841_v31  ;;  %v1301_v31 = vld [vmem:[#allocation2 + $0x10] sm:$0xf] }
  0x7c   : > { %5607 = vmatpush3.bf16.msra.mxu0 %v6131_v42  ;;  %5602 = vmatprep.mubr.bf16.mxu0 %v4842_v48  ;;  %v1330_v62 = vshrl.u32 %v1301_v31, 16  ;;  %v1333_v0 = vshll.u32 %v1301_v31, 16  ;;  %v1360_v42 = vrot.slane %v1358_v30, 4  ;;  %v6149_v48 = vld [vmem:[#allocation2 + $0x38] ss:$8 sps:$4 sm:$0xff]   ;;  %v1388_v31 = vrot.slane %v1386_v26, 4 }
  0x7d   : > { %5608 = vmatprep.subr.bf16.mxu0 %v6132_v53  ;;  %v1409_v30 = vshll.u32 %v6713_v8, 16 }
  0x7e   : > { %v1332_v1 = vrot.slane %v1330_v62, 4  ;;  %v1335_v25 = vrot.slane %v1333_v0, 5  ;;  %v1313_v62 = vld [vmem:[#allocation2 + $0x40] sm:$0xf]  ;;  %v1364_v0 = vor.u32 %v1363_v44, %v1360_v42  ;;  %v6724_v42 = vld [vmem:[#allocation2 + $0x18] sm:$0xe] }
  0x7f   : > { %v1414_v60 = vshrl.u32 %v1313_v62, 16  ;;  %v1417_v10 = vshll.u32 %v1313_v62, 16  ;;  %v1423_v44 = vshll.u32 %v6722_v39, 16  ;;  %v4910_v24 = vrot.slane %v6724_v42, 9  ;;  %v6161_v42 = vld [vmem:[%s7493_s1 + $0x190] sm:$0xff]  }
  0x80   : > { %5609 = vmatpush3.bf16.msra.mxu0 %v6132_v53  ;;  %v1336_v11 = vor.u32 %v1335_v25, %v1332_v1  ;;  %v1389_v53 = vshll.u32 %v1309_v40, 16  ;;  %v1395_v25 = vshll.u32 %v6704_v19, 16  ;;  %v1581_v40 = vld [vmem:[#allocation2 + $0x8] sm:$0xe] }
  0x81   : > { %5610 = vmatprep.subr.bf16.mxu0 %v6133_v54  ;;  %v1419_v36 = vrot.slane %v1417_v10, 5  ;;  %v1425_v62 = vrot.slane %v1423_v44, 5  ;;  %v1631_v10 = vrot.slane %v6713_v8, 5  ;;  %v6156_v8 = vld [vmem:[%s7493_s1 + $0x168] sm:$0xff]   ;;  %v6167_v44 = vld [vmem:[#allocation2 + $0x10] ss:$8 sps:$4 sm:$0xff]  }
  0x82   : > { %v1337_v35 = vrot.slane %v1336_v11, 4  ;;  %v6148_v11 = vld [vmem:[%s7493_s1 + $0x130] sm:$0xff]   ;;  %v1397_v29 = vrot.slane %v1395_v25, 5 }
  0x83   : > { %5603 = vmatmul.mubr.bf16.gmra.mrb[4].mxu0 %v4843_v56  ;;  %v6698_v56 = vld [vmem:[#allocation2 + $0x24] sm:$0x1]  ;;  %v6153_v25 = vld [vmem:[%s7493_s1 + $0x150] sm:$0xff]  }
  0x84   : > { %5611 = vmatpush3.bf16.msra.mxu0 %v6133_v54  ;;  %5622 = vmatprep.mubr.bf16.mxu0 %v6139_v57  ;;  %v1342_v28 = vsel %vm6433_vm9, %v1337_v35, %v1341_v23  ;;  %v6145_v54 = vld [vmem:[%s7493_s1 + $0x120] sm:$0xff]   ;;  %v6700_v57 = vld [vmem:[#allocation2 + $0x2c] sm:$0x1]  ;;  %v1367_v2 = vshll.u32 %v6698_v56, 16  ;;  %v1416_v35 = vrot.slane %v1414_v60, 4  ;;  %v1627_v60 = vrot.slane %v6704_v19, 5 }
  0x85   : > { %5612 = vmatprep.subr.bf16.mxu0 %v6134_v16  ;;  %v4896_v51 = vcombine.low %v1328_v47, %v1342_v28  ;;  %v1411_v28 = vrot.slane %v1409_v30, 5  ;;  %v6155_v19 = vld [vmem:[%s7493_s1 + $0x160] sm:$0xff]  }
  0x88   : > { %5613 = vmatpush3.bf16.msra.mxu0 %v6134_v16  ;;  %v1377_v16 = vrot.slane %v1375_v46, 5  ;;  %v1420_v46 = vor.u32 %v1419_v36, %v1416_v35 }
  0x89   : > { %5614 = vmatprep.subr.bf16.mxu0 %v6135_v49 }
  0x8a   : > { %v1378_v59 = vor.u32 %v1377_v16, %v1374_v52  ;;  %v4908_v52 = vrot.slane %v1581_v40, 9  ;;  %v1584_v16 = vld [vmem:[#allocation2 + $0x20] sm:$0xe] }
  0x8c   : > { %5615 = vmatpush3.bf16.msra.mxu0 %v6135_v49  ;;  %v1391_v49 = vrot.slane %v1389_v53, 5  ;;  %v1379_v18 = vrot.slane %v1378_v59, 4  ;;  %v4909_v53 = vrot.slane %v1582_v41, 9  ;;  %v4911_v59 = vrot.slane %v1584_v16, 9 }
  0x8d   : > { %5616 = vmatprep.subr.bf16.mxu0 %v6136_v58 }
  0x8e   : > { %v1392_v1 = vor.u32 %v1391_v49, %v1388_v31  ;;  %v1615_v31 = vrot.slane %v6693_v15, 5 }
  0x90   : > { %5617 = vmatpush3.bf16.msra.mxu0 %v6136_v58  ;;  %v1353_v58 = vshll.u32 %v6693_v15, 16  ;;  %v1393_v23 = vrot.slane %v1392_v1, 4  ;;  %v1623_v1 = vrot.slane %v6700_v57, 5  ;;  %v1616_v30 = vsel %vm6542_vm12, %v4910_v24, %v1615_v31 }
  0x91   : > { %5618 = vmatprep.subr.bf16.mxu0 %v6137_v3 }
  0x92   : > { %v1355_v13 = vrot.slane %v1353_v58, 5  ;;  %v6152_v58 = vld [vmem:[%s7493_s1 + $0x148] sm:$0xff]  }
  0x94   : > { %5619 = vmatpush3.bf16.msra.mxu0 %v6137_v3  ;;  %v1381_v3 = vshll.u32 %v6700_v57, 16  ;;  %v1356_v45 = vsel %vm6433_vm9, %v1351_v14, %v1355_v13  ;;  %v4914_v13 = vrot.slane %v1587_v4, 9  ;;  %v1635_v57 = vrot.slane %v6722_v39, 5  ;;  %v6160_v39 = vld [vmem:[%s7493_s1 + $0x188] sm:$0xff]   ;;  %v6175_v4 = vld [vmem:[#allocation2 + $0x30] ss:$8 sps:$4 sm:$0xff]  }
  0x95   : > { %5620 = vmatprep.subr.bf16.mxu0 %v6138_v5 }
  0x96   : > { %v1632_v40 = vsel %vm6542_vm12, %v4914_v13, %v1631_v10  ;;  %v1966_v10 = vld [vmem:[#allocation2 + $0x20] sm:$0xf]  ;;  %v1968_v13 = vld [vmem:[#allocation2 + $0x28] sm:$0xf] }
  0x98   : > { %5621 = vmatpush3.bf16.msra.mxu0 %v6138_v5  ;;  %v1400_v5 = vshrl.u32 %v1311_v61, 16  ;;  %v1421_v61 = vrot.slane %v1420_v46, 4  ;;  %v6163_v46 = vld [vmem:[%s7493_s1 + $0x1a0] sm:$0xff]  }
  0x99   : > { %5630 = vmatprep.subr.bf16.mxu0 %v6140_v20 }
  0x9b   : > { %5623 = vmatmul.mubr.bf16.vlgmr.msra.gmra.mrb[0].mxu0 %v6141_v21  ;;  %v1369_v21 = vrot.slane %v1367_v2, 5  ;;  %v1586_v2 = vld [vmem:[#allocation2 + $0x30] sm:$0xe] }
  0x9c   : > { %5631 = vmatpush3.bf16.msra.mxu0 %v6140_v20  ;;  %5626 = vmatprep.mubr.bf16.mxu0 %v6147_v6  ;;  %v1365_v20 = vrot.slane %v1364_v0, 4  ;;  %v1383_v6 = vrot.slane %v1381_v3, 5  ;;  %v1588_v3 = vld [vmem:[#allocation2 + $0x40] sm:$0xe] }
  0x9d   : > { %5632 = vmatprep.subr.bf16.mxu0 %v6142_v33  ;;  %v4915_v14 = vrot.slane %v1588_v3, 9  ;;  %v6170_v3 = vld [vmem:[%s7493_s1 + $0x1c8] sm:$0xff]  }
  0x9e   : > { %v1370_v26 = vsel %vm6433_vm9, %v1365_v20, %v1369_v21  ;;  %v1384_v47 = vsel %vm6433_vm9, %v1379_v18, %v1383_v6  ;;  %v6154_v20 = vld [vmem:[%s7493_s1 + $0x158] sm:$0xff]   ;;  %v6157_v18 = vld [vmem:[%s7493_s1 + $0x170] sm:$0xff]  }
  0x9f   : > { %v4897_v49 = vcombine.low %v1356_v45, %v1370_v26  ;;  %v1636_v41 = vsel %vm6542_vm12, %v4915_v14, %v1635_v57  ;;  %v6162_v45 = vld [vmem:[%s7493_s1 + $0x198] sm:$0xff]   ;;  %v6164_v26 = vld [vmem:[%s7493_s1 + $0x1a8] sm:$0xff]   ;;  %v1970_v14 = vld [vmem:[#allocation2 + $0x30] sm:$0xf] }
  0xa0   : > { %5633 = vmatpush3.bf16.msra.mxu0 %v6142_v33  ;;  %v1402_v33 = vrot.slane %v1400_v5, 4  ;;  %v1426_v5 = vsel %vm6433_vm9, %v1421_v61, %v1425_v62  ;;  %v1972_v57 = vld [vmem:[#allocation2 + $0x38] sm:$0xf] }
  0xa1   : > { %5634 = vmatprep.subr.bf16.mxu0 %v6143_v43 }
  0xa3   : > { %5627 = vmatmul.mubr.bf16.gmra.mrb[4].mxu0 %v6149_v48  ;;  %v1607_v48 = vrot.slane %v6668_v55, 5  ;;  %v1619_v55 = vrot.slane %v6698_v56, 5  ;;  %v1612_v56 = vsel %vm6542_vm12, %v4909_v53, %v1611_v27  ;;  %v6166_v27 = vld [vmem:[%s7493_s1 + $0x1b8] sm:$0xff]  }
  0xa4   : > { %5635 = vmatpush3.bf16.msra.mxu0 %v6143_v43  ;;  %5646 = vmatprep.mubr.bf16.mxu0 %v4896_v51  ;;  %v1406_v43 = vor.u32 %v1405_v34, %v1402_v33  ;;  %v1398_v51 = vsel %vm6433_vm9, %v1393_v23, %v1397_v29  ;;  %v6158_v23 = vld [vmem:[%s7493_s1 + $0x178] sm:$0xff]   ;;  %v6159_v29 = vld [vmem:[%s7493_s1 + $0x180] sm:$0xff]   ;;  %v1624_v34 = vsel %vm6542_vm12, %v4912_v9, %v1623_v1  ;;  %v6171_v1 = vld [vmem:[%s7493_s1 + $0x1d0] sm:$0xff]  }
  0xa5   : > { %5636 = vmatprep.subr.bf16.mxu0 %v6144_v50  ;;  %v4898_v0 = vcombine.low %v1384_v47, %v1398_v51  ;;  %v1620_v33 = vsel %vm6542_vm12, %v4911_v59, %v1619_v55  ;;  %v1962_v47 = vld [vmem:[#allocation2 + $0x10] sm:$0xf]  ;;  %v6812_v55 = vld [vmem:[#allocation2 + $0x14] sm:$0x1]  ;;  %v6177_v9 = vld [vmem:[#allocation2 + $0x40] ss:$8 sps:$4 sm:$0xff]  }
  0xa6   : > { %v4933_v36 = vcombine.low %v1616_v30, %v1620_v33  ;;  %v1982_v51 = vshll.u32 %v1962_v47, 16  ;;  %v1988_v62 = vshll.u32 %v6812_v55, 16  ;;  %v2052_v30 = vshll.u32 %v1972_v57, 16  ;;  %v6174_v33 = vld [vmem:[%s7493_s1 + $0x1e8] sm:$0xff]  }
  0xa8   : > { %5637 = vmatpush3.bf16.msra.mxu0 %v6144_v50  ;;  %v6151_v50 = vld [vmem:[%s7493_s1 + $0x140] sm:$0xff]   ;;  %v1984_v16 = vrot.slane %v1982_v51, 5 }
  0xa9   : > { %5638 = vmatprep.subr.bf16.mxu0 %v6145_v54 }
  0xac   : > { %5639 = vmatpush3.bf16.msra.mxu0 %v6145_v54  ;;  %v1407_v54 = vrot.slane %v1406_v43, 4  ;;  %v4935_v43 = vcombine.low %v1632_v40, %v1636_v41  ;;  %v1974_v41 = vld [vmem:[#allocation2 + $0x40] sm:$0xf] }
  0xad   : > { %5640 = vmatprep.subr.bf16.mxu0 %v6146_v22  ;;  %v2066_v51 = vshll.u32 %v1974_v41, 16 }
  0xae   : > { %v1412_v15 = vsel %vm6433_vm9, %v1407_v54, %v1411_v28  ;;  %v1964_v28 = vld [vmem:[#allocation2 + $0x18] sm:$0xf] }
  0xaf   : > { %v4899_v21 = vcombine.low %v1412_v15, %v1426_v5  ;;  %v1996_v53 = vshll.u32 %v1964_v28, 16  ;;  %v1990_v15 = vrot.slane %v1988_v62, 5  ;;  %v6178_v62 = vld [vmem:[%s7493_s1 + $0x1f8] sm:$0xff]  }
  0xb0   : > { %5641 = vmatpush3.bf16.msra.mxu0 %v6146_v22  ;;  %v1608_v22 = vsel %vm6542_vm12, %v4908_v52, %v1607_v48  ;;  %v6165_v48 = vld [vmem:[%s7493_s1 + $0x1b0] sm:$0xff]   ;;  %v1993_v52 = vshrl.u32 %v1964_v28, 16 }
  0xb1   : > { %5642 = vmatprep.subr.bf16.mxu0 %v6148_v11  ;;  %v4932_v6 = vcombine.low %v1608_v22, %v1612_v56  ;;  %v1998_v31 = vrot.slane %v1996_v53, 5 }
  0xb2   : > { %v1995_v24 = vrot.slane %v1993_v52, 4 }
  0xb4   : > { %5643 = vmatpush3.bf16.msra.mxu0 %v6148_v11  ;;  %v4913_v11 = vrot.slane %v1586_v2, 9  ;;  %v1999_v63 = vor.u32 %v1998_v31, %v1995_v24  ;;  %v6169_v2 = vld [vmem:[#allocation2 + $0x20] ss:$8 sps:$4 sm:$0xff]  }
  0xb5   : > { %5644 = vmatprep.subr.bf16.mxu0 %v6150_v38 }
  0xb6   : > { %v1628_v35 = vsel %vm6542_vm12, %v4913_v11, %v1627_v60  ;;  %v2000_v56 = vrot.slane %v1999_v63, 4  ;;  %v6172_v11 = vld [vmem:[%s7493_s1 + $0x1d8] sm:$0xff]  }
  0xb8   : > { %5645 = vmatpush3.bf16.msra.mxu0 %v6150_v38  ;;  %v4934_v38 = vcombine.low %v1624_v34, %v1628_v35  ;;  %v6840_v34 = vld [vmem:[#allocation2 + $0x24] sm:$0x1] }
  0xb9   : > { %5654 = vmatprep.subr.bf16.mxu0 %v6151_v50 }
  0xbb   : > { %5647 = vmatmul.mubr.bf16.vlgmr.msra.gmra.mrb[0].mxu0 %v4897_v49  ;;  %v6814_v49 = vld [vmem:[#allocation2 + $0x1c] sm:$0x1] }
  0xbc   : > { %5655 = vmatpush3.bf16.msra.mxu0 %v6151_v50  ;;  %5650 = vmatprep.mubr.bf16.mxu0 %v4898_v0  ;;  %v1979_v50 = vshrl.u32 %v1962_v47, 16  ;;  %v2002_v0 = vshll.u32 %v6814_v49, 16  ;;  %v6846_v47 = vld [vmem:[#allocation2 + $0x3c] sm:$0x1] }
  0xbd   : > { %5656 = vmatprep.subr.bf16.mxu0 %v6152_v58 }
  0xbe   : > { %v1981_v54 = vrot.slane %v1979_v50, 4  ;;  %v2004_v59 = vrot.slane %v2002_v0, 5  ;;  %v2063_v50 = vshrl.u32 %v1974_v41, 16  ;;  %v2270_v41 = vrot.slane %v6812_v55, 5 }
  0xc0   : > { %5657 = vmatpush3.bf16.msra.mxu0 %v6152_v58  ;;  %v6168_v58 = vld [vmem:[%s7493_s1 + $0x1c0] sm:$0xff]   ;;  %v1985_v61 = vor.u32 %v1984_v16, %v1981_v54  ;;  %v2005_v5 = vsel %vm6433_vm9, %v2000_v56, %v2004_v59  ;;  %v6176_v16 = vld [vmem:[%s7493_s1 + $0x1f0] sm:$0xff]  }
  0xc1   : > { %5658 = vmatprep.subr.bf16.mxu0 %v6153_v25 }
  0xc2   : > { %v1986_v22 = vrot.slane %v1985_v61, 4  ;;  %v2058_v61 = vshll.u32 %v6846_v47, 16 }
  0xc3   : > { %5651 = vmatmul.mubr.bf16.gmra.mrb[4].mxu0 %v4899_v21  ;;  %v2010_v21 = vshll.u32 %v1966_v10, 16 }
  0xc4   : > { %5659 = vmatpush3.bf16.msra.mxu0 %v6153_v25  ;;  %5670 = vmatprep.mubr.bf16.mxu0 %v4932_v6  ;;  %v1991_v25 = vsel %vm6433_vm9, %v1986_v22, %v1990_v15  ;;  %v2021_v6 = vshrl.u32 %v1968_v13, 16  ;;  %v6858_v15 = vld [vmem:[#allocation2 + $0x44] sm:$0x1] }
  0xc5   : > { %5660 = vmatprep.subr.bf16.mxu0 %v6154_v20  ;;  %v4988_v60 = vcombine.low %v1991_v25, %v2005_v5 }
  0xc8   : > { %5661 = vmatpush3.bf16.msra.mxu0 %v6154_v20  ;;  %v2007_v20 = vshrl.u32 %v1966_v10, 16 }
  0xc9   : > { %5662 = vmatprep.subr.bf16.mxu0 %v6155_v19 }
  0xca   : > { %v2009_v35 = vrot.slane %v2007_v20, 4 }
  0xcc   : > { %5663 = vmatpush3.bf16.msra.mxu0 %v6155_v19  ;;  %v2024_v19 = vshll.u32 %v1968_v13, 16 }
  0xcd   : > { %5664 = vmatprep.subr.bf16.mxu0 %v6156_v8 }
  0xce   : > { %v2026_v40 = vrot.slane %v2024_v19, 5 }
  0xd0   : > { %5665 = vmatpush3.bf16.msra.mxu0 %v6156_v8  ;;  %v6173_v8 = vld [vmem:[%s7493_s1 + $0x1e0] sm:$0xff]  }
  0xd1   : > { %5666 = vmatprep.subr.bf16.mxu0 %v6157_v18 }
  0xd4   : > { %5667 = vmatpush3.bf16.msra.mxu0 %v6157_v18  ;;  %v2035_v18 = vshrl.u32 %v1970_v14, 16 }
  0xd5   : > { %5668 = vmatprep.subr.bf16.mxu0 %v6158_v23 }
  0xd8   : > { %5669 = vmatpush3.bf16.msra.mxu0 %v6158_v23  ;;  %v2038_v23 = vshll.u32 %v1970_v14, 16  ;;  %v2072_v14 = vshll.u32 %v6858_v15, 16 }
  0xd9   : > { %5678 = vmatprep.subr.bf16.mxu0 %v6159_v29 }
  0xdb   : > { %5671 = vmatmul.mubr.bf16.vlgmr.msra.gmra.mrb[0].mxu0 %v4933_v36  ;;  %v2012_v36 = vrot.slane %v2010_v21, 5  ;;  %v6179_v21 = vld [vmem:[%s7493_s1 + $0x200] sm:$0xff]  }
  0xdc   : > { %5679 = vmatpush3.bf16.msra.mxu0 %v6159_v29  ;;  %5674 = vmatprep.mubr.bf16.mxu0 %v4934_v38  ;;  %v2049_v29 = vshrl.u32 %v1972_v57, 16  ;;  %v6842_v38 = vld [vmem:[#allocation2 + $0x2c] sm:$0x1] }
  0xdd   : > { %5680 = vmatprep.subr.bf16.mxu0 %v6160_v39  ;;  %v2013_v28 = vor.u32 %v2012_v36, %v2009_v35  ;;  %v2030_v53 = vshll.u32 %v6842_v38, 16 }
  0xdf   : > { %v2014_v63 = vrot.slane %v2013_v28, 4  ;;  %v2032_v22 = vrot.slane %v2030_v53, 5  ;;  %v6185_v53 = vld [vmem:[%s7493_s1 + $0x230] sm:$0xff]  }
  0xe0   : > { %5681 = vmatpush3.bf16.msra.mxu0 %v6160_v39  ;;  %v2023_v39 = vrot.slane %v2021_v6, 4 }
  0xe1   : > { %5682 = vmatprep.subr.bf16.mxu0 %v6161_v42 }
  0xe2   : > { %v2027_v52 = vor.u32 %v2026_v40, %v2023_v39  ;;  %v6180_v39 = vld [vmem:[%s7493_s1 + $0x208] sm:$0xff]  }
  0xe3   : > { %5675 = vmatmul.mubr.bf16.gmra.mrb[4].mxu0 %v4935_v43  ;;  %v2040_v43 = vrot.slane %v2038_v23, 5 }
  0xe4   : > { %5683 = vmatpush3.bf16.msra.mxu0 %v6161_v42  ;;  %5694 = vmatprep.mubr.bf16.mxu0 %v6167_v44  ;;  %v2037_v42 = vrot.slane %v2035_v18, 4  ;;  %v2051_v44 = vrot.slane %v2049_v29, 4  ;;  %v2245_v18 = vld [vmem:[#allocation2 + $0x18] sm:$0xe] }
  0xe5   : > { %5684 = vmatprep.subr.bf16.mxu0 %v6162_v45 }
  0xe6   : > { %v2041_v24 = vor.u32 %v2040_v43, %v2037_v42  ;;  %v5001_v42 = vrot.slane %v2245_v18, 9  ;;  %v2274_v43 = vrot.slane %v6814_v49, 5 }
  0xe8   : > { %5685 = vmatpush3.bf16.msra.mxu0 %v6162_v45  ;;  %v2054_v45 = vrot.slane %v2052_v30, 5  ;;  %v2275_v49 = vsel %vm6542_vm12, %v5001_v42, %v2274_v43  ;;  %v2527_v42 = vld [vmem:[#allocation3 + $0x38] sm:$0x1] }
  0xe9   : > { %5686 = vmatprep.subr.bf16.mxu0 %v6163_v46  ;;  %v2528_v43 = vsel %vm6343_vm2, 0, %v2527_v42 }
  0xea   : > { %2529 = vst [vmem:[#allocation3 + $0x38] sm:$0x1] %v2528_v43 }
  0xec   : > { %5687 = vmatpush3.bf16.msra.mxu0 %v6163_v46  ;;  %v1976_v46 = vld [vmem:[#allocation2 + $0x48] sm:$0xf] }
  0xed   : > { %5688 = vmatprep.subr.bf16.mxu0 %v6164_v26  ;;  %v2080_v54 = vshll.u32 %v1976_v46, 16 }
  0xef   : > { %v2082_v59 = vrot.slane %v2080_v54, 5  ;;  %v2247_v54 = vld [vmem:[#allocation2 + $0x28] sm:$0xe] }
  0xf0   : > { %5689 = vmatpush3.bf16.msra.mxu0 %v6164_v26  ;;  %v6844_v26 = vld [vmem:[#allocation2 + $0x34] sm:$0x1] }
  0xf1   : > { %5690 = vmatprep.subr.bf16.mxu0 %v6165_v48  ;;  %v2044_v31 = vshll.u32 %v6844_v26, 16 }
  0xf3   : > { %v2046_v25 = vrot.slane %v2044_v31, 5 }
  0xf4   : > { %5691 = vmatpush3.bf16.msra.mxu0 %v6165_v48  ;;  %v2016_v48 = vshll.u32 %v6840_v34, 16 }
  0xf5   : > { %5692 = vmatprep.subr.bf16.mxu0 %v6166_v27 }
  0xf6   : > { %v2018_v0 = vrot.slane %v2016_v48, 5 }
  0xf8   : > { %5693 = vmatpush3.bf16.msra.mxu0 %v6166_v27  ;;  %v2077_v27 = vshrl.u32 %v1976_v46, 16  ;;  %v2019_v10 = vsel %vm6433_vm9, %v2014_v63, %v2018_v0  ;;  %v6181_v46 = vld [vmem:[%s7493_s1 + $0x210] sm:$0xff]   ;;  %v6186_v63 = vld [vmem:[%s7493_s1 + $0x238] sm:$0xff]  }
  0xf9   : > { %5702 = vmatprep.subr.bf16.mxu0 %v6168_v58 }
  0xfa   : > { %v2079_v56 = vrot.slane %v2077_v27, 4  ;;  %v2246_v27 = vld [vmem:[#allocation2 + $0x20] sm:$0xe] }
  0xfb   : > { %5695 = vmatmul.mubr.bf16.vlgmr.msra.gmra.mrb[0].mxu0 %v6169_v2  ;;  %v2065_v2 = vrot.slane %v2063_v50, 4  ;;  %v6182_v50 = vld [vmem:[%s7493_s1 + $0x218] sm:$0xff]   ;;  %v5002_v31 = vrot.slane %v2246_v27, 9 }
  0xfc   : > { %5703 = vmatpush3.bf16.msra.mxu0 %v6168_v58  ;;  %5698 = vmatprep.mubr.bf16.mxu0 %v6175_v4  ;;  %v2055_v58 = vor.u32 %v2054_v45, %v2051_v44  ;;  %v2068_v4 = vrot.slane %v2066_v51, 5  ;;  %v2083_v57 = vor.u32 %v2082_v59, %v2079_v56  ;;  %v6183_v51 = vld [vmem:[%s7493_s1 + $0x220] sm:$0xff]  }
  0xfd   : > { %5704 = vmatprep.subr.bf16.mxu0 %v6170_v3  ;;  %v2250_v56 = vld [vmem:[#allocation2 + $0x40] sm:$0xe] }
  0xfe   : > { %v2056_v5 = vrot.slane %v2055_v58, 4  ;;  %v2084_v35 = vrot.slane %v2083_v57, 4  ;;  %v2278_v58 = vrot.slane %v6840_v34, 5  ;;  %v6187_v57 = vld [vmem:[%s7495_s3 + $0x40] sm:$0xff]  }
  0xff   : > { %5750 = vmatprep.subr.bf16.mxu1 %v6187_v57 }
 0x100   : > { %5705 = vmatpush3.bf16.msra.mxu0 %v6170_v3  ;;  %v2028_v3 = vrot.slane %v2027_v52, 4  ;;  %v6184_v52 = vld [vmem:[%s7493_s1 + $0x228] sm:$0xff]   ;;  %5751 = vmatpush3.bf16.msra.mxu1 %v6187_v57 }
 0x101   : > { %5706 = vmatprep.subr.bf16.mxu0 %v6171_v1 }
 0x102   : > { %v2033_v13 = vsel %vm6433_vm9, %v2028_v3, %v2032_v22  ;;  %v2290_v3 = vrot.slane %v6846_v47, 5  ;;  %v2279_v22 = vsel %vm6542_vm12, %v5002_v31, %v2278_v58  ;;  %v2506_v58 = vld [vmem:[#allocation3] sm:$0x1] }
 0x103   : > { %5699 = vmatmul.mubr.bf16.gmra.mrb[4].mxu0 %v6177_v9  ;;  %v2060_v9 = vrot.slane %v2058_v61, 5  ;;  %v4989_v23 = vcombine.low %v2019_v10, %v2033_v13  ;;  %v5003_v61 = vrot.slane %v2247_v54, 9  ;;  %v2524_v54 = vld [vmem:[#allocation3 + $0x30] sm:$0x1] }
 0x104   : > { %5707 = vmatpush3.bf16.msra.mxu0 %v6171_v1  ;;  %5718 = vmatprep.mubr.bf16.mxu0 %v4988_v60  ;;  %v2042_v1 = vrot.slane %v2041_v24, 4  ;;  %v6860_v60 = vld [vmem:[#allocation2 + $0x4c] sm:$0x1]  ;;  %v2249_v24 = vld [vmem:[#allocation2 + $0x38] sm:$0xe] }
 0x105   : > { %5708 = vmatprep.subr.bf16.mxu0 %v6172_v11  ;;  %v2086_v20 = vshll.u32 %v6860_v60, 16  ;;  %v2061_v19 = vsel %vm6433_vm9, %v2056_v5, %v2060_v9  ;;  %v2294_v5 = vrot.slane %v6858_v15, 5  ;;  %v2298_v10 = vrot.slane %v6860_v60, 5 }
 0x106   : > { %v2047_v6 = vsel %vm6433_vm9, %v2042_v1, %v2046_v25  ;;  %v2251_v1 = vld [vmem:[#allocation2 + $0x48] sm:$0xe]  ;;  %v5006_v25 = vrot.slane %v2250_v56, 9 }
 0x107   : > { %v4990_v30 = vcombine.low %v2047_v6, %v2061_v19  ;;  %v2088_v36 = vrot.slane %v2086_v20, 5  ;;  %v5007_v9 = vrot.slane %v2251_v1, 9  ;;  %v2515_v20 = vld [vmem:[#allocation3 + $0x18] sm:$0x1]  ;;  %v2509_v6 = vld [vmem:[#allocation3 + $0x8] sm:$0x1] }
 0x108   : > { %5709 = vmatpush3.bf16.msra.mxu0 %v6172_v11  ;;  %v2069_v11 = vor.u32 %v2068_v4, %v2065_v2  ;;  %v2286_v2 = vrot.slane %v6844_v26, 5  ;;  %v5005_v4 = vrot.slane %v2249_v24, 9  ;;  %v2516_v15 = vsel %vm6343_vm2, 0, %v2515_v20  ;;  %v2539_v19 = vld [vmem:[#allocation3 + $0xc] sm:$0x1] }
 0x109   : > { %5710 = vmatprep.subr.bf16.mxu0 %v6173_v8  ;;  %v2089_v45 = vsel %vm6433_vm9, %v2084_v35, %v2088_v36  ;;  %v2299_v13 = vsel %vm6542_vm12, %v5007_v9, %v2298_v10  ;;  %2517 = vst [vmem:[#allocation3 + $0x18] sm:$0x1] %v2516_v15  ;;  %v2540_v18 = vsel %vm6353_vm4, 0, %v2539_v19  ;;  %v2512_v35 = vld [vmem:[#allocation3 + $0x10] sm:$0x1]  ;;  %v2525_v24 = vsel %vm6343_vm2, 0, %v2524_v54 }
 0x10a   : > { %v2070_v29 = vrot.slane %v2069_v11, 4  ;;  %v2291_v59 = vsel %vm6542_vm12, %v5005_v4, %v2290_v3  ;;  %v2295_v11 = vsel %vm6542_vm12, %v5006_v25, %v2294_v5  ;;  %2541 = vst [vmem:[#allocation3 + $0xc] sm:$0x1] %v2540_v18  ;;  %v2542_v36 = vld [vmem:[#allocation3 + $0x14] sm:$0x1]  ;;  %v6193_v4 = vld [vmem:[%s7495_s3 + $0x70] sm:$0xff]  }
 0x10b   : > { %2526 = vst [vmem:[#allocation3 + $0x30] sm:$0x1] %v2525_v24  ;;  %v6194_v3 = vld [vmem:[%s7495_s3 + $0x78] sm:$0xff]   ;;  %v6997_v1 = vld [vmem:[%s7494_s2] ss:$0 sm:$0xff] }
 0x10c   : > { %5711 = vmatpush3.bf16.msra.mxu0 %v6173_v8  ;;  %v2244_v8 = vld [vmem:[#allocation2 + $0x10] sm:$0xe] }
 0x10d   : > { %5712 = vmatprep.subr.bf16.mxu0 %v6174_v33  ;;  %v5000_v40 = vrot.slane %v2244_v8, 9  ;;  %v2510_v8 = vsel %vm6343_vm2, 0, %v2509_v6 }
 0x10e   : > { %2511 = vst [vmem:[#allocation3 + $0x8] sm:$0x1] %v2510_v8 }
 0x10f   : > { %v2271_v55 = vsel %vm6542_vm12, %v5000_v40, %v2270_v41  ;;  %v2543_v40 = vsel %vm6353_vm4, 0, %v2542_v36  ;;  %v6188_v41 = vld [vmem:[%s7495_s3 + $0x48] sm:$0xff]  }
 0x110   : > { %5713 = vmatpush3.bf16.msra.mxu0 %v6174_v33  ;;  %v2074_v33 = vrot.slane %v2072_v14, 5  ;;  %v5024_v48 = vcombine.low %v2271_v55, %v2275_v49  ;;  %v5027_v14 = vcombine.low %v2295_v11, %v2299_v13  ;;  %2544 = vst [vmem:[#allocation3 + $0x14] sm:$0x1] %v2543_v40  ;;  %5752 = vmatprep.subr.bf16.mxu1 %v6188_v41  ;;  %v2521_v55 = vld [vmem:[#allocation3 + $0x28] sm:$0x1] }
 0x111   : > { %5714 = vmatprep.subr.bf16.mxu0 %v6176_v16  ;;  %5753 = vmatpush3.bf16.msra.mxu1 %v6188_v41  ;;  %v2551_v49 = vld [vmem:[#allocation3 + $0x2c] sm:$0x1]  ;;  %v2659_v36 = vld [vmem:[#allocation3 + $0x18] sm:$0xf] }
 0x112   : > { %v2075_v44 = vsel %vm6433_vm9, %v2070_v29, %v2074_v33  ;;  %v2548_v29 = vld [vmem:[#allocation3 + $0x24] sm:$0x1] }
 0x113   : > { %v4991_v28 = vcombine.low %v2075_v44, %v2089_v45  ;;  %v2549_v33 = vsel %vm6353_vm4, 0, %v2548_v29  ;;  %v6189_v44 = vld [vmem:[%s7495_s3 + $0x50] sm:$0xff]   ;;  %v2557_v45 = vld [vmem:[#allocation3 + $0x3c] sm:$0x1] }
 0x114   : > { %5715 = vmatpush3.bf16.msra.mxu0 %v6176_v16  ;;  %v2248_v16 = vld [vmem:[#allocation2 + $0x30] sm:$0xe]  ;;  %2550 = vst [vmem:[#allocation3 + $0x24] sm:$0x1] %v2549_v33  ;;  %5754 = vmatprep.subr.bf16.mxu1 %v6189_v44 }
 0x115   : > { %5716 = vmatprep.subr.bf16.mxu0 %v6178_v62  ;;  %v5004_v0 = vrot.slane %v2248_v16, 9  ;;  %5755 = vmatpush3.bf16.msra.mxu1 %v6189_v44  ;;  %v2554_v16 = vld [vmem:[#allocation3 + $0x34] sm:$0x1] }
 0x116   : > { %v2555_v31 = vsel %vm6353_vm4, 0, %v2554_v16 }
 0x117   : > { %2556 = vst [vmem:[#allocation3 + $0x34] sm:$0x1] %v2555_v31 }
 0x118   : > { %5717 = vmatpush3.bf16.msra.mxu0 %v6178_v62  ;;  %v2282_v62 = vrot.slane %v6842_v38, 5  ;;  %v2287_v38 = vsel %vm6542_vm12, %v5004_v0, %v2286_v2  ;;  %v6191_v0 = vld [vmem:[%s7495_s3 + $0x60] sm:$0xff]   ;;  %v6192_v2 = vld [vmem:[%s7495_s3 + $0x68] sm:$0xff]  }
 0x119   : > { %5726 = vmatprep.subr.bf16.mxu0 %v6179_v21  ;;  %v5026_v47 = vcombine.low %v2287_v38, %v2291_v59  ;;  %v2563_v38 = vld [vmem:[#allocation3 + $0x4c] sm:$0x1] }
 0x11a   : > { %v2283_v34 = vsel %vm6542_vm12, %v5003_v61, %v2282_v62  ;;  %v2536_v61 = vld [vmem:[#allocation3 + $0x4] sm:$0x1]  ;;  %v2507_v62 = vsel %vm6343_vm2, 0, %v2506_v58  ;;  %v2564_v59 = vsel %vm6353_vm4, 0, %v2563_v38 }
 0x11b   : > { %5719 = vmatmul.mubr.bf16.vlgmr.msra.gmra.mrb[0].mxu0 %v4989_v23  ;;  %v5025_v26 = vcombine.low %v2279_v22, %v2283_v34  ;;  %v2518_v23 = vld [vmem:[#allocation3 + $0x20] sm:$0x1]  ;;  %2508 = vst [vmem:[#allocation3] sm:$0x1] %v2507_v62  ;;  %v6987_v22 = vld [vmem:[%s7495_s3] sm:$0xff]  }
 0x11c   : > { %5727 = vmatpush3.bf16.msra.mxu0 %v6179_v21  ;;  %5722 = vmatprep.mubr.bf16.mxu0 %v4990_v30  ;;  %v2545_v21 = vld [vmem:[#allocation3 + $0x1c] sm:$0x1]  ;;  %v2519_v30 = vsel %vm6343_vm2, 0, %v2518_v23  ;;  %v2533_v34 = vld [vmem:[#allocation3 + $0x48] sm:$0x1] }
 0x11d   : > { %5728 = vmatprep.subr.bf16.mxu0 %v6180_v39  ;;  %v2546_v60 = vsel %vm6353_vm4, 0, %v2545_v21  ;;  %2520 = vst [vmem:[#allocation3 + $0x20] sm:$0x1] %v2519_v30  ;;  %v2534_v56 = vsel %vm6343_vm2, 0, %v2533_v34  ;;  %2565 = vst [vmem:[#allocation3 + $0x4c] sm:$0x1] %v2564_v59 }
 0x11e   : > { %2547 = vst [vmem:[#allocation3 + $0x1c] sm:$0x1] %v2546_v60  ;;  %2535 = vst [vmem:[#allocation3 + $0x48] sm:$0x1] %v2534_v56 }
 0x120   : > { %5729 = vmatpush3.bf16.msra.mxu0 %v6180_v39  ;;  %v2513_v39 = vsel %vm6343_vm2, 0, %v2512_v35 }
 0x121   : > { %5730 = vmatprep.subr.bf16.mxu0 %v6181_v46  ;;  %2514 = vst [vmem:[#allocation3 + $0x10] sm:$0x1] %v2513_v39 }
 0x122   : > { %v6999_v25 = vld [vmem:[#allocation3] sm:$0xf] }
 0x123   : > { %5723 = vmatmul.mubr.bf16.gmra.mrb[4].mxu0 %v4991_v28  ;;  %v2522_v28 = vsel %vm6343_vm2, 0, %v2521_v55  ;;  %v2731_v57 = vshll.u32 %v6999_v25, 16 }
 0x124   : > { %5731 = vmatpush3.bf16.msra.mxu0 %v6181_v46  ;;  %5742 = vmatprep.mubr.bf16.mxu0 %v5024_v48  ;;  %v2558_v46 = vsel %vm6353_vm4, 0, %v2557_v45  ;;  %v2552_v48 = vsel %vm6353_vm4, 0, %v2551_v49  ;;  %2523 = vst [vmem:[#allocation3 + $0x28] sm:$0x1] %v2522_v28  ;;  %v2647_v45 = vld [vmem:[#allocation3 + $0x8] sm:$0xf] }
 0x125   : > { %5732 = vmatprep.subr.bf16.mxu0 %v6182_v50  ;;  %2559 = vst [vmem:[#allocation3 + $0x3c] sm:$0x1] %v2558_v46  ;;  %2553 = vst [vmem:[#allocation3 + $0x2c] sm:$0x1] %v2552_v48  ;;  %v7012_v33 = vrot.slane %v2731_v57, 5 }
 0x126   : > { %v2662_v39 = vld [vmem:[#allocation3 + $0x1c] sm:$0x1]  ;;  %v2665_v31 = vld [vmem:[#allocation3 + $0x20] sm:$0xf] }
 0x128   : > { %5733 = vmatpush3.bf16.msra.mxu0 %v6182_v50  ;;  %v2530_v50 = vld [vmem:[#allocation3 + $0x40] sm:$0x1]  ;;  %v2653_v59 = vld [vmem:[#allocation3 + $0x10] sm:$0xf] }
 0x129   : > { %5734 = vmatprep.subr.bf16.mxu0 %v6183_v51 }
 0x12c   : > { %5735 = vmatpush3.bf16.msra.mxu0 %v6183_v51  ;;  %v2560_v51 = vld [vmem:[#allocation3 + $0x44] sm:$0x1] }
 0x12d   : > { %5736 = vmatprep.subr.bf16.mxu0 %v6184_v52  ;;  %v2561_v27 = vsel %vm6353_vm4, 0, %v2560_v51 }
 0x12e   : > { %2562 = vst [vmem:[#allocation3 + $0x44] sm:$0x1] %v2561_v27 }
 0x130   : > { %5737 = vmatpush3.bf16.msra.mxu0 %v6184_v52  ;;  %v6190_v52 = vld [vmem:[%s7495_s3 + $0x58] sm:$0xff]  }
 0x131   : > { %5738 = vmatprep.subr.bf16.mxu0 %v6185_v53  ;;  %5756 = vmatprep.subr.bf16.mxu1 %v6190_v52 }
 0x132   : > { %5757 = vmatpush3.bf16.msra.mxu1 %v6190_v52 }
 0x133   : > { %5758 = vmatprep.subr.bf16.mxu1 %v6191_v0 }
 0x134   : > { %5739 = vmatpush3.bf16.msra.mxu0 %v6185_v53  ;;  %v2531_v53 = vsel %vm6343_vm2, 0, %v2530_v50  ;;  %v2650_v50 = vld [vmem:[#allocation3 + $0xc] sm:$0x1] }
 0x135   : > { %5740 = vmatprep.subr.bf16.mxu0 %v6186_v63  ;;  %2532 = vst [vmem:[#allocation3 + $0x40] sm:$0x1] %v2531_v53 }
 0x136   : > { %5759 = vmatpush3.bf16.msra.mxu1 %v6191_v0  ;;  %v2668_v0 = vld [vmem:[#allocation3 + $0x24] sm:$0x1] }
 0x137   : > { %5760 = vmatprep.subr.bf16.mxu1 %v6192_v2 }
 0x138   : > { %5741 = vmatpush3.bf16.msra.mxu0 %v6186_v63  ;;  %v2537_v63 = vsel %vm6353_vm4, 0, %v2536_v61 }
 0x139   : > { %2538 = vst [vmem:[#allocation3 + $0x4] sm:$0x1] %v2537_v63 }
 0x13a   : > { %5761 = vmatpush3.bf16.msra.mxu1 %v6192_v2 }
 0x13b   : > { %5743 = vmatmul.mubr.bf16.vlgmr.msra.gmra.mrb[0].mxu0 %v5025_v26  ;;  %5762 = vmatprep.subr.bf16.mxu1 %v6193_v4 }
 0x13c   : > { %5746 = vmatprep.mubr.bf16.mxu0 %v5026_v47 }
 0x13e   : > { %5763 = vmatpush3.bf16.msra.mxu1 %v6193_v4 }
 0x13f   : > { %5764 = vmatprep.subr.bf16.mxu1 %v6194_v3 }
 0x140   : > { %v7007_v6 = vld [vmem:[#allocation3 + $0x4] sm:$0x1] }
 0x141   : > { %v2737_v18 = vshll.u32 %v7007_v6, 16 }
 0x142   : > { %5765 = vmatpush3.bf16.msra.mxu1 %v6194_v3 }
 0x143   : > { %5747 = vmatmul.mubr.bf16.gmra.mrb[4].mxu0 %v5027_v14  ;;  %5774 = vmatprep.subr.bf16.mxu1 %v6987_v22  ;;  %v2728_v14 = vshrl.u32 %v6999_v25, 16 }
 0x145   : > { %v7010_v30 = vrot.slane %v2728_v14, 4 }
 0x20e   : > { %v5744_v26 = vpop.f32.mrb[0].mxu0 }
 0x20f   : > { %v2463_v47 = vadd.f32 %v5744_v26, %v6997_v1  ;;  %v2415_v5 = vpop.f32.mrb[1].mxu0  ;;  %v2656_v26 = vld [vmem:[#allocation3 + $0x14] sm:$0x1] }
 0x210   : > { %v2461_v9 = vadd.f32 %v6997_v1, %v2415_v5  ;;  %v5745_v10 = vpop.f32.mrb[2].mxu0 }
 0x211   : > { %v2471_v11 = vmax.f32 %v2463_v47, 0.0  ;;  %v2464_v13 = vadd.f32 %v5745_v10, %v6997_v1  ;;  %v2418_v17 = vpop.f32.mrb[3].mxu0 }
 0x212   : > { %v2469_v20 = vmax.f32 %v2461_v9, 0.0  ;;  %v2462_v21 = vadd.f32 %v6997_v1, %v2418_v17 }
 0x213   : > { %v5312_v15 = vpack.c.bf16 %v2471_v11, %v2471_v11  ;;  %v2472_v60 = vmax.f32 %v2464_v13, 0.0 }
 0x214   : > { %v5310_v19 = vpack.c.bf16 %v2469_v20, %v2469_v20  ;;  %v2470_v8 = vmax.f32 %v2462_v21, 0.0 }
 0x215   : > { %v2583_v23 = vshrl.u32 %v5312_v15, 16  ;;  %v5313_v29 = vpack.c.bf16 %v2472_v60, %v2472_v60  ;;  %v2586_v35 = vshll.u32 %v5312_v15, 16 }
 0x216   : > { %v2567_v40 = vshrl.u32 %v5310_v19, 16  ;;  %v2570_v41 = vshll.u32 %v5310_v19, 16  ;;  %v5311_v42 = vpack.c.bf16 %v2470_v8, %v2470_v8  ;;  %v5748_v43 = vpop.f32.mrb[4].mxu0  ;;  %v2683_v8 = vld [vmem:[#allocation3 + $0x38] sm:$0xf] }
 0x217   : > { %v2585_v44 = vrot.slane %v2583_v23, 7  ;;  %v2591_v46 = vshrl.u32 %v5313_v29, 16  ;;  %v2594_v55 = vshll.u32 %v5313_v29, 16  ;;  %v2467_v49 = vadd.f32 %v5748_v43, %v6997_v1  ;;  %v2431_v28 = vpop.f32.mrb[5].mxu0  ;;  %v2674_v43 = vld [vmem:[#allocation3 + $0x2c] sm:$0x1] }
 0x218   : > { %v2569_v48 = vrot.slane %v2567_v40, 7  ;;  %v2575_v51 = vshrl.u32 %v5311_v42, 16  ;;  %v2578_v52 = vshll.u32 %v5311_v42, 16  ;;  %v2465_v53 = vadd.f32 %v6997_v1, %v2431_v28  ;;  %v5749_v27 = vpop.f32.mrb[6].mxu0  ;;  %v2671_v42 = vld [vmem:[#allocation3 + $0x28] sm:$0xf] }
 0x219   : > { %v2588_v54 = vor.u32 %v2586_v35, %v2585_v44  ;;  %v2589_v16 = vrot.slane %v2585_v44, 4  ;;  %v2593_v24 = vrot.slane %v2591_v46, 7  ;;  %v2475_v58 = vmax.f32 %v2467_v49, 0.0  ;;  %v2434_v61 = vpop.f32.mrb[7].mxu0 }
 0x21a   : > { %v2572_v62 = vor.u32 %v2570_v41, %v2569_v48  ;;  %v2573_v63 = vrot.slane %v2569_v48, 4  ;;  %v2577_v2 = vrot.slane %v2575_v51, 7  ;;  %v2473_v4 = vmax.f32 %v2465_v53, 0.0 }
 0x21b   : > { %v2660_v3 = vsel %vm6373_vm6, %v2588_v54, %v2659_v36  ;;  %v2663_v34 = vsel %vm6343_vm2, %v2589_v16, %v2662_v39  ;;  %v2596_v56 = vor.u32 %v2594_v55, %v2593_v24  ;;  %v2597_v38 = vrot.slane %v2593_v24, 4  ;;  %v2686_v39 = vld [vmem:[#allocation3 + $0x3c] sm:$0x1]  ;;  %v2689_v16 = vld [vmem:[#allocation3 + $0x40] sm:$0xf] }
 0x21c   : > { %2661 = vst [vmem:[#allocation3 + $0x18] sm:$0xf] %v2660_v3  ;;  %2664 = vst [vmem:[#allocation3 + $0x1c] sm:$0x1] %v2663_v34  ;;  %v2648_v47 = vsel %vm6373_vm6, %v2572_v62, %v2647_v45  ;;  %v2651_v5 = vsel %vm6343_vm2, %v2573_v63, %v2650_v50  ;;  %v2580_v9 = vor.u32 %v2578_v52, %v2577_v2  ;;  %v2581_v10 = vrot.slane %v2577_v2, 4 }
 0x21d   : > { %2649 = vst [vmem:[#allocation3 + $0x8] sm:$0xf] %v2648_v47  ;;  %2652 = vst [vmem:[#allocation3 + $0xc] sm:$0x1] %v2651_v5  ;;  %v2666_v11 = vsel %vm6373_vm6, %v2596_v56, %v2665_v31  ;;  %v2669_v13 = vsel %vm6343_vm2, %v2597_v38, %v2668_v0  ;;  %v5316_v17 = vpack.c.bf16 %v2475_v58, %v2475_v58  ;;  %v2692_v24 = vld [vmem:[#allocation3 + $0x44] sm:$0x1] }
 0x21e   : > { %v5314_v14 = vpack.c.bf16 %v2473_v4, %v2473_v4  ;;  %2667 = vst [vmem:[#allocation3 + $0x20] sm:$0xf] %v2666_v11  ;;  %2670 = vst [vmem:[#allocation3 + $0x24] sm:$0x1] %v2669_v13  ;;  %v2654_v57 = vsel %vm6373_vm6, %v2580_v9, %v2653_v59  ;;  %v2657_v20 = vsel %vm6343_vm2, %v2581_v10, %v2656_v26  ;;  %v2677_v31 = vld [vmem:[#allocation3 + $0x30] sm:$0xf] }
 0x21f   : > { %v2468_v21 = vadd.f32 %v5749_v27, %v6997_v1  ;;  %v2466_v15 = vadd.f32 %v6997_v1, %v2434_v61  ;;  %2655 = vst [vmem:[#allocation3 + $0x10] sm:$0xf] %v2654_v57  ;;  %2658 = vst [vmem:[#allocation3 + $0x14] sm:$0x1] %v2657_v20  ;;  %v2615_v60 = vshrl.u32 %v5316_v17, 16  ;;  %v2618_v36 = vshll.u32 %v5316_v17, 16 }
 0x220   : > { %v2599_v19 = vshrl.u32 %v5314_v14, 16  ;;  %v2602_v41 = vshll.u32 %v5314_v14, 16  ;;  %v2734_v46 = vor.u32 %v7012_v33, %v7010_v30  ;;  %v7038_v1 = vrot.slane %v2737_v18, 5  ;;  %v2680_v4 = vld [vmem:[#allocation3 + $0x34] sm:$0x1] }
 0x221   : > { %v2476_v23 = vmax.f32 %v2468_v21, 0.0  ;;  %v2474_v29 = vmax.f32 %v2466_v15, 0.0  ;;  %v2617_v35 = vrot.slane %v2615_v60, 7 }
 0x222   : > { %v2601_v40 = vrot.slane %v2599_v19, 7  ;;  %v2735_v3 = vrot.slane %v2734_v46, 4 }
 0x223   : > { %v5317_v44 = vpack.c.bf16 %v2476_v23, %v2476_v23  ;;  %v5315_v45 = vpack.c.bf16 %v2474_v29, %v2474_v29  ;;  %v2620_v55 = vor.u32 %v2618_v36, %v2617_v35  ;;  %v2621_v49 = vrot.slane %v2617_v35, 4  ;;  %v7059_v9 = vld [vmem:[#allocation3 + $0x18] sm:$0xf]  ;;  %v7071_v15 = vld [vmem:[#allocation3 + $0x1c] sm:$0x1] }
 0x224   : > { %v2604_v28 = vor.u32 %v2602_v41, %v2601_v40  ;;  %v2605_v48 = vrot.slane %v2601_v40, 4  ;;  %v7040_v27 = vld [vmem:[#allocation3 + $0x8] sm:$0xf]  ;;  %v7050_v58 = vld [vmem:[#allocation3 + $0xc] sm:$0x1]  ;;  %v2770_v23 = vshrl.u32 %v7059_v9, 16  ;;  %v2740_v32 = vsel %vm6433_vm9, %v2735_v3, %v7038_v1 }
 0x225   : > { %v2623_v50 = vshrl.u32 %v5317_v44, 16  ;;  %v2626_v51 = vshll.u32 %v5317_v44, 16  ;;  %v2607_v52 = vshrl.u32 %v5315_v45, 16  ;;  %v2610_v53 = vshll.u32 %v5315_v45, 16  ;;  %v7075_v29 = vld [vmem:[#allocation3 + $0x20] sm:$0xf] }
 0x226   : > { %v2684_v54 = vsel %vm6373_vm6, %v2620_v55, %v2683_v8  ;;  %v2687_v30 = vsel %vm6343_vm2, %v2621_v49, %v2686_v39  ;;  %v2672_v18 = vsel %vm6373_vm6, %v2604_v28, %v2671_v42  ;;  %v2675_v33 = vsel %vm6343_vm2, %v2605_v48, %v2674_v43  ;;  %v7054_v2 = vld [vmem:[#allocation3 + $0x10] sm:$0xf]  ;;  %v7061_v10 = vld [vmem:[#allocation3 + $0x14] sm:$0x1]  ;;  %v7088_v49 = vld [vmem:[#allocation3 + $0x24] sm:$0x1] }
 0x227   : > { %2685 = vst [vmem:[#allocation3 + $0x38] sm:$0xf] %v2684_v54  ;;  %2688 = vst [vmem:[#allocation3 + $0x3c] sm:$0x1] %v2687_v30  ;;  %v2625_v61 = vrot.slane %v2623_v50, 7  ;;  %v2609_v62 = vrot.slane %v2607_v52, 7 }
 0x228   : > { %2673 = vst [vmem:[#allocation3 + $0x28] sm:$0xf] %v2672_v18  ;;  %2676 = vst [vmem:[#allocation3 + $0x2c] sm:$0x1] %v2675_v33  ;;  %v2742_v63 = vshrl.u32 %v7040_v27, 16  ;;  %v2745_v0 = vshll.u32 %v7040_v27, 16 }
 0x229   : > { %v2751_v34 = vshll.u32 %v7050_v58, 16  ;;  %v2756_v56 = vshrl.u32 %v7054_v2, 16  ;;  %v2759_v38 = vshll.u32 %v7054_v2, 16  ;;  %v2628_v59 = vor.u32 %v2626_v51, %v2625_v61 }
 0x22a   : > { %v2629_v26 = vrot.slane %v2625_v61, 4  ;;  %v2612_v47 = vor.u32 %v2610_v53, %v2609_v62  ;;  %v2613_v5 = vrot.slane %v2609_v62, 4  ;;  %v2744_v11 = vrot.slane %v2742_v63, 4  ;;  %v6196_v63 = vld [vmem:[%s7495_s3 + $0x8] sm:$0xff]  }
 0x22b   : > { %v2747_v13 = vrot.slane %v2745_v0, 5  ;;  %v2758_v17 = vrot.slane %v2756_v56, 4  ;;  %v2690_v14 = vsel %vm6373_vm6, %v2628_v59, %v2689_v16  ;;  %v2761_v19 = vrot.slane %v2759_v38, 5 }
 0x22c   : > { %v2693_v57 = vsel %vm6343_vm2, %v2629_v26, %v2692_v24  ;;  %v2678_v20 = vsel %vm6373_vm6, %v2612_v47, %v2677_v31  ;;  %v2681_v21 = vsel %vm6343_vm2, %v2613_v5, %v2680_v4  ;;  %2691 = vst [vmem:[#allocation3 + $0x40] sm:$0xf] %v2690_v14  ;;  %v2765_v8 = vshll.u32 %v7061_v10, 16  ;;  %v3124_v47 = vld [vmem:[#allocation3 + $0x10] sm:$0xe] }
 0x22d   : > { %2694 = vst [vmem:[#allocation3 + $0x44] sm:$0x1] %v2693_v57  ;;  %2679 = vst [vmem:[#allocation3 + $0x30] sm:$0xf] %v2678_v20  ;;  %v2748_v60 = vor.u32 %v2747_v13, %v2744_v11  ;;  %v2753_v12 = vrot.slane %v2751_v34, 5  ;;  %v2773_v35 = vshll.u32 %v7059_v9, 16  ;;  %v2762_v39 = vor.u32 %v2761_v19, %v2758_v17 }
 0x22e   : > { %2682 = vst [vmem:[#allocation3 + $0x34] sm:$0x1] %v2681_v21  ;;  %v2772_v40 = vrot.slane %v2770_v23, 4  ;;  %v2779_v41 = vshll.u32 %v7071_v15, 16  ;;  %v2784_v44 = vshrl.u32 %v7075_v29, 16  ;;  %v2787_v45 = vshll.u32 %v7075_v29, 16 }
 0x22f   : > { %v2749_v36 = vrot.slane %v2748_v60, 4  ;;  %v7082_v42 = vld [vmem:[#allocation3 + $0x28] sm:$0xf]  ;;  %v2775_v43 = vrot.slane %v2773_v35, 5  ;;  %v2763_v55 = vrot.slane %v2762_v39, 4  ;;  %v2767_v1 = vrot.slane %v2765_v8, 5 }
 0x230   : > { %v2798_v28 = vshrl.u32 %v7082_v42, 16  ;;  %v7091_v51 = vld [vmem:[#allocation3 + $0x2c] sm:$0x1]  ;;  %v2786_v52 = vrot.slane %v2784_v44, 4  ;;  %v2789_v53 = vrot.slane %v2787_v45, 5  ;;  %v2781_v54 = vrot.slane %v2779_v41, 5 }
 0x231   : > { %v2754_v46 = vsel %vm6433_vm9, %v2749_v36, %v2753_v12  ;;  %v2776_v50 = vor.u32 %v2775_v43, %v2772_v40  ;;  %v2801_v18 = vshll.u32 %v7082_v42, 16  ;;  %v7094_v33 = vld [vmem:[#allocation3 + $0x38] sm:$0xf]  ;;  %v2768_v16 = vsel %vm6433_vm9, %v2763_v55, %v2767_v1  ;;  %v2726_v13 = vld [vmem:[#allocation3 + $0x3c] sm:$0x1]  ;;  %v6197_v41 = vld [vmem:[%s7495_s3 + $0x10] sm:$0xff]  }
 0x232   : > { %v5061_v48 = vcombine.low %v2740_v32, %v2754_v46  ;;  %v2800_v30 = vrot.slane %v2798_v28, 4  ;;  %v2790_v31 = vor.u32 %v2789_v53, %v2786_v52  ;;  %v2793_v61 = vshll.u32 %v7088_v49, 16  ;;  %v3125_v57 = vld [vmem:[#allocation3 + $0x18] sm:$0xe] }
 0x233   : > { %v2777_v24 = vrot.slane %v2776_v50, 4  ;;  %v2803_v0 = vrot.slane %v2801_v18, 5  ;;  %v2807_v4 = vshll.u32 %v7091_v51, 16  ;;  %v2826_v26 = vshrl.u32 %v7094_v33, 16  ;;  %v3129_v28 = vld [vmem:[#allocation3 + $0x38] sm:$0xe] }
 0x234   : > { %5766 = vmatprep.mubr.bf16.mxu1 %v5061_v48  ;;  %v7099_v62 = vld [vmem:[#allocation3 + $0x30] sm:$0xf]  ;;  %v2791_v59 = vrot.slane %v2790_v31, 4  ;;  %v3156_v20 = vrot.slane %v7061_v10, 5  ;;  %v2829_v19 = vshll.u32 %v7094_v33, 16  ;;  %v2795_v8 = vrot.slane %v2793_v61, 5 }
 0x235   : > { %v2725_v3 = vld [vmem:[#allocation3 + $0x34] sm:$0x1]  ;;  %v2812_v34 = vshrl.u32 %v7099_v62, 16  ;;  %v2815_v56 = vshll.u32 %v7099_v62, 16  ;;  %v2782_v38 = vsel %vm6433_vm9, %v2777_v24, %v2781_v54  ;;  %v2804_v11 = vor.u32 %v2803_v0, %v2800_v30  ;;  %v6199_v54 = vld [vmem:[%s7495_s3 + $0x18] sm:$0xff]  }
 0x236   : > { %v5062_v5 = vcombine.low %v2768_v16, %v2782_v38  ;;  %v2821_v21 = vshll.u32 %v2725_v3, 16  ;;  %v2828_v60 = vrot.slane %v2826_v26, 4  ;;  %v2809_v32 = vrot.slane %v2807_v4, 5  ;;  %v6203_v38 = vld [vmem:[%s7495_s3 + $0x38] sm:$0xff]   ;;  %v3122_v26 = vld [vmem:[#allocation3] sm:$0xe] }
 0x237   : > { %v2814_v17 = vrot.slane %v2812_v34, 4  ;;  %v2817_v14 = vrot.slane %v2815_v56, 5  ;;  %v2805_v23 = vrot.slane %v2804_v11, 4  ;;  %v3160_v35 = vrot.slane %v7071_v15, 5  ;;  %v6207_v11 = vld [vmem:[%s7495_s3 + $0x88] sm:$0xff]  }
 0x238   : > { %5767 = vmatmul.mubr.bf16.vlgmr.msra.gmra.mrb[0].mxu1 %v5062_v5  ;;  %v2831_v36 = vrot.slane %v2829_v19, 5  ;;  %v2835_v39 = vshll.u32 %v2726_v13, 16  ;;  %v2796_v40 = vsel %vm6433_vm9, %v2791_v59, %v2795_v8  ;;  %v5087_v44 = vrot.slane %v3124_v47, 9  ;;  %v6205_v59 = vld [vmem:[%s7495_s3 + $0x80] sm:$0xff]   ;;  %v3123_v47 = vld [vmem:[#allocation3 + $0x8] sm:$0xe] }
 0x239   : > { %v2818_v12 = vor.u32 %v2817_v14, %v2814_v17  ;;  %5775 = vmatpush3.bf16.msra.mxu1 %v6987_v22  ;;  %v2810_v10 = vsel %vm6433_vm9, %v2805_v23, %v2809_v32  ;;  %v2823_v46 = vrot.slane %v2821_v21, 5  ;;  %v5088_v55 = vrot.slane %v3125_v57, 9  ;;  %v3128_v22 = vld [vmem:[#allocation3 + $0x30] sm:$0xe]  ;;  %v6214_v19 = vld [vmem:[%s7495_s3 + $0xb8] sm:$0xff]  }
 0x23a   : > { %5776 = vmatprep.subr.bf16.mxu1 %v6196_v63  ;;  %v5063_v45 = vcombine.low %v2796_v40, %v2810_v10  ;;  %v2832_v15 = vor.u32 %v2831_v36, %v2828_v60  ;;  %v7123_v1 = vsel %vm6542_vm12, %v5087_v44, %v3156_v20  ;;  %v2837_v52 = vrot.slane %v2835_v39, 5  ;;  %v6211_v21 = vld [vmem:[%s7495_s3 + $0xa0] sm:$0xff]   ;;  %v3127_v60 = vld [vmem:[#allocation3 + $0x28] sm:$0xe]  ;;  %v3126_v8 = vld [vmem:[#allocation3 + $0x20] sm:$0xe] }
 0x23b   : > { %v2819_v43 = vrot.slane %v2818_v12, 4  ;;  %v7129_v53 = vsel %vm6542_vm12, %v5088_v55, %v3160_v35  ;;  %v5091_v18 = vrot.slane %v3128_v22, 9  ;;  %v3172_v16 = vrot.slane %v2725_v3, 5  ;;  %v6200_v3 = vld [vmem:[%s7495_s3 + $0x20] sm:$0xff]   ;;  %v3502_v55 = vld [vmem:[#allocation3 + $0x8] sm:$0xf] }
 0x23c   : > { %5770 = vmatprep.mubr.bf16.mxu1 %v5063_v45  ;;  %v2833_v50 = vrot.slane %v2832_v15, 4  ;;  %v5110_v30 = vcombine.low %v7123_v1, %v7129_v53  ;;  %v5092_v31 = vrot.slane %v3129_v28, 9  ;;  %v3176_v61 = vrot.slane %v2726_v13, 5  ;;  %v6215_v12 = vld [vmem:[%s7495_s3 + $0xc0] sm:$0xff]   ;;  %v6221_v45 = vld [vmem:[%s7495_s3 + $0xe8] sm:$0xff]   ;;  %v6222_v15 = vld [vmem:[%s7495_s3 + $0xf0] sm:$0xff]  }
 0x23d   : > { %5777 = vmatpush3.bf16.msra.mxu1 %v6196_v63  ;;  %v2824_v48 = vsel %vm6433_vm9, %v2819_v43, %v2823_v46  ;;  %v7140_v0 = vsel %vm6542_vm12, %v5091_v18, %v3172_v16  ;;  %v5073_v4 = vcombine.low %v6999_v25, %v7040_v27  ;;  %v6201_v25 = vld [vmem:[%s7495_s3 + $0x28] sm:$0xff]   ;;  %v6202_v27 = vld [vmem:[%s7495_s3 + $0x30] sm:$0xff]   ;;  %v5074_v5 = vcombine.low %v7054_v2, %v7059_v9  ;;  %v6218_v43 = vld [vmem:[#allocation3 + $0x8] ss:$8 sps:$4 sm:$0xff]  }
 0x23e   : > { %5778 = vmatprep.subr.bf16.mxu1 %v6197_v41  ;;  %v2838_v24 = vsel %vm6433_vm9, %v2833_v50, %v2837_v52  ;;  %v7146_v34 = vsel %vm6542_vm12, %v5092_v31, %v3176_v61  ;;  %v5075_v13 = vcombine.low %v7075_v29, %v7082_v42  ;;  %v3148_v17 = vrot.slane %v7007_v6, 5  ;;  %v6209_v2 = vld [vmem:[%s7495_s3 + $0x90] sm:$0xff]   ;;  %v6220_v44 = vld [vmem:[%s7495_s3 + $0xe0] sm:$0xff]   ;;  %v6223_v28 = vld [vmem:[%s7495_s3 + $0xf8] sm:$0xff]  }
 0x23f   : > { %v5064_v63 = vcombine.low %v2824_v48, %v2838_v24  ;;  %v5112_v56 = vcombine.low %v7140_v0, %v7146_v34  ;;  %v3152_v14 = vrot.slane %v7050_v58, 5  ;;  %v5085_v57 = vrot.slane %v3122_v26, 9  ;;  %v6210_v58 = vld [vmem:[%s7495_s3 + $0x98] sm:$0xff]   ;;  %v3504_v46 = vld [vmem:[#allocation3 + $0x10] sm:$0xf] }
 0x240   : > { %v5086_v20 = vrot.slane %v3123_v47, 9  ;;  %v5076_v6 = vcombine.low %v7099_v62, %v7094_v33  ;;  %v6212_v33 = vld [vmem:[%s7495_s3 + $0xa8] sm:$0xff]   ;;  %v6213_v62 = vld [vmem:[%s7495_s3 + $0xb0] sm:$0xff]   ;;  %v5090_v23 = vrot.slane %v3127_v60, 9  ;;  %v3168_v32 = vrot.slane %v7091_v51, 5 }
 0x241   : > { %5779 = vmatpush3.bf16.msra.mxu1 %v6197_v41  ;;  %v3149_v9 = vsel %vm6542_vm12, %v5085_v57, %v3148_v17  ;;  %v5089_v35 = vrot.slane %v3126_v8, 9  ;;  %v3164_v36 = vrot.slane %v7088_v49, 5  ;;  %v6216_v51 = vld [vmem:[%s7495_s3 + $0xc8] sm:$0xff]   ;;  %v6217_v49 = vld [vmem:[%s7495_s3 + $0xd0] sm:$0xff]   ;;  %v6219_v41 = vld [vmem:[%s7495_s3 + $0xd8] sm:$0xff]   ;;  %v3533_v22 = vshrl.u32 %v3504_v46, 16 }
 0x242   : > { %5771 = vmatmul.mubr.bf16.gmra.mrb[4].mxu1 %v5064_v63  ;;  %5780 = vmatprep.subr.bf16.mxu1 %v6199_v54  ;;  %v3153_v29 = vsel %vm6542_vm12, %v5086_v20, %v3152_v14  ;;  %v3169_v39 = vsel %vm6542_vm12, %v5090_v23, %v3168_v32  ;;  %v3536_v1 = vshll.u32 %v3504_v46, 16  ;;  %v3519_v48 = vshrl.u32 %v3502_v55, 16  ;;  %v7237_v16 = vld [vmem:[#allocation3 + $0x14] sm:$0x1]  ;;  %v7239_v31 = vld [vmem:[#allocation3 + $0xc] sm:$0x1] }
 0x243   : > { %5790 = vmatprep.mubr.bf16.mxu1 %v5073_v4  ;;  %v5109_v42 = vcombine.low %v3149_v9, %v3153_v29  ;;  %v3165_v40 = vsel %vm6542_vm12, %v5089_v35, %v3164_v36  ;;  %v3522_v50 = vshll.u32 %v3502_v55, 16  ;;  %v3535_v52 = vrot.slane %v3533_v22, 4  ;;  %v6224_v61 = vld [vmem:[#allocation3 + $0x18] ss:$8 sps:$4 sm:$0xff]   ;;  %v6226_v34 = vld [vmem:[#allocation3 + $0x28] ss:$8 sps:$4 sm:$0xff]  }
 0x244   : > { %v5111_v10 = vcombine.low %v3165_v40, %v3169_v39  ;;  %v3538_v53 = vrot.slane %v3536_v1, 5  ;;  %v6227_v63 = vld [vmem:[%s7495_s3 + $0x108] sm:$0xff]   ;;  %v3542_v4 = vshll.u32 %v7237_v16, 16  ;;  %v3508_v17 = vld [vmem:[#allocation3 + $0x20] sm:$0xf]  ;;  %v6231_v57 = vld [vmem:[%s7495_s3 + $0x120] sm:$0xff]  }
 0x245   : > { %5781 = vmatpush3.bf16.msra.mxu1 %v6199_v54  ;;  %v6225_v54 = vld [vmem:[%s7495_s3 + $0x100] sm:$0xff]   ;;  %v3524_v18 = vrot.slane %v3522_v50, 5  ;;  %v6228_v47 = vld [vmem:[#allocation3 + $0x38] ss:$8 sps:$4 sm:$0xff]   ;;  %v3564_v9 = vshll.u32 %v3508_v17, 16  ;;  %v6234_v50 = vld [vmem:[%s7495_s3 + $0x138] sm:$0xff]  }
 0x246   : > { %5782 = vmatprep.subr.bf16.mxu1 %v6200_v3  ;;  %v3539_v24 = vor.u32 %v3538_v53, %v3535_v52  ;;  %v3512_v14 = vld [vmem:[#allocation3 + $0x30] sm:$0xf]  ;;  %v3506_v20 = vld [vmem:[#allocation3 + $0x18] sm:$0xf]  ;;  %v3510_v29 = vld [vmem:[#allocation3 + $0x28] sm:$0xf] }
 0x247   : > { %v3578_v60 = vshll.u32 %v3510_v29, 16  ;;  %v3566_v8 = vrot.slane %v3564_v9, 5  ;;  %v6233_v35 = vld [vmem:[%s7495_s3 + $0x130] sm:$0xff]   ;;  %v7269_v46 = vld [vmem:[#allocation3 + $0x1c] sm:$0x1] }
 0x248   : > { %v7265_v40 = vld [vmem:[#allocation3 + $0x24] sm:$0x1]  ;;  %v7272_v1 = vld [vmem:[#allocation3 + $0x2c] sm:$0x1] }
 0x249   : > { %5783 = vmatpush3.bf16.msra.mxu1 %v6200_v3  ;;  %v3528_v3 = vshll.u32 %v7239_v31, 16  ;;  %v3570_v22 = vshll.u32 %v7265_v40, 16 }
 0x24a   : > { %5784 = vmatprep.subr.bf16.mxu1 %v6201_v25 }
 0x24d   : > { %5785 = vmatpush3.bf16.msra.mxu1 %v6201_v25  ;;  %v6229_v25 = vld [vmem:[%s7495_s3 + $0x110] sm:$0xff]  }
 0x24e   : > { %5786 = vmatprep.subr.bf16.mxu1 %v6202_v27 }
 0x251   : > { %5787 = vmatpush3.bf16.msra.mxu1 %v6202_v27 }
 0x252   : > { %5788 = vmatprep.subr.bf16.mxu1 %v6203_v38 }
 0x255   : > { %5789 = vmatpush3.bf16.msra.mxu1 %v6203_v38  ;;  %v3544_v38 = vrot.slane %v3542_v4, 5  ;;  %v3572_v4 = vrot.slane %v3570_v22, 5  ;;  %v3786_v22 = vld [vmem:[#allocation3 + $0x18] sm:$0xe] }
 0x256   : > { %5798 = vmatprep.subr.bf16.mxu1 %v6205_v59 }
 0x258   : > { %5791 = vmatmul.mubr.bf16.vlgmr.msra.gmra.mrb[0].mxu1 %v5074_v5 }
 0x259   : > { %5794 = vmatprep.mubr.bf16.mxu1 %v5075_v13  ;;  %5799 = vmatpush3.bf16.msra.mxu1 %v6205_v59  ;;  %v3530_v59 = vrot.slane %v3528_v3, 5 }
 0x25a   : > { %5800 = vmatprep.subr.bf16.mxu1 %v6207_v11 }
 0x25d   : > { %5801 = vmatpush3.bf16.msra.mxu1 %v6207_v11  ;;  %v6230_v11 = vld [vmem:[%s7495_s3 + $0x118] sm:$0xff]  }
 0x25e   : > { %5802 = vmatprep.subr.bf16.mxu1 %v6209_v2 }
 0x260   : > { %5795 = vmatmul.mubr.bf16.gmra.mrb[4].mxu1 %v5076_v6  ;;  %v3589_v6 = vshrl.u32 %v3512_v14, 16 }
 0x261   : > { %5803 = vmatpush3.bf16.msra.mxu1 %v6209_v2  ;;  %5814 = vmatprep.mubr.bf16.mxu1 %v5109_v42  ;;  %v3561_v2 = vshrl.u32 %v3508_v17, 16  ;;  %v3547_v42 = vshrl.u32 %v3506_v20, 16 }
 0x262   : > { %5804 = vmatprep.subr.bf16.mxu1 %v6210_v58  ;;  %v3591_v23 = vrot.slane %v3589_v6, 4 }
 0x263   : > { %v3549_v36 = vrot.slane %v3547_v42, 4 }
 0x265   : > { %5805 = vmatpush3.bf16.msra.mxu1 %v6210_v58  ;;  %v3592_v58 = vshll.u32 %v3512_v14, 16 }
 0x266   : > { %5806 = vmatprep.subr.bf16.mxu1 %v6211_v21 }
 0x267   : > { %v3594_v32 = vrot.slane %v3592_v58, 5 }
 0x269   : > { %5807 = vmatpush3.bf16.msra.mxu1 %v6211_v21  ;;  %v3550_v21 = vshll.u32 %v3506_v20, 16  ;;  %v3785_v20 = vld [vmem:[#allocation3 + $0x10] sm:$0xe] }
 0x26a   : > { %5808 = vmatprep.subr.bf16.mxu1 %v6212_v33 }
 0x26b   : > { %v3552_v39 = vrot.slane %v3550_v21, 5  ;;  %v3784_v21 = vld [vmem:[#allocation3 + $0x8] sm:$0xe] }
 0x26d   : > { %5809 = vmatpush3.bf16.msra.mxu1 %v6212_v33  ;;  %v6232_v33 = vld [vmem:[%s7495_s3 + $0x128] sm:$0xff]   ;;  %v3553_v55 = vor.u32 %v3552_v39, %v3549_v36 }
 0x26e   : > { %5810 = vmatprep.subr.bf16.mxu1 %v6213_v62 }
 0x271   : > { %5811 = vmatpush3.bf16.msra.mxu1 %v6213_v62  ;;  %v3575_v62 = vshrl.u32 %v3510_v29, 16  ;;  %v6236_v29 = vld [vmem:[%s7495_s3 + $0x148] sm:$0xff]  }
 0x272   : > { %5812 = vmatprep.subr.bf16.mxu1 %v6214_v19 }
 0x275   : > { %5813 = vmatpush3.bf16.msra.mxu1 %v6214_v19  ;;  %v3563_v19 = vrot.slane %v3561_v2, 4 }
 0x276   : > { %5822 = vmatprep.subr.bf16.mxu1 %v6215_v12 }
 0x278   : > { %5815 = vmatmul.mubr.bf16.vlgmr.msra.gmra.mrb[0].mxu1 %v5110_v30  ;;  %v3521_v30 = vrot.slane %v3519_v48, 4 }
 0x279   : > { %5818 = vmatprep.mubr.bf16.mxu1 %v5111_v10  ;;  %5823 = vmatpush3.bf16.msra.mxu1 %v6215_v12  ;;  %v3516_v12 = vld [vmem:[#allocation3 + $0x40] sm:$0xf]  ;;  %v3580_v10 = vrot.slane %v3578_v60, 5 }
 0x27a   : > { %5824 = vmatprep.subr.bf16.mxu1 %v6216_v51  ;;  %v3525_v0 = vor.u32 %v3524_v18, %v3521_v30 }
 0x27c   : > { %v3526_v27 = vrot.slane %v3525_v0, 4  ;;  %v3554_v0 = vrot.slane %v3553_v55, 4  ;;  %v6242_v55 = vld [vmem:[%s7495_s3 + $0x178] sm:$0xff]  }
 0x27d   : > { %5825 = vmatpush3.bf16.msra.mxu1 %v6216_v51  ;;  %v3577_v51 = vrot.slane %v3575_v62, 4  ;;  %v3814_v62 = vrot.slane %v7237_v16, 5 }
 0x27e   : > { %5826 = vmatprep.subr.bf16.mxu1 %v6217_v49  ;;  %v3531_v5 = vsel %vm6433_vm9, %v3526_v27, %v3530_v59 }
 0x27f   : > { %v3581_v52 = vor.u32 %v3580_v10, %v3577_v51 }
 0x280   : > { %5819 = vmatmul.mubr.bf16.gmra.mrb[4].mxu1 %v5112_v56  ;;  %v3540_v56 = vrot.slane %v3539_v24, 4 }
 0x281   : > { %5827 = vmatpush3.bf16.msra.mxu1 %v6217_v49  ;;  %5838 = vmatprep.mubr.bf16.mxu1 %v6218_v43  ;;  %v3514_v49 = vld [vmem:[#allocation3 + $0x38] sm:$0xf]  ;;  %v7267_v43 = vld [vmem:[#allocation3 + $0x34] sm:$0x1] }
 0x282   : > { %5828 = vmatprep.subr.bf16.mxu1 %v6219_v41  ;;  %v3545_v26 = vsel %vm6433_vm9, %v3540_v56, %v3544_v38  ;;  %v3606_v48 = vshll.u32 %v3514_v49, 16  ;;  %v3598_v53 = vshll.u32 %v7267_v43, 16  ;;  %v6235_v56 = vld [vmem:[%s7495_s3 + $0x140] sm:$0xff]   ;;  %v7283_v38 = vld [vmem:[#allocation3 + $0x44] sm:$0x1] }
 0x283   : > { %v5165_v13 = vcombine.low %v3531_v5, %v3545_v26 }
 0x284   : > { %v3608_v3 = vrot.slane %v3606_v48, 5  ;;  %v3600_v27 = vrot.slane %v3598_v53, 5  ;;  %v3822_v48 = vrot.slane %v7265_v40, 5  ;;  %v3830_v53 = vrot.slane %v7267_v43, 5 }
 0x285   : > { %5829 = vmatpush3.bf16.msra.mxu1 %v6219_v41  ;;  %v3567_v41 = vor.u32 %v3566_v8, %v3563_v19  ;;  %v6237_v8 = vld [vmem:[%s7495_s3 + $0x150] sm:$0xff]  }
 0x286   : > { %5830 = vmatprep.subr.bf16.mxu1 %v6220_v44 }
 0x287   : > { %v3568_v30 = vrot.slane %v3567_v41, 4  ;;  %v6240_v41 = vld [vmem:[%s7495_s3 + $0x168] sm:$0xff]  }
 0x289   : > { %5831 = vmatpush3.bf16.msra.mxu1 %v6220_v44  ;;  %v3617_v44 = vshrl.u32 %v3516_v12, 16  ;;  %v3573_v26 = vsel %vm6433_vm9, %v3568_v30, %v3572_v4  ;;  %v3818_v30 = vrot.slane %v7269_v46, 5 }
 0x28a   : > { %5832 = vmatprep.subr.bf16.mxu1 %v6221_v45 }
 0x28b   : > { %v3619_v18 = vrot.slane %v3617_v44, 4  ;;  %v6241_v44 = vld [vmem:[%s7495_s3 + $0x170] sm:$0xff]  }
 0x28d   : > { %5833 = vmatpush3.bf16.msra.mxu1 %v6221_v45  ;;  %v3620_v45 = vshll.u32 %v3516_v12, 16 }
 0x28e   : > { %5834 = vmatprep.subr.bf16.mxu1 %v6222_v15 }
 0x28f   : > { %v3622_v24 = vrot.slane %v3620_v45, 5  ;;  %v3787_v45 = vld [vmem:[#allocation3 + $0x20] sm:$0xe] }
 0x291   : > { %5835 = vmatpush3.bf16.msra.mxu1 %v6222_v15  ;;  %v3595_v15 = vor.u32 %v3594_v32, %v3591_v23  ;;  %v5177_v23 = vrot.slane %v3784_v21, 9  ;;  %v3810_v32 = vrot.slane %v7239_v31, 5  ;;  %v6238_v31 = vld [vmem:[%s7495_s3 + $0x158] sm:$0xff]  }
 0x292   : > { %5836 = vmatprep.subr.bf16.mxu1 %v6223_v28 }
 0x293   : > { %v3811_v51 = vsel %vm6542_vm12, %v5177_v23, %v3810_v32  ;;  %v7375_v32 = vld [vmem:[#allocation3 + $0x1c] sm:$0x1] }
 0x295   : > { %5837 = vmatpush3.bf16.msra.mxu1 %v6223_v28  ;;  %v3603_v28 = vshrl.u32 %v3514_v49, 16  ;;  %v6239_v49 = vld [vmem:[%s7495_s3 + $0x160] sm:$0xff]  }
 0x296   : > { %5846 = vmatprep.subr.bf16.mxu1 %v6225_v54 }
 0x298   : > { %5839 = vmatmul.mubr.bf16.vlgmr.msra.gmra.mrb[0].mxu1 %v6224_v61  ;;  %v3584_v61 = vshll.u32 %v7272_v1, 16 }
 0x299   : > { %5842 = vmatprep.mubr.bf16.mxu1 %v6226_v34  ;;  %5847 = vmatpush3.bf16.msra.mxu1 %v6225_v54  ;;  %v3556_v54 = vshll.u32 %v7269_v46, 16  ;;  %v3605_v34 = vrot.slane %v3603_v28, 4  ;;  %v5180_v28 = vrot.slane %v3787_v45, 9 }
 0x29a   : > { %5848 = vmatprep.subr.bf16.mxu1 %v6227_v63  ;;  %v3586_v5 = vrot.slane %v3584_v61, 5  ;;  %v3826_v61 = vrot.slane %v7272_v1, 5  ;;  %v6244_v1 = vld [vmem:[%s7495_s3 + $0x188] sm:$0xff]  }
 0x29b   : > { %v3558_v59 = vrot.slane %v3556_v54, 5  ;;  %v3609_v14 = vor.u32 %v3608_v3, %v3605_v34  ;;  %v5179_v54 = vrot.slane %v3786_v22, 9  ;;  %v3790_v34 = vld [vmem:[#allocation3 + $0x38] sm:$0xe]  ;;  %v6258_v22 = vld [vmem:[%s7495_s3 + $0x1d8] sm:$0xff]  }
 0x29d   : > { %5849 = vmatpush3.bf16.msra.mxu1 %v6227_v63  ;;  %v3596_v63 = vrot.slane %v3595_v15, 4  ;;  %v3559_v17 = vsel %vm6433_vm9, %v3554_v0, %v3558_v59  ;;  %v3610_v60 = vrot.slane %v3609_v14, 4  ;;  %v3789_v15 = vld [vmem:[#allocation3 + $0x30] sm:$0xe]  ;;  %v3791_v0 = vld [vmem:[#allocation3 + $0x40] sm:$0xe]  ;;  %v3819_v43 = vsel %vm6542_vm12, %v5179_v54, %v3818_v30 }
 0x29e   : > { %5850 = vmatprep.subr.bf16.mxu1 %v6229_v25  ;;  %v5166_v2 = vcombine.low %v3559_v17, %v3573_v26  ;;  %v6245_v26 = vld [vmem:[%s7495_s3 + $0x190] sm:$0xff]   ;;  %v6246_v17 = vld [vmem:[#allocation3 + $0x10] ss:$8 sps:$4 sm:$0xff]  }
 0x29f   : > { %v6249_v14 = vld [vmem:[%s7495_s3 + $0x1a8] sm:$0xff]  }
 0x2a0   : > { %5843 = vmatmul.mubr.bf16.gmra.mrb[4].mxu1 %v6228_v47  ;;  %v3623_v47 = vor.u32 %v3622_v24, %v3619_v18  ;;  %v6243_v18 = vld [vmem:[%s7495_s3 + $0x180] sm:$0xff]  }
 0x2a1   : > { %5851 = vmatpush3.bf16.msra.mxu1 %v6229_v25  ;;  %5862 = vmatprep.mubr.bf16.mxu1 %v5165_v13  ;;  %v3582_v25 = vrot.slane %v3581_v52, 4  ;;  %v7289_v13 = vld [vmem:[#allocation3 + $0x3c] sm:$0x1]  ;;  %v5182_v52 = vrot.slane %v3789_v15, 9  ;;  %v6256_v15 = vld [vmem:[#allocation3 + $0x40] ss:$8 sps:$4 sm:$0xff]  }
 0x2a2   : > { %5852 = vmatprep.subr.bf16.mxu1 %v6230_v11  ;;  %v3612_v58 = vshll.u32 %v7289_v13, 16  ;;  %v3624_v42 = vrot.slane %v3623_v47, 4  ;;  %v3834_v59 = vrot.slane %v7289_v13, 5  ;;  %v6248_v13 = vld [vmem:[%s7495_s3 + $0x1a0] sm:$0xff]  }
 0x2a3   : > { %v3587_v9 = vsel %vm6433_vm9, %v3582_v25, %v3586_v5  ;;  %v3831_v40 = vsel %vm6542_vm12, %v5182_v52, %v3830_v53  ;;  %v3838_v25 = vrot.slane %v7283_v38, 5  ;;  %v6259_v52 = vld [vmem:[%s7495_s3 + $0x1e0] sm:$0xff]   ;;  %v4169_v53 = vld [vmem:[#allocation3 + $0x20] sm:$0xf] }
 0x2a4   : > { %v3614_v12 = vrot.slane %v3612_v58, 5 }
 0x2a5   : > { %5853 = vmatpush3.bf16.msra.mxu1 %v6230_v11  ;;  %v3601_v11 = vsel %vm6433_vm9, %v3596_v63, %v3600_v27  ;;  %v3823_v63 = vsel %vm6542_vm12, %v5180_v28, %v3822_v48  ;;  %v5183_v27 = vrot.slane %v3790_v34, 9  ;;  %v4171_v48 = vld [vmem:[#allocation3 + $0x28] sm:$0xf] }
 0x2a6   : > { %5854 = vmatprep.subr.bf16.mxu1 %v6231_v57  ;;  %v5167_v6 = vcombine.low %v3587_v9, %v3601_v11  ;;  %v3615_v16 = vsel %vm6433_vm9, %v3610_v60, %v3614_v12  ;;  %v5202_v46 = vcombine.low %v3819_v43, %v3823_v63  ;;  %v6252_v12 = vld [vmem:[#allocation3 + $0x20] ss:$8 sps:$4 sm:$0xff]   ;;  %v4224_v54 = vshrl.u32 %v4171_v48, 16 }
 0x2a7   : > { %v3835_v5 = vsel %vm6542_vm12, %v5183_v27, %v3834_v59  ;;  %v4227_v30 = vshll.u32 %v4171_v48, 16  ;;  %v4210_v63 = vshrl.u32 %v4169_v53, 16 }
 0x2a9   : > { %5855 = vmatpush3.bf16.msra.mxu1 %v6231_v57  ;;  %v3626_v57 = vshll.u32 %v7283_v38, 16  ;;  %v6247_v38 = vld [vmem:[%s7495_s3 + $0x198] sm:$0xff]   ;;  %v4229_v34 = vrot.slane %v4227_v30, 5  ;;  %v4212_v27 = vrot.slane %v4210_v63, 4 }
 0x2aa   : > { %5856 = vmatprep.subr.bf16.mxu1 %v6232_v33 }
 0x2ab   : > { %v3628_v19 = vrot.slane %v3626_v57, 5  ;;  %v4165_v57 = vld [vmem:[#allocation3 + $0x10] sm:$0xf] }
 0x2ac   : > { %v4182_v9 = vshrl.u32 %v4165_v57, 16 }
 0x2ad   : > { %5857 = vmatpush3.bf16.msra.mxu1 %v6232_v33  ;;  %v5178_v33 = vrot.slane %v3785_v20, 9  ;;  %v6250_v20 = vld [vmem:[%s7495_s3 + $0x1b0] sm:$0xff]  }
 0x2ae   : > { %5858 = vmatprep.subr.bf16.mxu1 %v6233_v35  ;;  %v4184_v21 = vrot.slane %v4182_v9, 4 }
 0x2af   : > { %v3815_v36 = vsel %vm6542_vm12, %v5178_v33, %v3814_v62  ;;  %v6253_v62 = vld [vmem:[%s7495_s3 + $0x1c0] sm:$0xff]  }
 0x2b0   : > { %v5201_v10 = vcombine.low %v3811_v51, %v3815_v36 }
 0x2b1   : > { %5859 = vmatpush3.bf16.msra.mxu1 %v6233_v35  ;;  %v3629_v35 = vsel %vm6433_vm9, %v3624_v42, %v3628_v19 }
 0x2b2   : > { %5860 = vmatprep.subr.bf16.mxu1 %v6234_v50  ;;  %v5168_v39 = vcombine.low %v3615_v16, %v3629_v35  ;;  %v6255_v35 = vld [vmem:[%s7495_s3 + $0x1c8] sm:$0xff]  }
 0x2b5   : > { %5861 = vmatpush3.bf16.msra.mxu1 %v6234_v50  ;;  %v3788_v50 = vld [vmem:[#allocation3 + $0x28] sm:$0xe] }
 0x2b6   : > { %5870 = vmatprep.subr.bf16.mxu1 %v6235_v56  ;;  %v5181_v24 = vrot.slane %v3788_v50, 9  ;;  %v4173_v50 = vld [vmem:[#allocation3 + $0x30] sm:$0xf] }
 0x2b8   : > { %5863 = vmatmul.mubr.bf16.vlgmr.msra.gmra.mrb[0].mxu1 %v5166_v2  ;;  %v3827_v4 = vsel %vm6542_vm12, %v5181_v24, %v3826_v61  ;;  %v4167_v2 = vld [vmem:[#allocation3 + $0x18] sm:$0xf]  ;;  %v4238_v24 = vshrl.u32 %v4173_v50, 16  ;;  %v4241_v61 = vshll.u32 %v4173_v50, 16 }
 0x2b9   : > { %5866 = vmatprep.mubr.bf16.mxu1 %v5167_v6  ;;  %5871 = vmatpush3.bf16.msra.mxu1 %v6235_v56  ;;  %v5203_v3 = vcombine.low %v3827_v4, %v3831_v40  ;;  %v5184_v56 = vrot.slane %v3791_v0, 9  ;;  %v6251_v6 = vld [vmem:[%s7495_s3 + $0x1b8] sm:$0xff]   ;;  %v4196_v58 = vshrl.u32 %v4167_v2, 16  ;;  %v4199_v42 = vshll.u32 %v4167_v2, 16  ;;  %v6260_v0 = vld [vmem:[%s7495_s3 + $0x1e8] sm:$0xff]  }
 0x2ba   : > { %5872 = vmatprep.subr.bf16.mxu1 %v6236_v29  ;;  %v4213_v40 = vshll.u32 %v4169_v53, 16  ;;  %v4179_v4 = vld [vmem:[#allocation3 + $0x48] sm:$0xf]  ;;  %v7405_v2 = vld [vmem:[#allocation3 + $0x24] sm:$0x1] }
 0x2bb   : > { %v3839_v47 = vsel %vm6542_vm12, %v5184_v56, %v3838_v25  ;;  %v4198_v60 = vrot.slane %v4196_v58, 4  ;;  %v4201_v19 = vrot.slane %v4199_v42, 5  ;;  %v4243_v56 = vrot.slane %v4241_v61, 5  ;;  %v4177_v25 = vld [vmem:[#allocation3 + $0x40] sm:$0xf]  ;;  %v6262_v42 = vld [vmem:[%s7495_s3 + $0x1f8] sm:$0xff]  }
 0x2bc   : > { %v5204_v11 = vcombine.low %v3835_v5, %v3839_v47  ;;  %v4215_v59 = vrot.slane %v4213_v40, 5  ;;  %v6261_v47 = vld [vmem:[%s7495_s3 + $0x1f0] sm:$0xff]   ;;  %v7401_v5 = vld [vmem:[#allocation3 + $0x2c] sm:$0x1]  ;;  %v7408_v58 = vld [vmem:[#allocation3 + $0x3c] sm:$0x1] }
 0x2bd   : > { %5873 = vmatpush3.bf16.msra.mxu1 %v6236_v29  ;;  %v4185_v29 = vshll.u32 %v4165_v57, 16  ;;  %v4202_v16 = vor.u32 %v4201_v19, %v4198_v60  ;;  %v4266_v57 = vshrl.u32 %v4177_v25, 16  ;;  %v4219_v19 = vshll.u32 %v7405_v2, 16 }
 0x2be   : > { %5874 = vmatprep.subr.bf16.mxu1 %v6237_v8 }
 0x2bf   : > { %v4187_v33 = vrot.slane %v4185_v29, 5  ;;  %v4216_v29 = vor.u32 %v4215_v59, %v4212_v27 }
 0x2c0   : > { %5867 = vmatmul.mubr.bf16.gmra.mrb[4].mxu1 %v5168_v39  ;;  %v6254_v39 = vld [vmem:[#allocation3 + $0x30] ss:$8 sps:$4 sm:$0xff]  }
 0x2c1   : > { %5875 = vmatpush3.bf16.msra.mxu1 %v6237_v8  ;;  %5886 = vmatprep.mubr.bf16.mxu1 %v5201_v10  ;;  %v7373_v8 = vld [vmem:[#allocation3 + $0x14] sm:$0x1]  ;;  %v4188_v23 = vor.u32 %v4187_v33, %v4184_v21  ;;  %v6257_v10 = vld [vmem:[%s7495_s3 + $0x1d0] sm:$0xff]  }
 0x2c2   : > { %5876 = vmatprep.subr.bf16.mxu1 %v6238_v31  ;;  %v4191_v36 = vshll.u32 %v7373_v8, 16 }
 0x2c3   : > { %v4189_v51 = vrot.slane %v4188_v23, 4 }
 0x2c5   : > { %5877 = vmatpush3.bf16.msra.mxu1 %v6238_v31  ;;  %v4205_v31 = vshll.u32 %v7375_v32, 16 }
 0x2c6   : > { %5878 = vmatprep.subr.bf16.mxu1 %v6239_v49 }
 0x2c7   : > { %v4207_v45 = vrot.slane %v4205_v31, 5  ;;  %v7416_v31 = vld [vmem:[#allocation3 + $0x4c] sm:$0x1] }
 0x2c9   : > { %5879 = vmatpush3.bf16.msra.mxu1 %v6239_v49  ;;  %v4193_v49 = vrot.slane %v4191_v36, 5 }
 0x2ca   : > { %5880 = vmatprep.subr.bf16.mxu1 %v6240_v41 }
 0x2cd   : > { %5881 = vmatpush3.bf16.msra.mxu1 %v6240_v41  ;;  %v4203_v41 = vrot.slane %v4202_v16, 4  ;;  %v4261_v16 = vshll.u32 %v7408_v58, 16 }
 0x2ce   : > { %5882 = vmatprep.subr.bf16.mxu1 %v6241_v44 }
 0x2cf   : > { %v4263_v50 = vrot.slane %v4261_v16, 5 }
 0x2d1   : > { %5883 = vmatpush3.bf16.msra.mxu1 %v6241_v44  ;;  %v4194_v44 = vsel %vm6433_vm9, %v4189_v51, %v4193_v49 }
 0x2d2   : > { %5884 = vmatprep.subr.bf16.mxu1 %v6242_v55 }
 0x2d5   : > { %5885 = vmatpush3.bf16.msra.mxu1 %v6242_v55  ;;  %v4208_v55 = vsel %vm6433_vm9, %v4203_v41, %v4207_v45 }
 0x2d6   : > { %5894 = vmatprep.subr.bf16.mxu1 %v6243_v18  ;;  %v5257_v28 = vcombine.low %v4194_v44, %v4208_v55  ;;  %v7421_v44 = vld [vmem:[#allocation3 + $0x44] sm:$0x1] }
 0x2d7   : > { %v4275_v53 = vshll.u32 %v7421_v44, 16 }
 0x2d8   : > { %5887 = vmatmul.mubr.bf16.vlgmr.msra.gmra.mrb[0].mxu1 %v5202_v46 }
 0x2d9   : > { %5890 = vmatprep.mubr.bf16.mxu1 %v5203_v3  ;;  %5895 = vmatpush3.bf16.msra.mxu1 %v6243_v18  ;;  %v4175_v18 = vld [vmem:[#allocation3 + $0x38] sm:$0xf]  ;;  %v4240_v3 = vrot.slane %v4238_v24, 4 }
 0x2da   : > { %5896 = vmatprep.subr.bf16.mxu1 %v6244_v1  ;;  %v4252_v43 = vshrl.u32 %v4175_v18, 16  ;;  %v4255_v46 = vshll.u32 %v4175_v18, 16  ;;  %v6264_v24 = vld [vmem:[%s7495_s3 + $0x208] sm:$0xff]  }
 0x2db   : > { %v4244_v9 = vor.u32 %v4243_v56, %v4240_v3  ;;  %v4477_v56 = vrot.slane %v7375_v32, 5 }
 0x2dd   : > { %5897 = vmatpush3.bf16.msra.mxu1 %v6244_v1  ;;  %v4226_v1 = vrot.slane %v4224_v54, 4  ;;  %v4245_v36 = vrot.slane %v4244_v9, 4  ;;  %v4447_v54 = vld [vmem:[#allocation3 + $0x10] sm:$0xe] }
 0x2de   : > { %5898 = vmatprep.subr.bf16.mxu1 %v6245_v26 }
 0x2e0   : > { %5891 = vmatmul.mubr.bf16.gmra.mrb[4].mxu1 %v5204_v11  ;;  %v4254_v11 = vrot.slane %v4252_v43, 4  ;;  %v4448_v43 = vld [vmem:[#allocation3 + $0x18] sm:$0xe] }
 0x2e1   : > { %5899 = vmatpush3.bf16.msra.mxu1 %v6245_v26  ;;  %5910 = vmatprep.mubr.bf16.mxu1 %v6246_v17  ;;  %v4280_v26 = vshrl.u32 %v4179_v4, 16  ;;  %v4283_v17 = vshll.u32 %v4179_v4, 16  ;;  %v4473_v4 = vrot.slane %v7373_v8, 5  ;;  %v5270_v3 = vrot.slane %v4448_v43, 9 }
 0x2e2   : > { %5900 = vmatprep.subr.bf16.mxu1 %v6247_v38 }
 0x2e3   : > { %v4285_v60 = vrot.slane %v4283_v17, 5  ;;  %v4450_v17 = vld [vmem:[#allocation3 + $0x28] sm:$0xe] }
 0x2e4   : > { %v5272_v9 = vrot.slane %v4450_v17, 9 }
 0x2e5   : > { %5901 = vmatpush3.bf16.msra.mxu1 %v6247_v38  ;;  %v4257_v38 = vrot.slane %v4255_v46, 5  ;;  %v5269_v46 = vrot.slane %v4447_v54, 9 }
 0x2e6   : > { %5902 = vmatprep.subr.bf16.mxu1 %v6248_v13 }
 0x2e7   : > { %v4258_v33 = vor.u32 %v4257_v38, %v4254_v11  ;;  %v4474_v8 = vsel %vm6542_vm12, %v5269_v46, %v4473_v4  ;;  %v6268_v11 = vld [vmem:[%s7495_s3 + $0x228] sm:$0xff]   ;;  %v6269_v38 = vld [vmem:[%s7495_s3 + $0x230] sm:$0xff]  }
 0x2e9   : > { %5903 = vmatpush3.bf16.msra.mxu1 %v6248_v13  ;;  %v4230_v13 = vor.u32 %v4229_v34, %v4226_v1  ;;  %v4259_v41 = vrot.slane %v4258_v33, 4  ;;  %v4277_v1 = vrot.slane %v4275_v53, 5  ;;  %v6265_v34 = vld [vmem:[%s7495_s3 + $0x210] sm:$0xff]  }
 0x2ea   : > { %5904 = vmatprep.subr.bf16.mxu1 %v6249_v14 }
 0x2eb   : > { %v4231_v23 = vrot.slane %v4230_v13, 4  ;;  %v4264_v18 = vsel %vm6433_vm9, %v4259_v41, %v4263_v50  ;;  %v4451_v13 = vld [vmem:[#allocation3 + $0x30] sm:$0xe] }
 0x2ed   : > { %5905 = vmatpush3.bf16.msra.mxu1 %v6249_v14  ;;  %v7403_v14 = vld [vmem:[#allocation3 + $0x34] sm:$0x1] }
 0x2ee   : > { %5906 = vmatprep.subr.bf16.mxu1 %v6250_v20  ;;  %v4247_v21 = vshll.u32 %v7403_v14, 16 }
 0x2f0   : > { %v4249_v49 = vrot.slane %v4247_v21, 5  ;;  %v4489_v21 = vrot.slane %v7403_v14, 5 }
 0x2f1   : > { %5907 = vmatpush3.bf16.msra.mxu1 %v6250_v20  ;;  %v4269_v20 = vshll.u32 %v4177_v25, 16 }
 0x2f2   : > { %5908 = vmatprep.subr.bf16.mxu1 %v6251_v6  ;;  %v4250_v48 = vsel %vm6433_vm9, %v4245_v36, %v4249_v49 }
 0x2f3   : > { %v5259_v61 = vcombine.low %v4250_v48, %v4264_v18 }
 0x2f5   : > { %5909 = vmatpush3.bf16.msra.mxu1 %v6251_v6  ;;  %v4233_v6 = vshll.u32 %v7401_v5, 16 }
 0x2f6   : > { %5918 = vmatprep.subr.bf16.mxu1 %v6253_v62 }
 0x2f7   : > { %v4235_v51 = vrot.slane %v4233_v6, 5  ;;  %v4452_v6 = vld [vmem:[#allocation3 + $0x38] sm:$0xe] }
 0x2f8   : > { %5911 = vmatmul.mubr.bf16.vlgmr.msra.gmra.mrb[0].mxu1 %v6252_v12  ;;  %v4268_v12 = vrot.slane %v4266_v57, 4  ;;  %v6270_v57 = vld [vmem:[%s7495_s3 + $0x238] sm:$0xff]  }
 0x2f9   : > { %5914 = vmatprep.mubr.bf16.mxu1 %v6254_v39  ;;  %5919 = vmatpush3.bf16.msra.mxu1 %v6253_v62  ;;  %v4282_v62 = vrot.slane %v4280_v26, 4  ;;  %v4217_v39 = vrot.slane %v4216_v29, 4  ;;  %v4236_v55 = vsel %vm6433_vm9, %v4231_v23, %v4235_v51  ;;  %v4478_v26 = vsel %vm6542_vm12, %v5270_v3, %v4477_v56 }
 0x2fa   : > { %5920 = vmatprep.subr.bf16.mxu1 %v6255_v35  ;;  %v5293_v32 = vcombine.low %v4474_v8, %v4478_v26  ;;  %v4485_v29 = vrot.slane %v7401_v5, 5  ;;  %v4453_v5 = vld [vmem:[#allocation3 + $0x40] sm:$0xe]  ;;  %v4497_v51 = vrot.slane %v7421_v44, 5 }
 0x2fb   : > { %v4286_v45 = vor.u32 %v4285_v60, %v4282_v62  ;;  %v4481_v62 = vrot.slane %v7405_v2, 5  ;;  %v5274_v60 = vrot.slane %v4452_v6, 9 }
 0x2fc   : > { %v4486_v23 = vsel %vm6542_vm12, %v5272_v9, %v4485_v29 }
 0x2fd   : > { %5921 = vmatpush3.bf16.msra.mxu1 %v6255_v35  ;;  %v4271_v35 = vrot.slane %v4269_v20, 5  ;;  %v4287_v40 = vrot.slane %v4286_v45, 4  ;;  %v4449_v20 = vld [vmem:[#allocation3 + $0x20] sm:$0xe] }
 0x2fe   : > { %5922 = vmatprep.subr.bf16.mxu1 %v6257_v10  ;;  %v5271_v33 = vrot.slane %v4449_v20, 9 }
 0x300   : > { %5915 = vmatmul.mubr.bf16.gmra.mrb[4].mxu1 %v6256_v15  ;;  %v4221_v15 = vrot.slane %v4219_v19, 5  ;;  %v4493_v19 = vrot.slane %v7408_v58, 5  ;;  %v4482_v14 = vsel %vm6542_vm12, %v5271_v33, %v4481_v62  ;;  %v5275_v58 = vrot.slane %v4453_v5, 9 }
 0x301   : > { %5923 = vmatpush3.bf16.msra.mxu1 %v6257_v10  ;;  %5934 = vmatprep.mubr.bf16.mxu1 %v5257_v28  ;;  %v6263_v10 = vld [vmem:[%s7495_s3 + $0x200] sm:$0xff]   ;;  %v4289_v28 = vshll.u32 %v7416_v31, 16  ;;  %v5294_v36 = vcombine.low %v4482_v14, %v4486_v23 }
 0x302   : > { %5924 = vmatprep.subr.bf16.mxu1 %v6258_v22  ;;  %v4494_v2 = vsel %vm6542_vm12, %v5274_v60, %v4493_v19  ;;  %v4498_v49 = vsel %vm6542_vm12, %v5275_v58, %v4497_v51 }
 0x305   : > { %5925 = vmatpush3.bf16.msra.mxu1 %v6258_v22  ;;  %v4272_v22 = vor.u32 %v4271_v35, %v4268_v12  ;;  %v4454_v12 = vld [vmem:[#allocation3 + $0x48] sm:$0xe] }
 0x306   : > { %5926 = vmatprep.subr.bf16.mxu1 %v6259_v52  ;;  %v5276_v16 = vrot.slane %v4454_v12, 9 }
 0x307   : > { %v4273_v63 = vrot.slane %v4272_v22, 4 }
 0x309   : > { %5927 = vmatpush3.bf16.msra.mxu1 %v6259_v52  ;;  %v4222_v52 = vsel %vm6433_vm9, %v4217_v39, %v4221_v15  ;;  %v4278_v25 = vsel %vm6433_vm9, %v4273_v63, %v4277_v1  ;;  %v5305_v15 = vld [vmem:[%s7496_s4] ss:$0 sm:$0xff] }
 0x30a   : > { %5928 = vmatprep.subr.bf16.mxu1 %v6260_v0  ;;  %v5258_v30 = vcombine.low %v4222_v52, %v4236_v55 }
 0x30d   : > { %5929 = vmatpush3.bf16.msra.mxu1 %v6260_v0  ;;  %v4291_v0 = vrot.slane %v4289_v28, 5 }
 0x30e   : > { %5930 = vmatprep.subr.bf16.mxu1 %v6261_v47 }
 0x30f   : > { %v4292_v27 = vsel %vm6433_vm9, %v4287_v40, %v4291_v0 }
 0x310   : > { %v5260_v59 = vcombine.low %v4278_v25, %v4292_v27 }
 0x311   : > { %5931 = vmatpush3.bf16.msra.mxu1 %v6261_v47  ;;  %v6266_v47 = vld [vmem:[%s7495_s3 + $0x218] sm:$0xff]  }
 0x312   : > { %5932 = vmatprep.subr.bf16.mxu1 %v6262_v42 }
 0x315   : > { %5933 = vmatpush3.bf16.msra.mxu1 %v6262_v42  ;;  %v5273_v42 = vrot.slane %v4451_v13, 9 }
 0x316   : > { %5942 = vmatprep.subr.bf16.mxu1 %v6263_v10 }
 0x317   : > { %v4490_v35 = vsel %vm6542_vm12, %v5273_v42, %v4489_v21 }
 0x318   : > { %5935 = vmatmul.mubr.bf16.vlgmr.msra.gmra.mrb[0].mxu1 %v5258_v30  ;;  %v5295_v39 = vcombine.low %v4490_v35, %v4494_v2 }
 0x319   : > { %5938 = vmatprep.mubr.bf16.mxu1 %v5259_v61  ;;  %5943 = vmatpush3.bf16.msra.mxu1 %v6263_v10  ;;  %v4501_v10 = vrot.slane %v7416_v31, 5 }
 0x31a   : > { %5944 = vmatprep.subr.bf16.mxu1 %v6264_v24 }
 0x31b   : > { %v4502_v41 = vsel %vm6542_vm12, %v5276_v16, %v4501_v10 }
 0x31c   : > { %v5296_v45 = vcombine.low %v4498_v49, %v4502_v41 }
 0x31d   : > { %5945 = vmatpush3.bf16.msra.mxu1 %v6264_v24 }
 0x31e   : > { %5946 = vmatprep.subr.bf16.mxu1 %v6265_v34 }
 0x320   : > { %5939 = vmatmul.mubr.bf16.gmra.mrb[4].mxu1 %v5260_v59 }
 0x321   : > { %5947 = vmatpush3.bf16.msra.mxu1 %v6265_v34  ;;  %5958 = vmatprep.mubr.bf16.mxu1 %v5293_v32 }
 0x322   : > { %5948 = vmatprep.subr.bf16.mxu1 %v6266_v47 }
 0x325   : > { %5949 = vmatpush3.bf16.msra.mxu1 %v6266_v47 }
 0x326   : > { %5950 = vmatprep.subr.bf16.mxu1 %v6267_v37 }
 0x329   : > { %5951 = vmatpush3.bf16.msra.mxu1 %v6267_v37 }
 0x32a   : > { %5952 = vmatprep.subr.bf16.mxu1 %v6268_v11 }
 0x32d   : > { %5953 = vmatpush3.bf16.msra.mxu1 %v6268_v11 }
 0x32e   : > { %5954 = vmatprep.subr.bf16.mxu1 %v6269_v38 }
 0x331   : > { %5955 = vmatpush3.bf16.msra.mxu1 %v6269_v38 }
 0x332   : > { %5956 = vmatprep.subr.bf16.mxu1 %v6270_v57 }
 0x335   : > { %5957 = vmatpush3.bf16.msra.mxu1 %v6270_v57 }
 0x338   : > { %5959 = vmatmul.mubr.bf16.vlgmr.msra.gmra.mrb[0].mxu1 %v5294_v36 }
 0x339   : > { %5962 = vmatprep.mubr.bf16.mxu1 %v5295_v39 }
 0x340   : > { %5963 = vmatmul.mubr.bf16.gmra.mrb[4].mxu1 %v5296_v45 }
 0x40b   : > { %v5960_v55 = vpop.f32.mrb[0].mxu1 }
 0x40c   : > { %v4666_v22 = vadd.f32 %v5960_v55, %v5305_v15  ;;  %v4618_v44 = vpop.f32.mrb[1].mxu1 }
 0x40d   : > { %v4664_v31 = vadd.f32 %v5305_v15, %v4618_v44  ;;  %v5961_v28 = vpop.f32.mrb[2].mxu1 }
 0x40e   : > { %v4674_v48 = vmax.f32 %v4666_v22, 0.0  ;;  %v4667_v50 = vadd.f32 %v5961_v28, %v5305_v15  ;;  %v4621_v7 = vpop.f32.mrb[3].mxu1 }
 0x40f   : > { %v4672_v52 = vmax.f32 %v4664_v31, 0.0  ;;  %v4665_v53 = vadd.f32 %v5305_v15, %v4621_v7 }
 0x410   : > { %4682 = vst [vmem:[%s224_s20 + $0x10] sm:$0xff] %v4674_v48  ;;  %v4675_v54 = vmax.f32 %v4667_v50, 0.0 }
 0x411   : > { %4680 = vst [vmem:[%s224_s20] sm:$0xff] %v4672_v52  ;;  %v4673_v30 = vmax.f32 %v4665_v53, 0.0 }
 0x412   : > { %4683 = vst [vmem:[%s224_s20 + $0x18] sm:$0xff] %v4675_v54 }
 0x413   : > { %4681 = vst [vmem:[%s224_s20 + $0x8] sm:$0xff] %v4673_v30  ;;  %v5964_v18 = vpop.f32.mrb[4].mxu1 }
 0x414   : > { %v4670_v24 = vadd.f32 %v5964_v18, %v5305_v15  ;;  %v4634_v61 = vpop.f32.mrb[5].mxu1 }
 0x415   : > { %v4668_v63 = vadd.f32 %v5305_v15, %v4634_v61  ;;  %v5965_v40 = vpop.f32.mrb[6].mxu1 }
 0x416   : > { %v4678_v0 = vmax.f32 %v4670_v24, 0.0  ;;  %v4671_v43 = vadd.f32 %v5965_v40, %v5305_v15  ;;  %v4637_v46 = vpop.f32.mrb[7].mxu1 }
 0x417   : > { %v4676_v4 = vmax.f32 %v4668_v63, 0.0  ;;  %v4669_v1 = vadd.f32 %v5305_v15, %v4637_v46 }
 0x418   : > { %4686 = vst [vmem:[%s224_s20 + $0x30] sm:$0xff] %v4678_v0  ;;  %v4679_v34 = vmax.f32 %v4671_v43, 0.0 }
 0x419   : > { %4684 = vst [vmem:[%s224_s20 + $0x20] sm:$0xff] %v4676_v4  ;;  %v4677_v3 = vmax.f32 %v4669_v1, 0.0 }
 0x41a   : > { %4687 = vst [vmem:[%s224_s20 + $0x38] sm:$0xff] %v4679_v34 }
 0x41b   : > { %4685 = vst [vmem:[%s224_s20 + $0x28] sm:$0xff] %v4677_v3 }
 0x41c PF: > { %s15_s18 = sadd.s32 1, %s6277_s18  }
 0x41d   : > { %p12_p4 = scmp.ge.s32.totalorder %s15_s18, 4  }
 0x41f   :  { %14 = sbr.rel (!%p12_p4) target bundleno = 1 (0x1), region = 95 }

</bundles_post_ra>
